<compile_context>
chip_gen: v7x
topology: tpu7x:2x2x1
jax: 0.10.0
libtpu: 0.0.40
codegen_flags: <defaults>
</compile_context>

<pallas_src>
import functools
import math

import jax
import jax.numpy as jnp
from jax.experimental import pallas as pl
from jax.experimental.pallas import tpu as pltpu


def _shift_flat(val, pos, delta, hwp):
    """s[p] = val[p - delta] for 0 <= p - delta < hwp, else 0.0.

    `pos` is the exact (integer-valued f32) flat-index vector.  Both rotation
    directions of pltpu.roll are issued and the one whose rolled index probe
    matches p - delta is selected, so correctness does not depend on the roll
    sign convention (XLU rolls are cheap; EUP sin dominates this kernel).
    """
    s = delta % hwp                      # static python ints
    tgt = pos - float(delta)             # exact non-modular source index
    a = pltpu.roll(val, shift=s, axis=1)
    ap = pltpu.roll(pos, shift=s, axis=1)
    ok_a = ap == tgt
    b = pltpu.roll(val, shift=hwp - s, axis=1)
    bp = pltpu.roll(pos, shift=hwp - s, axis=1)
    ok_b = jnp.logical_and(bp == tgt, jnp.logical_not(ok_a))
    return jnp.where(ok_a, a, jnp.where(ok_b, b, jnp.zeros_like(val)))


def _pos_embed_kernel(mask_ref, pos_ref, row_ref, col_ref, inv_ref, ph_ref,
                      out_ref, *, H, W, HWP, F, normalize, scale):
    m = mask_ref[...]        # (1, HWP) f32 flattened mask (zero padded tail)
    pos = pos_ref[...]       # (1, HWP) f32: flat index p
    row = row_ref[...]       # (1, HWP) f32: p // W
    col = col_ref[...]       # (1, HWP) f32: p %  W

    # ---- cumsum over W (x_embed) and over H (y_embed): log-step scans ------
    x = m
    d = 1
    while d < W:
        x = x + jnp.where(col >= d, _shift_flat(x, pos, d, HWP), 0.0)
        d *= 2
    y = m
    d = 1
    while d < H:
        y = y + jnp.where(row >= d, _shift_flat(y, pos, d * W, HWP), 0.0)
        d *= 2

    if normalize:
        # Broadcast the last element of every image row / column (== the row /
        # column total of the cumsum) to the whole row / column.
        dx = x
        d = 1
        while d < W:
            dx = jnp.where(col < (W - d), _shift_flat(dx, pos, -d, HWP), dx)
            d *= 2
        dy = y
        d = 1
        while d < H:
            dy = jnp.where(row < (H - d), _shift_flat(dy, pos, -d * W, HWP), dy)
            d *= 2
        x = x / (dx + 1e-6) * scale
        y = y / (dy + 1e-6) * scale

    # ---- channels on sublanes, pixels on lanes; cos(a) == sin(a + pi/2) ----
    inv = inv_ref[...]       # (2F, 1): rows [0,F) -> pos_y, [F,2F) -> pos_x
    ph = ph_ref[...]         # (2F, 1): 0.0 (sin, even ch) / pi/2 (cos, odd ch)
    out_ref[0:F, :] = jnp.sin(y * inv[0:F] + ph[0:F])                 # pos_y
    out_ref[F:2 * F, :] = jnp.sin(x * inv[F:2 * F] + ph[F:2 * F])     # pos_x


@functools.partial(jax.jit, static_argnames=(
    "num_pos_feats", "temperatureH", "temperatureW", "normalize", "scale"))
def position_embedding_sine_hw(m, num_pos_feats=64, temperatureH=10000,
                               temperatureW=10000, normalize=False, scale=None):
    if scale is not None and normalize is False:
        raise ValueError("normalize should be True if scale is passed")
    if scale is None:
        scale = 2 * math.pi
    scale = float(scale)

    mask = jnp.squeeze(m, axis=1).astype(jnp.float32)        # (B, H, W)
    B, H, W = mask.shape
    F = num_pos_feats
    HW = H * W
    assert HW < (1 << 24), "flat index must stay exactly representable in f32"
    HWP = pl.cdiv(HW, 128) * 128                             # lane-dense padding

    mask_flat = mask.reshape(B, HW)
    if HWP != HW:
        mask_flat = jnp.pad(mask_flat, ((0, 0), (0, HWP - HW)))
    mask_flat = mask_flat.reshape(B, 1, HWP)

    # Tiny per-call constants (constant-folded under jit).
    p_i = jnp.arange(HWP, dtype=jnp.int32)
    pos = p_i.astype(jnp.float32).reshape(1, HWP)
    row = (p_i // W).astype(jnp.float32).reshape(1, HWP)
    col = (p_i % W).astype(jnp.float32).reshape(1, HWP)

    j = jnp.arange(F, dtype=jnp.float32)
    expo = 2.0 * jnp.floor(j / 2.0) / F
    inv = jnp.concatenate([1.0 / jnp.float32(temperatureH) ** expo,
                           1.0 / jnp.float32(temperatureW) ** expo]
                          ).reshape(2 * F, 1).astype(jnp.float32)
    ph_half = jnp.where(jnp.arange(F) % 2 == 1, 0.5 * math.pi, 0.0)
    ph = jnp.concatenate([ph_half, ph_half]).reshape(2 * F, 1).astype(jnp.float32)

    kernel = functools.partial(_pos_embed_kernel, H=H, W=W, HWP=HWP, F=F,
                               normalize=normalize, scale=scale)

    out = pl.pallas_call(
        kernel,
        out_shape=jax.ShapeDtypeStruct((B, 2 * F, HWP), jnp.float32),
        grid=(B,),
        in_specs=[
            pl.BlockSpec((None, 1, HWP), lambda b: (b, 0, 0)),   # mask, per batch
            pl.BlockSpec((1, HWP), lambda b: (0, 0)),            # flat index p
            pl.BlockSpec((1, HWP), lambda b: (0, 0)),            # row index
            pl.BlockSpec((1, HWP), lambda b: (0, 0)),            # col index
            pl.BlockSpec((2 * F, 1), lambda b: (0, 0)),          # 1 / divisors
            pl.BlockSpec((2 * F, 1), lambda b: (0, 0)),          # sin/cos phase
        ],
        out_specs=pl.BlockSpec((None, 2 * F, HWP), lambda b: (b, 0, 0)),
        compiler_params=pltpu.CompilerParams(
            dimension_semantics=("parallel",)),
    )(mask_flat, pos, row, col, inv, ph)

    if HWP != HW:
        out = out[:, :, :HW]
    # Row-major split of the flat spatial dim -> NCHW; no data reordering.
    return out.reshape(B, 2 * F, H, W)


def _reference(m, num_pos_feats, temperatureH, temperatureW, normalize, scale):
    """Pure-JAX mirror of the PyTorch forward (for verification)."""
    mask = jnp.squeeze(m, axis=1)
    y_embed = jnp.cumsum(mask, axis=1, dtype=jnp.float32)
    x_embed = jnp.cumsum(mask, axis=2, dtype=jnp.float32)
    if normalize:
        eps = 1e-6
        y_embed = y_embed / (y_embed[:, -1:, :] + eps) * scale
        x_embed = x_embed / (x_embed[:, :, -1:] + eps) * scale
    dim_tx = jnp.arange(num_pos_feats, dtype=jnp.float32)
    dim_tx = jnp.float32(temperatureW) ** (2 * jnp.floor(dim_tx / 2) / num_pos_feats)
    pos_x = x_embed[:, :, :, None] / dim_tx
    dim_ty = jnp.arange(num_pos_feats, dtype=jnp.float32)
    dim_ty = jnp.float32(temperatureH) ** (2 * jnp.floor(dim_ty / 2) / num_pos_feats)
    pos_y = y_embed[:, :, :, None] / dim_ty
    B, H, W, _ = pos_x.shape
    pos_x = jnp.stack((jnp.sin(pos_x[:, :, :, 0::2]),
                       jnp.cos(pos_x[:, :, :, 1::2])), axis=4).reshape(B, H, W, -1)
    pos_y = jnp.stack((jnp.sin(pos_y[:, :, :, 0::2]),
                       jnp.cos(pos_y[:, :, :, 1::2])), axis=4).reshape(B, H, W, -1)
    pos = jnp.concatenate((pos_y, pos_x), axis=3).transpose(0, 3, 1, 2)
    return pos


if __name__ == "__main__":
    key = jax.random.PRNGKey(0)
    B, H, W = 2, 16, 16
    F = 32  # num_pos_feats -> 2F = 64 output channels

    # DETR-style binary padding mask, shape (B, 1, H, W), float32.
    m = (jax.random.uniform(key, (B, 1, H, W)) > 0.3).astype(jnp.float32)

    for normalize in (False, True):
        out = position_embedding_sine_hw(m, num_pos_feats=F, normalize=normalize)
        out = jax.block_until_ready(out)
        ref = _reference(m, F, 10000, 10000, normalize, 2 * math.pi)
        assert out.shape == (B, 2 * F, H, W), out.shape
        assert out.dtype == jnp.float32, out.dtype
        err = float(jnp.max(jnp.abs(out - ref)))
        assert jnp.allclose(out, ref, atol=1e-3, rtol=1e-3), err

    print("KERNEL_OK")
</pallas_src>

<mosaic_0001>
module attributes {stable_mosaic.version = 11 : i64} {
  func.func @_pos_embed_kernel(%arg0: i32, %arg1: memref<1x1x256xf32, #tpu.memory_space<vmem>>, %arg2: memref<1x256xf32, #tpu.memory_space<vmem>>, %arg3: memref<1x256xf32, #tpu.memory_space<vmem>>, %arg4: memref<1x256xf32, #tpu.memory_space<vmem>>, %arg5: memref<64x1xf32, #tpu.memory_space<vmem>>, %arg6: memref<64x1xf32, #tpu.memory_space<vmem>>, %arg7: memref<1x64x256xf32, #tpu.memory_space<vmem>>) attributes {dimension_semantics = [#tpu.dimension_semantics<parallel>], iteration_bounds = array<i64: 2>, scalar_prefetch = 0 : i64, scratch_operands = 0 : i64, tpu.core_type = #tpu.core_type<tc>, window_params = [{transform_indices = @transform_0, window_bounds = array<i64: 1, 1, 256>}, {pipeline_mode = #tpu.pipeline_mode<synchronous>, transform_indices = @transform_1, window_bounds = array<i64: 1, 256>}, {pipeline_mode = #tpu.pipeline_mode<synchronous>, transform_indices = @transform_2, window_bounds = array<i64: 1, 256>}, {pipeline_mode = #tpu.pipeline_mode<synchronous>, transform_indices = @transform_3, window_bounds = array<i64: 1, 256>}, {pipeline_mode = #tpu.pipeline_mode<synchronous>, transform_indices = @transform_4, window_bounds = array<i64: 64, 1>}, {pipeline_mode = #tpu.pipeline_mode<synchronous>, transform_indices = @transform_5, window_bounds = array<i64: 64, 1>}, {transform_indices = @transform_6, window_bounds = array<i64: 1, 64, 256>}]} {
    %c0 = arith.constant 0 : index
    %c0_0 = arith.constant 0 : index
    %c0_1 = arith.constant 0 : index
    %0 = vector.load %arg1[%c0, %c0_0, %c0_1] : memref<1x1x256xf32, #tpu.memory_space<vmem>>, vector<1x1x256xf32>
    %1 = vector.shape_cast %0 : vector<1x1x256xf32> to vector<1x256xf32>
    %c0_2 = arith.constant 0 : index
    %c0_3 = arith.constant 0 : index
    %2 = vector.load %arg2[%c0_2, %c0_3] : memref<1x256xf32, #tpu.memory_space<vmem>>, vector<1x256xf32>
    %c0_4 = arith.constant 0 : index
    %c0_5 = arith.constant 0 : index
    %3 = vector.load %arg3[%c0_4, %c0_5] : memref<1x256xf32, #tpu.memory_space<vmem>>, vector<1x256xf32>
    %c0_6 = arith.constant 0 : index
    %c0_7 = arith.constant 0 : index
    %4 = vector.load %arg4[%c0_6, %c0_7] : memref<1x256xf32, #tpu.memory_space<vmem>>, vector<1x256xf32>
    %cst = arith.constant 1.000000e+00 : f32
    %5 = vector.broadcast %cst : f32 to vector<1x256xf32>
    %6 = arith.cmpf oge, %4, %5 : vector<1x256xf32>
    %cst_8 = arith.constant 1.000000e+00 : f32
    %7 = vector.broadcast %cst_8 : f32 to vector<1x256xf32>
    %8 = arith.subf %2, %7 : vector<1x256xf32>
    %c1_i32 = arith.constant 1 : i32
    %9 = tpu.dynamic_rotate %1 by %c1_i32 dim 1 : vector<1x256xf32>, i32 -> vector<1x256xf32>
    %c1_i32_9 = arith.constant 1 : i32
    %10 = tpu.dynamic_rotate %2 by %c1_i32_9 dim 1 : vector<1x256xf32>, i32 -> vector<1x256xf32>
    %11 = arith.cmpf oeq, %10, %8 : vector<1x256xf32>
    %c255_i32 = arith.constant 255 : i32
    %12 = tpu.dynamic_rotate %1 by %c255_i32 dim 1 : vector<1x256xf32>, i32 -> vector<1x256xf32>
    %c255_i32_10 = arith.constant 255 : i32
    %13 = tpu.dynamic_rotate %2 by %c255_i32_10 dim 1 : vector<1x256xf32>, i32 -> vector<1x256xf32>
    %14 = arith.cmpf oeq, %13, %8 : vector<1x256xf32>
    %cst_11 = arith.constant dense<true> : vector<1x256xi1>
    %15 = arith.xori %11, %cst_11 : vector<1x256xi1>
    %16 = arith.andi %14, %15 : vector<1x256xi1>
    %cst_12 = arith.constant 0.000000e+00 : f32
    %17 = vector.broadcast %cst_12 : f32 to vector<1x256xf32>
    %18 = arith.select %16, %12, %17 : vector<1x256xi1>, vector<1x256xf32>
    %19 = arith.select %11, %9, %18 : vector<1x256xi1>, vector<1x256xf32>
    %cst_13 = arith.constant 0.000000e+00 : f32
    %20 = vector.broadcast %cst_13 : f32 to vector<1x256xf32>
    %21 = arith.select %6, %19, %20 : vector<1x256xi1>, vector<1x256xf32>
    %22 = arith.addf %1, %21 : vector<1x256xf32>
    %cst_14 = arith.constant 2.000000e+00 : f32
    %23 = vector.broadcast %cst_14 : f32 to vector<1x256xf32>
    %24 = arith.cmpf oge, %4, %23 : vector<1x256xf32>
    %cst_15 = arith.constant 2.000000e+00 : f32
    %25 = vector.broadcast %cst_15 : f32 to vector<1x256xf32>
    %26 = arith.subf %2, %25 : vector<1x256xf32>
    %c2_i32 = arith.constant 2 : i32
    %27 = tpu.dynamic_rotate %22 by %c2_i32 dim 1 : vector<1x256xf32>, i32 -> vector<1x256xf32>
    %c2_i32_16 = arith.constant 2 : i32
    %28 = tpu.dynamic_rotate %2 by %c2_i32_16 dim 1 : vector<1x256xf32>, i32 -> vector<1x256xf32>
    %29 = arith.cmpf oeq, %28, %26 : vector<1x256xf32>
    %c254_i32 = arith.constant 254 : i32
    %30 = tpu.dynamic_rotate %22 by %c254_i32 dim 1 : vector<1x256xf32>, i32 -> vector<1x256xf32>
    %c254_i32_17 = arith.constant 254 : i32
    %31 = tpu.dynamic_rotate %2 by %c254_i32_17 dim 1 : vector<1x256xf32>, i32 -> vector<1x256xf32>
    %32 = arith.cmpf oeq, %31, %26 : vector<1x256xf32>
    %cst_18 = arith.constant dense<true> : vector<1x256xi1>
    %33 = arith.xori %29, %cst_18 : vector<1x256xi1>
    %34 = arith.andi %32, %33 : vector<1x256xi1>
    %cst_19 = arith.constant 0.000000e+00 : f32
    %35 = vector.broadcast %cst_19 : f32 to vector<1x256xf32>
    %36 = arith.select %34, %30, %35 : vector<1x256xi1>, vector<1x256xf32>
    %37 = arith.select %29, %27, %36 : vector<1x256xi1>, vector<1x256xf32>
    %cst_20 = arith.constant 0.000000e+00 : f32
    %38 = vector.broadcast %cst_20 : f32 to vector<1x256xf32>
    %39 = arith.select %24, %37, %38 : vector<1x256xi1>, vector<1x256xf32>
    %40 = arith.addf %22, %39 : vector<1x256xf32>
    %cst_21 = arith.constant 4.000000e+00 : f32
    %41 = vector.broadcast %cst_21 : f32 to vector<1x256xf32>
    %42 = arith.cmpf oge, %4, %41 : vector<1x256xf32>
    %cst_22 = arith.constant 4.000000e+00 : f32
    %43 = vector.broadcast %cst_22 : f32 to vector<1x256xf32>
    %44 = arith.subf %2, %43 : vector<1x256xf32>
    %c4_i32 = arith.constant 4 : i32
    %45 = tpu.dynamic_rotate %40 by %c4_i32 dim 1 : vector<1x256xf32>, i32 -> vector<1x256xf32>
    %c4_i32_23 = arith.constant 4 : i32
    %46 = tpu.dynamic_rotate %2 by %c4_i32_23 dim 1 : vector<1x256xf32>, i32 -> vector<1x256xf32>
    %47 = arith.cmpf oeq, %46, %44 : vector<1x256xf32>
    %c252_i32 = arith.constant 252 : i32
    %48 = tpu.dynamic_rotate %40 by %c252_i32 dim 1 : vector<1x256xf32>, i32 -> vector<1x256xf32>
    %c252_i32_24 = arith.constant 252 : i32
    %49 = tpu.dynamic_rotate %2 by %c252_i32_24 dim 1 : vector<1x256xf32>, i32 -> vector<1x256xf32>
    %50 = arith.cmpf oeq, %49, %44 : vector<1x256xf32>
    %cst_25 = arith.constant dense<true> : vector<1x256xi1>
    %51 = arith.xori %47, %cst_25 : vector<1x256xi1>
    %52 = arith.andi %50, %51 : vector<1x256xi1>
    %cst_26 = arith.constant 0.000000e+00 : f32
    %53 = vector.broadcast %cst_26 : f32 to vector<1x256xf32>
    %54 = arith.select %52, %48, %53 : vector<1x256xi1>, vector<1x256xf32>
    %55 = arith.select %47, %45, %54 : vector<1x256xi1>, vector<1x256xf32>
    %cst_27 = arith.constant 0.000000e+00 : f32
    %56 = vector.broadcast %cst_27 : f32 to vector<1x256xf32>
    %57 = arith.select %42, %55, %56 : vector<1x256xi1>, vector<1x256xf32>
    %58 = arith.addf %40, %57 : vector<1x256xf32>
    %cst_28 = arith.constant 8.000000e+00 : f32
    %59 = vector.broadcast %cst_28 : f32 to vector<1x256xf32>
    %60 = arith.cmpf oge, %4, %59 : vector<1x256xf32>
    %cst_29 = arith.constant 8.000000e+00 : f32
    %61 = vector.broadcast %cst_29 : f32 to vector<1x256xf32>
    %62 = arith.subf %2, %61 : vector<1x256xf32>
    %c8_i32 = arith.constant 8 : i32
    %63 = tpu.dynamic_rotate %58 by %c8_i32 dim 1 : vector<1x256xf32>, i32 -> vector<1x256xf32>
    %c8_i32_30 = arith.constant 8 : i32
    %64 = tpu.dynamic_rotate %2 by %c8_i32_30 dim 1 : vector<1x256xf32>, i32 -> vector<1x256xf32>
    %65 = arith.cmpf oeq, %64, %62 : vector<1x256xf32>
    %c248_i32 = arith.constant 248 : i32
    %66 = tpu.dynamic_rotate %58 by %c248_i32 dim 1 : vector<1x256xf32>, i32 -> vector<1x256xf32>
    %c248_i32_31 = arith.constant 248 : i32
    %67 = tpu.dynamic_rotate %2 by %c248_i32_31 dim 1 : vector<1x256xf32>, i32 -> vector<1x256xf32>
    %68 = arith.cmpf oeq, %67, %62 : vector<1x256xf32>
    %cst_32 = arith.constant dense<true> : vector<1x256xi1>
    %69 = arith.xori %65, %cst_32 : vector<1x256xi1>
    %70 = arith.andi %68, %69 : vector<1x256xi1>
    %cst_33 = arith.constant 0.000000e+00 : f32
    %71 = vector.broadcast %cst_33 : f32 to vector<1x256xf32>
    %72 = arith.select %70, %66, %71 : vector<1x256xi1>, vector<1x256xf32>
    %73 = arith.select %65, %63, %72 : vector<1x256xi1>, vector<1x256xf32>
    %cst_34 = arith.constant 0.000000e+00 : f32
    %74 = vector.broadcast %cst_34 : f32 to vector<1x256xf32>
    %75 = arith.select %60, %73, %74 : vector<1x256xi1>, vector<1x256xf32>
    %76 = arith.addf %58, %75 : vector<1x256xf32>
    %cst_35 = arith.constant 1.000000e+00 : f32
    %77 = vector.broadcast %cst_35 : f32 to vector<1x256xf32>
    %78 = arith.cmpf oge, %3, %77 : vector<1x256xf32>
    %cst_36 = arith.constant 1.600000e+01 : f32
    %79 = vector.broadcast %cst_36 : f32 to vector<1x256xf32>
    %80 = arith.subf %2, %79 : vector<1x256xf32>
    %c16_i32 = arith.constant 16 : i32
    %81 = tpu.dynamic_rotate %1 by %c16_i32 dim 1 : vector<1x256xf32>, i32 -> vector<1x256xf32>
    %c16_i32_37 = arith.constant 16 : i32
    %82 = tpu.dynamic_rotate %2 by %c16_i32_37 dim 1 : vector<1x256xf32>, i32 -> vector<1x256xf32>
    %83 = arith.cmpf oeq, %82, %80 : vector<1x256xf32>
    %c240_i32 = arith.constant 240 : i32
    %84 = tpu.dynamic_rotate %1 by %c240_i32 dim 1 : vector<1x256xf32>, i32 -> vector<1x256xf32>
    %c240_i32_38 = arith.constant 240 : i32
    %85 = tpu.dynamic_rotate %2 by %c240_i32_38 dim 1 : vector<1x256xf32>, i32 -> vector<1x256xf32>
    %86 = arith.cmpf oeq, %85, %80 : vector<1x256xf32>
    %cst_39 = arith.constant dense<true> : vector<1x256xi1>
    %87 = arith.xori %83, %cst_39 : vector<1x256xi1>
    %88 = arith.andi %86, %87 : vector<1x256xi1>
    %cst_40 = arith.constant 0.000000e+00 : f32
    %89 = vector.broadcast %cst_40 : f32 to vector<1x256xf32>
    %90 = arith.select %88, %84, %89 : vector<1x256xi1>, vector<1x256xf32>
    %91 = arith.select %83, %81, %90 : vector<1x256xi1>, vector<1x256xf32>
    %cst_41 = arith.constant 0.000000e+00 : f32
    %92 = vector.broadcast %cst_41 : f32 to vector<1x256xf32>
    %93 = arith.select %78, %91, %92 : vector<1x256xi1>, vector<1x256xf32>
    %94 = arith.addf %1, %93 : vector<1x256xf32>
    %cst_42 = arith.constant 2.000000e+00 : f32
    %95 = vector.broadcast %cst_42 : f32 to vector<1x256xf32>
    %96 = arith.cmpf oge, %3, %95 : vector<1x256xf32>
    %cst_43 = arith.constant 3.200000e+01 : f32
    %97 = vector.broadcast %cst_43 : f32 to vector<1x256xf32>
    %98 = arith.subf %2, %97 : vector<1x256xf32>
    %c32_i32 = arith.constant 32 : i32
    %99 = tpu.dynamic_rotate %94 by %c32_i32 dim 1 : vector<1x256xf32>, i32 -> vector<1x256xf32>
    %c32_i32_44 = arith.constant 32 : i32
    %100 = tpu.dynamic_rotate %2 by %c32_i32_44 dim 1 : vector<1x256xf32>, i32 -> vector<1x256xf32>
    %101 = arith.cmpf oeq, %100, %98 : vector<1x256xf32>
    %c224_i32 = arith.constant 224 : i32
    %102 = tpu.dynamic_rotate %94 by %c224_i32 dim 1 : vector<1x256xf32>, i32 -> vector<1x256xf32>
    %c224_i32_45 = arith.constant 224 : i32
    %103 = tpu.dynamic_rotate %2 by %c224_i32_45 dim 1 : vector<1x256xf32>, i32 -> vector<1x256xf32>
    %104 = arith.cmpf oeq, %103, %98 : vector<1x256xf32>
    %cst_46 = arith.constant dense<true> : vector<1x256xi1>
    %105 = arith.xori %101, %cst_46 : vector<1x256xi1>
    %106 = arith.andi %104, %105 : vector<1x256xi1>
    %cst_47 = arith.constant 0.000000e+00 : f32
    %107 = vector.broadcast %cst_47 : f32 to vector<1x256xf32>
    %108 = arith.select %106, %102, %107 : vector<1x256xi1>, vector<1x256xf32>
    %109 = arith.select %101, %99, %108 : vector<1x256xi1>, vector<1x256xf32>
    %cst_48 = arith.constant 0.000000e+00 : f32
    %110 = vector.broadcast %cst_48 : f32 to vector<1x256xf32>
    %111 = arith.select %96, %109, %110 : vector<1x256xi1>, vector<1x256xf32>
    %112 = arith.addf %94, %111 : vector<1x256xf32>
    %cst_49 = arith.constant 4.000000e+00 : f32
    %113 = vector.broadcast %cst_49 : f32 to vector<1x256xf32>
    %114 = arith.cmpf oge, %3, %113 : vector<1x256xf32>
    %cst_50 = arith.constant 6.400000e+01 : f32
    %115 = vector.broadcast %cst_50 : f32 to vector<1x256xf32>
    %116 = arith.subf %2, %115 : vector<1x256xf32>
    %c64_i32 = arith.constant 64 : i32
    %117 = tpu.dynamic_rotate %112 by %c64_i32 dim 1 : vector<1x256xf32>, i32 -> vector<1x256xf32>
    %c64_i32_51 = arith.constant 64 : i32
    %118 = tpu.dynamic_rotate %2 by %c64_i32_51 dim 1 : vector<1x256xf32>, i32 -> vector<1x256xf32>
    %119 = arith.cmpf oeq, %118, %116 : vector<1x256xf32>
    %c192_i32 = arith.constant 192 : i32
    %120 = tpu.dynamic_rotate %112 by %c192_i32 dim 1 : vector<1x256xf32>, i32 -> vector<1x256xf32>
    %c192_i32_52 = arith.constant 192 : i32
    %121 = tpu.dynamic_rotate %2 by %c192_i32_52 dim 1 : vector<1x256xf32>, i32 -> vector<1x256xf32>
    %122 = arith.cmpf oeq, %121, %116 : vector<1x256xf32>
    %cst_53 = arith.constant dense<true> : vector<1x256xi1>
    %123 = arith.xori %119, %cst_53 : vector<1x256xi1>
    %124 = arith.andi %122, %123 : vector<1x256xi1>
    %cst_54 = arith.constant 0.000000e+00 : f32
    %125 = vector.broadcast %cst_54 : f32 to vector<1x256xf32>
    %126 = arith.select %124, %120, %125 : vector<1x256xi1>, vector<1x256xf32>
    %127 = arith.select %119, %117, %126 : vector<1x256xi1>, vector<1x256xf32>
    %cst_55 = arith.constant 0.000000e+00 : f32
    %128 = vector.broadcast %cst_55 : f32 to vector<1x256xf32>
    %129 = arith.select %114, %127, %128 : vector<1x256xi1>, vector<1x256xf32>
    %130 = arith.addf %112, %129 : vector<1x256xf32>
    %cst_56 = arith.constant 8.000000e+00 : f32
    %131 = vector.broadcast %cst_56 : f32 to vector<1x256xf32>
    %132 = arith.cmpf oge, %3, %131 : vector<1x256xf32>
    %cst_57 = arith.constant 1.280000e+02 : f32
    %133 = vector.broadcast %cst_57 : f32 to vector<1x256xf32>
    %134 = arith.subf %2, %133 : vector<1x256xf32>
    %c128_i32 = arith.constant 128 : i32
    %135 = tpu.dynamic_rotate %130 by %c128_i32 dim 1 : vector<1x256xf32>, i32 -> vector<1x256xf32>
    %c128_i32_58 = arith.constant 128 : i32
    %136 = tpu.dynamic_rotate %2 by %c128_i32_58 dim 1 : vector<1x256xf32>, i32 -> vector<1x256xf32>
    %137 = arith.cmpf oeq, %136, %134 : vector<1x256xf32>
    %c128_i32_59 = arith.constant 128 : i32
    %138 = tpu.dynamic_rotate %130 by %c128_i32_59 dim 1 : vector<1x256xf32>, i32 -> vector<1x256xf32>
    %c128_i32_60 = arith.constant 128 : i32
    %139 = tpu.dynamic_rotate %2 by %c128_i32_60 dim 1 : vector<1x256xf32>, i32 -> vector<1x256xf32>
    %140 = arith.cmpf oeq, %139, %134 : vector<1x256xf32>
    %cst_61 = arith.constant dense<true> : vector<1x256xi1>
    %141 = arith.xori %137, %cst_61 : vector<1x256xi1>
    %142 = arith.andi %140, %141 : vector<1x256xi1>
    %cst_62 = arith.constant 0.000000e+00 : f32
    %143 = vector.broadcast %cst_62 : f32 to vector<1x256xf32>
    %144 = arith.select %142, %138, %143 : vector<1x256xi1>, vector<1x256xf32>
    %145 = arith.select %137, %135, %144 : vector<1x256xi1>, vector<1x256xf32>
    %cst_63 = arith.constant 0.000000e+00 : f32
    %146 = vector.broadcast %cst_63 : f32 to vector<1x256xf32>
    %147 = arith.select %132, %145, %146 : vector<1x256xi1>, vector<1x256xf32>
    %148 = arith.addf %130, %147 : vector<1x256xf32>
    %c0_64 = arith.constant 0 : index
    %c0_65 = arith.constant 0 : index
    %149 = vector.load %arg5[%c0_64, %c0_65] : memref<64x1xf32, #tpu.memory_space<vmem>>, vector<64x1xf32>
    %c0_66 = arith.constant 0 : index
    %c0_67 = arith.constant 0 : index
    %150 = vector.load %arg6[%c0_66, %c0_67] : memref<64x1xf32, #tpu.memory_space<vmem>>, vector<64x1xf32>
    %151 = vector.extract_strided_slice %149 {offsets = [0, 0], sizes = [32, 1], strides = [1, 1]} : vector<64x1xf32> to vector<32x1xf32>
    %152 = vector.broadcast %148 : vector<1x256xf32> to vector<32x256xf32>
    %153 = vector.broadcast %151 : vector<32x1xf32> to vector<32x256xf32>
    %154 = arith.mulf %152, %153 : vector<32x256xf32>
    %155 = vector.extract_strided_slice %150 {offsets = [0, 0], sizes = [32, 1], strides = [1, 1]} : vector<64x1xf32> to vector<32x1xf32>
    %156 = vector.broadcast %155 : vector<32x1xf32> to vector<32x256xf32>
    %157 = arith.addf %154, %156 : vector<32x256xf32>
    %158 = math.sin %157 : vector<32x256xf32>
    %c0_68 = arith.constant 0 : index
    %c0_69 = arith.constant 0 : index
    %c0_70 = arith.constant 0 : index
    %159 = vector.load %arg7[%c0_68, %c0_69, %c0_70] : memref<1x64x256xf32, #tpu.memory_space<vmem>>, vector<1x32x256xf32>
    %160 = vector.shape_cast %159 : vector<1x32x256xf32> to vector<32x256xf32>
    %161 = vector.shape_cast %158 : vector<32x256xf32> to vector<1x32x256xf32>
    tpu.vector_store %arg7[%c0_68, %c0_69, %c0_70], %161 {strides = array<i32>} : memref<1x64x256xf32, #tpu.memory_space<vmem>>, vector<1x32x256xf32>,
    %162 = vector.extract_strided_slice %149 {offsets = [32, 0], sizes = [32, 1], strides = [1, 1]} : vector<64x1xf32> to vector<32x1xf32>
    %163 = vector.broadcast %76 : vector<1x256xf32> to vector<32x256xf32>
    %164 = vector.broadcast %162 : vector<32x1xf32> to vector<32x256xf32>
    %165 = arith.mulf %163, %164 : vector<32x256xf32>
    %166 = vector.extract_strided_slice %150 {offsets = [32, 0], sizes = [32, 1], strides = [1, 1]} : vector<64x1xf32> to vector<32x1xf32>
    %167 = vector.broadcast %166 : vector<32x1xf32> to vector<32x256xf32>
    %168 = arith.addf %165, %167 : vector<32x256xf32>
    %169 = math.sin %168 : vector<32x256xf32>
    %c0_71 = arith.constant 0 : index
    %c32 = arith.constant 32 : index
    %c0_72 = arith.constant 0 : index
    %170 = vector.load %arg7[%c0_71, %c32, %c0_72] : memref<1x64x256xf32, #tpu.memory_space<vmem>>, vector<1x32x256xf32>
    %171 = vector.shape_cast %170 : vector<1x32x256xf32> to vector<32x256xf32>
    %172 = vector.shape_cast %169 : vector<32x256xf32> to vector<1x32x256xf32>
    tpu.vector_store %arg7[%c0_71, %c32, %c0_72], %172 {strides = array<i32>} : memref<1x64x256xf32, #tpu.memory_space<vmem>>, vector<1x32x256xf32>,
    return
  }
  func.func @transform_0(%arg0: i32) -> (i32, i32, i32) {
    %c0_i32 = arith.constant 0 : i32
    %c0_i32_0 = arith.constant 0 : i32
    %c0_i32_1 = arith.constant 0 : i32
    return %arg0, %c0_i32, %c0_i32_0 : i32, i32, i32
  }
  func.func @transform_1(%arg0: i32) -> (i32, i32) {
    %c0_i32 = arith.constant 0 : i32
    %c0_i32_0 = arith.constant 0 : i32
    %c0_i32_1 = arith.constant 0 : i32
    return %c0_i32, %c0_i32_0 : i32, i32
  }
  func.func @transform_2(%arg0: i32) -> (i32, i32) {
    %c0_i32 = arith.constant 0 : i32
    %c0_i32_0 = arith.constant 0 : i32
    %c0_i32_1 = arith.constant 0 : i32
    return %c0_i32, %c0_i32_0 : i32, i32
  }
  func.func @transform_3(%arg0: i32) -> (i32, i32) {
    %c0_i32 = arith.constant 0 : i32
    %c0_i32_0 = arith.constant 0 : i32
    %c0_i32_1 = arith.constant 0 : i32
    return %c0_i32, %c0_i32_0 : i32, i32
  }
  func.func @transform_4(%arg0: i32) -> (i32, i32) {
    %c0_i32 = arith.constant 0 : i32
    %c0_i32_0 = arith.constant 0 : i32
    %c0_i32_1 = arith.constant 0 : i32
    return %c0_i32, %c0_i32_0 : i32, i32
  }
  func.func @transform_5(%arg0: i32) -> (i32, i32) {
    %c0_i32 = arith.constant 0 : i32
    %c0_i32_0 = arith.constant 0 : i32
    %c0_i32_1 = arith.constant 0 : i32
    return %c0_i32, %c0_i32_0 : i32, i32
  }
  func.func @transform_6(%arg0: i32) -> (i32, i32, i32) {
    %c0_i32 = arith.constant 0 : i32
    %c0_i32_0 = arith.constant 0 : i32
    %c0_i32_1 = arith.constant 0 : i32
    return %arg0, %c0_i32, %c0_i32_0 : i32, i32, i32
  }
}

</mosaic_0001>

<bundles_post_ra>
// kernel: squeeze.1
= control target key start
LH: loop header
LB: loop body
LE: loop exit
PB: predicated region body
PF: predicated region fallthrough
CT: control target
= control target key end

     0   :  { %2 = vsyncpa [#allocation1], 0  ;;  %s118_s6 = smov [#allocation0]   ;;  %s160_s0 = inlined_call_operand.hbm [shape: f32[2,1,16,16], index: 0, kind: input, shape index: {}]   ;;  %s161_s1 = inlined_call_operand.vmem [shape: f32[2,1,256], index: 1, kind: output, shape index: {}]  }
   0x1   :  { %s7_s7 = sshll.u32 %s118_s6, 4  ;;  %s94_s10 = scalar_lea.hbm %s160_s0, 512  ;;  %s8_s7 = int_to_ptr.vmem [resolvable:$true] %s7_s7 }
   0x2   :  { %p95_p0 = scmp.ne.s32.totalorder %s160_s0, %s94_s10  ;;  %p98_p1 = scmp.lt.u32.totalorder %s94_s10, %s160_s0 }
   0x4   :  { %p100_p2 = pnand %p98_p1, %p95_p0 }
   0x6   :  { %103 = shalt.err (!%p100_p2)
}
   0x7   :  { %s104_s15 = scalar_lea.vmem %s8_s7, 512  ;;  %p109_p4 = scmp.lt.s32.totalorder %s8_s7, %s8_s7 }
   0x8   :  { %p105_p3 = scmp.ne.s32.totalorder %s8_s7, %s104_s15  ;;  %p110_p5 = scmp.lt.s32.totalorder %s104_s15, %s104_s15 }
   0xa   :  { %p111_p6 = por %p110_p5, %p109_p4 }
   0xc   :  { %p112_p7 = pnand %p111_p6, %p105_p3 }
   0xe   :  { %115 = shalt.err (!%p112_p7)
}
   0xf   :  { %10 = dma.hbm_to_vmem [thread:$0]  %s160_s0, 512, %s8_s7, [#allocation1]  }
  0x10   :  { %116 = dma.done.wait [#allocation1], 512  }
  0x11   :  { %117 = vsyncadd [#allocation1], 4294966784  ;;  %v16_v0 = vld [vmem:[#allocation0 + $0x7] ss:$8 sm:$0xf]   ;;  %s119_s0 = smov 112  }
  0x12   :  { %v28_v1 = vld [vmem:[#allocation0 + $0x5] ss:$8 sm:$0xf]   ;;  %17 = vrot.lane.b32.xlu0 %v16_v0, %s119_s0  ;;  %s120_s18 = smov 80   ;;  %vm13_vm0 = vcmask 130048   ;;  %s121_s19 = smov 96  }
  0x13   :  { %29 = vrot.lane.b32.xlu1 %v28_v1, %s120_s18  ;;  %v22_v2 = vld [vmem:[#allocation0 + $0x6] ss:$8 sm:$0xf]   ;;  %v34_v3 = vld [vmem:[#allocation0 + $0x4] ss:$8 sm:$0xf]  }
  0x14   :  { %v12_v4 = vld [vmem:[#allocation0] ss:$8 sm:$0xf]   ;;  %s122_s20 = smov 64   ;;  %s123_s21 = smov 48   ;;  %vm19_vm1 = vcmask 1048448  }
  0x15   :  { %14 = vst.msk [vmem:[#allocation2] ss:$8 sm:$0xf] %vm13_vm0, %v12_v4   ;;  %v40_v5 = vld [vmem:[#allocation0 + $0x3] ss:$8 sm:$0xf]  }
  0x16   :  { %23 = vrot.lane.b32.xlu0 %v22_v2, %s121_s19  ;;  %v46_v6 = vld [vmem:[#allocation0 + $0x2] ss:$8 sm:$0xf]   ;;  %s124_s22 = smov 32   ;;  %s125_s23 = smov 16   ;;  %vm25_vm2 = vcmask 917248  }
  0x17   :  { %35 = vrot.lane.b32.xlu1 %v34_v3, %s122_s20  ;;  %v52_v7 = vld [vmem:[#allocation0 + $0x1] ss:$8 sm:$0xf]   ;;  %vm31_vm3 = vcmask 786048   ;;  %vm37_vm4 = vcmask 654848   ;;  %vm43_vm5 = vcmask 523648  }
  0x18   :  { %vm49_vm6 = vcmask 392448   ;;  %vm55_vm7 = vcmask 261248  }
  0x1a   :  { %41 = vrot.lane.b32.xlu0 %v40_v5, %s123_s21 }
  0x1b   :  { %47 = vrot.lane.b32.xlu1 %v46_v6, %s124_s22 }
  0x1e   :  { %53 = vrot.lane.b32.xlu0 %v52_v7, %s125_s23 }
  0x84   :  { %v18_v8 = vpop.permute.xlu0 %17  }
  0x85   :  { %v30_v9 = vpop.permute.xlu1 %29   ;;  %20 = vst.msk [vmem:[#allocation2] ss:$8 sm:$0xf] %vm19_vm1, %v18_v8  }
  0x88   :  { %v24_v10 = vpop.permute.xlu0 %23  }
  0x89   :  { %v36_v11 = vpop.permute.xlu1 %35   ;;  %26 = vst.msk [vmem:[#allocation2] ss:$8 sm:$0xf] %vm25_vm2, %v24_v10  }
  0x8a   :  { %32 = vst.msk [vmem:[#allocation2] ss:$8 sm:$0xf] %vm31_vm3, %v30_v9  }
  0x8b   :  { %38 = vst.msk [vmem:[#allocation2] ss:$8 sm:$0xf] %vm37_vm4, %v36_v11  }
  0x8c   :  { %v42_v12 = vpop.permute.xlu0 %41  }
  0x8d   :  { %v48_v13 = vpop.permute.xlu1 %47   ;;  %44 = vst.msk [vmem:[#allocation2] ss:$8 sm:$0xf] %vm43_vm5, %v42_v12  }
  0x8e   :  { %50 = vst.msk [vmem:[#allocation2] ss:$8 sm:$0xf] %vm49_vm6, %v48_v13  }
  0x90   :  { %v54_v14 = vpop.permute.xlu0 %53  }
  0x91   :  { %56 = vst.msk [vmem:[#allocation2] ss:$8 sm:$0xf] %vm55_vm7, %v54_v14  }
  0x98   :  { %v60_v15 = vld [vmem:[#allocation2] sm:$0x1]  ;;  %v64_v16 = vld [vmem:[#allocation2 + $0x8] sm:$0x1]  ;;  %v69_v17 = vld [vmem:[#allocation2 + $0x10] sm:$0x1] }
  0x99   :  { %62 = vst [vmem:[%s161_s1] sm:$0x1] %v60_v15  ;;  %83 = vst [vmem:[%s161_s1 + $0x1] sm:$0x1] %v64_v16  ;;  %v75_v18 = vld [vmem:[#allocation2 + $0x18] sm:$0x1] }
  0x9a   :  { %84 = vst [vmem:[%s161_s1 + $0x2] sm:$0x1] %v69_v17  ;;  %85 = vst [vmem:[%s161_s1 + $0x3] sm:$0x1] %v75_v18 }
  0x9b   :  { %80 = vsyncpa [#allocation1], 1 }

// kernel: position_embedding_sine_hw.1
= control target key start
LH: loop header
LB: loop body
LE: loop exit
PB: predicated region body
PF: predicated region fallthrough
CT: control target
= control target key end

     0   :  { %s3058_s21 = smov 0   ;;  %s4895_s0 = inlined_call_operand.vmem [shape: f32[2,1,256], index: 0, kind: input, shape index: {}]   ;;  %s4896_s1 = inlined_call_operand.vmem [shape: f32[1,256], index: 1, kind: input, shape index: {}]   ;;  %s4897_s2 = inlined_call_operand.vmem [shape: f32[1,256], index: 2, kind: input, shape index: {}]   ;;  %s4898_s3 = inlined_call_operand.vmem [shape: f32[1,256], index: 3, kind: input, shape index: {}]   ;;  %s4899_s4 = inlined_call_operand.vmem [shape: f32[64,1], index: 4, kind: input, shape index: {}]   ;;  %s4900_s5 = inlined_call_operand.vmem [shape: f32[64,1], index: 5, kind: input, shape index: {}]   ;;  %s4901_s6 = inlined_call_operand.vmem [shape: f32[2,64,256], index: 6, kind: output, shape index: {}]  }
   0x1 LB: > { %s2749_s22 = sadd.s32 4294967295, %s2999_s21   ;;  %p2753_p0 = scmp.ge.s32.totalorder %s2999_s21, 1  ;;  %s2999_s21 = sphi %s3058_s21, %s16_s21  }
   0x2   : > { %p211_p1 = scmp.lt.s32.totalorder %s2999_s21, 3 }
   0x4   : > { %p212_p2 = pnand %p2753_p0, %p211_p1 }
   0x5   : > { %v256_v0 = vlaneseq (!%p212_p2)  ;;  %p240_p3 = scmp.lt.s32.totalorder (!%p212_p2), %s2749_s22, 1  ;;  %v3071_v2 = vld [vmem:[%s4896_s1] sm:$0x3] (!%p212_p2)  ;;  %s3001_s29 = smov (!%p212_p2), 127   ;;  %v3007_v18 = vmov (!%p212_p2), 1966171168  }
   0x6   : > { %215 = sbr.rel (%p212_p2) target bundleno = 923 (0x39b), region = 44  ;;  %s3002_s30 = smov (!%p212_p2), 1   ;;  %v2757_v11 = vadd.f32 (!%p212_p2), -1.0, %v3071_v2  ;;  %v332_v19 = vunpack.c.l.s4 (!%p212_p2), %v3007_v18  ;;  %vm3008_vm6 = vmmov (!%p212_p2), 1   ;;  %v2761_v29 = vadd.f32 (!%p212_p2), -16.0, %v3071_v2 }
   0x7   : > { %v3066_v1 = vshrl.u32 (!%p212_p2), %v256_v0, 7  ;;  %s3003_s7 = smov (!%p212_p2), 16   ;;  %s3004_s8 = smov (!%p212_p2), 112   ;;  %v3115_v10 = vand.u32 (!%p212_p2), 127, %v256_v0  ;;  %v3154_v42 = vld [vmem:[%s4898_s3] sm:$0x3] (!%p212_p2) }
   0x8   : > { %s3005_s9 = smov (!%p212_p2), 2   ;;  %s3006_s10 = smov (!%p212_p2), 126   ;;  %v333_v26 = vunpack.c.0.s8 (!%p212_p2), %v332_v19  ;;  %vm253_vm15 = vcmp.ge.f32.partialorder (!%p212_p2), %v3154_v42, 1.0 }
   0x9   : > { %v3076_v3 = vsub.s32 (!%p212_p2), 0, %v3066_v1  ;;  %v3079_v4 = vsub.s32 (!%p212_p2), 1, %v3066_v1  ;;  %vm309_vm0 = vcmp.lt.s32.totalorder (!%p212_p2), %v3115_v10, 127  ;;  %vm272_vm1 = vcmp.lt.s32.totalorder (!%p212_p2), %v3115_v10, 1  ;;  %s3009_s15 = smov (!%p212_p2), 32   ;;  %s3010_s16 = smov (!%p212_p2), 96  }
   0xa   : > { %v3140_v31 = vsub.s32 (!%p212_p2), %v333_v26, %v3066_v1  ;;  %vm600_vm11 = vcmp.lt.s32.totalorder (!%p212_p2), %v3115_v10, 16  ;;  %vm626_vm14 = vcmp.lt.s32.totalorder (!%p212_p2), %v3115_v10, 112  ;;  %s3011_s17 = smov (!%p212_p2), 4   ;;  %s3013_s18 = smov (!%p212_p2), 124  }
   0xb   : > { %v3084_v5 = vrot.slane (!%p212_p2), %v3071_v2, %v3076_v3  ;;  %v3093_v6 = vrot.slane (!%p212_p2), %v3071_v2, %v3079_v4  ;;  %v296_v14 = vrot.slane (!%p212_p2), %v2757_v11, %v3076_v3  ;;  %v300_v15 = vrot.slane (!%p212_p2), %v2757_v11, %v3079_v4  ;;  %s3014_s19 = smov (!%p212_p2), 64   ;;  %s3015_s20 = smov (!%p212_p2), 8  }
   0xc   : > { %v613_v39 = vrot.slane (!%p212_p2), %v2761_v29, %v3076_v3  ;;  %v617_v40 = vrot.slane (!%p212_p2), %v2761_v29, %v3079_v4  ;;  %s3016_s23 = smov (!%p212_p2), 120  }
   0xd   : > { %s4959_s22 = smov (!%p240_p3, %s2749_s22), 1  ;;  %312 = vrot.lane.b32.xlu1 %v3084_v5, %s3001_s29  ;;  %286 = vrot.lane.b32.xlu0 %v3084_v5, %s3002_s30 }
   0xe   : > { %s2754_s25 = sshll.u32 %s4959_s22, 1 }
   0xf   : > { %s243_s28 = scalar_lea.vmem %s4895_s0, %s2754_s25 }
  0x10   : > { %v3095_v7 = vld [vmem:[%s243_s28] sm:$0x3] }
  0x11   : > { %314 = vrot.lane.b32.xlu1 %v3093_v6, %s3001_s29  ;;  %288 = vrot.lane.b32.xlu0 %v3093_v6, %s3002_s30  ;;  %v263_v8 = vrot.slane %v3095_v7, %v3079_v4  ;;  %v259_v9 = vrot.slane %v3095_v7, %v3076_v3 }
  0x15   : > { %307 = vrot.lane.b32.xlu1 %v263_v8, %s3001_s29  ;;  %305 = vrot.lane.b32.xlu0 %v259_v9, %s3001_s29 }
  0x19   : > { %268 = vrot.lane.b32.xlu1 %v263_v8, %s3002_s30  ;;  %266 = vrot.lane.b32.xlu0 %v259_v9, %s3002_s30 }
  0x1d   : > { %605 = vrot.lane.b32.xlu1 %v3093_v6, %s3003_s7  ;;  %603 = vrot.lane.b32.xlu0 %v3084_v5, %s3003_s7 }
  0x21   : > { %631 = vrot.lane.b32.xlu1 %v3093_v6, %s3004_s8  ;;  %629 = vrot.lane.b32.xlu0 %v3084_v5, %s3004_s8 }
  0x25   : > { %624 = vrot.lane.b32.xlu1 %v263_v8, %s3004_s8  ;;  %622 = vrot.lane.b32.xlu0 %v259_v9, %s3004_s8 }
  0x29   : > { %598 = vrot.lane.b32.xlu1 %v263_v8, %s3003_s7  ;;  %596 = vrot.lane.b32.xlu0 %v259_v9, %s3003_s7 }
  0x2d   : > { %370 = vrot.lane.b32.xlu1 %v3093_v6, %s3005_s9  ;;  %368 = vrot.lane.b32.xlu0 %v3084_v5, %s3005_s9 }
  0x31   : > { %396 = vrot.lane.b32.xlu1 %v3093_v6, %s3006_s10  ;;  %394 = vrot.lane.b32.xlu0 %v3084_v5, %s3006_s10 }
  0x7f   : > { %v313_v12 = vpop.permute.xlu1 %312  ;;  %v287_v13 = vpop.permute.xlu0 %286 }
  0x83   : > { %v315_v16 = vpop.permute.xlu1 %314  ;;  %v289_v17 = vpop.permute.xlu0 %288 }
  0x84   : > { %v316_v20 = vsel %vm309_vm0, %v313_v12, %v315_v16  ;;  %v317_v21 = vsel %vm309_vm0, %v315_v16, %v313_v12  ;;  %v290_v22 = vsel %vm272_vm1, %v287_v13, %v289_v17  ;;  %v291_v23 = vsel %vm272_vm1, %v289_v17, %v287_v13 }
  0x85   : > { %vm318_vm2 = vcmp.eq.f32.partialorder %v316_v20, %v296_v14  ;;  %vm303_vm3 = vcmp.eq.f32.partialorder %v291_v23, %v296_v14  ;;  %vm304_vm4 = vcmp.eq.f32.partialorder %v290_v22, %v300_v15  ;;  %vm319_vm5 = vcmp.eq.f32.partialorder %v317_v21, %v300_v15  ;;  %v3208_v15 = vld [vmem:[%s4897_s2] sm:$0x3] }
  0x86   : > { %vm320_vm7 = vmxor %vm303_vm3, %vm3008_vm6  ;;  %v3012_v22 = vmov 0  }
  0x87   : > { %vm321_vm8 = vmxor %vm304_vm4, %vm3008_vm6  ;;  %v308_v24 = vpop.permute.xlu1 %307  ;;  %v306_v25 = vpop.permute.xlu0 %305  ;;  %2927 = vset.pattern.permute.xlu1 %v3012_v22  ;;  %2926 = vset.pattern.permute.xlu0 %v3012_v22 }
  0x88   : > { %vm322_vm9 = vmand %vm318_vm2, %vm320_vm7  ;;  %v310_v27 = vsel %vm309_vm0, %v306_v25, %v308_v24  ;;  %v311_v28 = vsel %vm309_vm0, %v308_v24, %v306_v25  ;;  %vm594_vm7 = vcmp.ge.f32.partialorder %v3208_v15, 1.0  ;;  %v2758_v24 = vadd.f32 -2.0, %v3071_v2 }
  0x89   : > { %vm323_vm10 = vmand %vm319_vm5, %vm321_vm8  ;;  %v324_v33 = vsel %vm322_vm9, %v310_v27, 0.0  ;;  %vm365_vm8 = vcmp.lt.s32.totalorder %v3115_v10, 2  ;;  %vm391_vm9 = vcmp.lt.s32.totalorder %v3115_v10, 126 }
  0x8a   : > { %v325_v34 = vsel %vm323_vm10, %v311_v28, 0.0  ;;  %v378_v25 = vrot.slane %v2758_v24, %v3076_v3  ;;  %v382_v26 = vrot.slane %v2758_v24, %v3079_v4 }
  0x8b   : > { %v269_v30 = vpop.permute.xlu1 %268  ;;  %v267_v32 = vpop.permute.xlu0 %266 }
  0x8c   : > { %v273_v35 = vsel %vm272_vm1, %v267_v32, %v269_v30  ;;  %v274_v36 = vsel %vm272_vm1, %v269_v30, %v267_v32 }
  0x8d   : > { %v326_v37 = vsel %vm303_vm3, %v274_v36, %v324_v33  ;;  %v327_v38 = vsel %vm304_vm4, %v273_v35, %v325_v34 }
  0x8e   : > { %v330_v41 = vcombine.low %v326_v37, %v327_v38 }
  0x8f   : > { %v606_v43 = vpop.permute.xlu1 %605  ;;  %v604_v44 = vpop.permute.xlu0 %603 }
  0x90   : > { %v337_v45 = vrot.slane %v330_v41, %v3140_v31  ;;  %v607_v46 = vsel %vm600_vm11, %v604_v44, %v606_v43  ;;  %v608_v47 = vsel %vm600_vm11, %v606_v43, %v604_v44 }
  0x91   : > { %vm620_vm12 = vcmp.eq.f32.partialorder %v608_v47, %v613_v39  ;;  %vm621_vm13 = vcmp.eq.f32.partialorder %v607_v46, %v617_v40 }
  0x92   : > { %v344_v48 = vrot.slane %v337_v45, %v3140_v31  ;;  %vm637_vm0 = vmxor %vm620_vm12, %vm3008_vm6 }
  0x93   : > { %v632_v49 = vpop.permute.xlu1 %631  ;;  %v630_v50 = vpop.permute.xlu0 %629  ;;  %vm638_vm1 = vmxor %vm621_vm13, %vm3008_vm6 }
  0x94   : > { %v633_v51 = vsel %vm626_vm14, %v630_v50, %v632_v49  ;;  %v634_v52 = vsel %vm626_vm14, %v632_v49, %v630_v50  ;;  %v346_v53 = vsel %vm253_vm15, %v344_v48, 0.0 }
  0x95   : > { %vm635_vm2 = vcmp.eq.f32.partialorder %v633_v51, %v613_v39  ;;  %vm636_vm3 = vcmp.eq.f32.partialorder %v634_v52, %v617_v40  ;;  %v3173_v54 = vadd.f32 %v346_v53, %v3095_v7  ;;  %v2762_v51 = vadd.f32 -32.0, %v3071_v2 }
  0x96   : > { %vm3175_vm4 = vmand %vm635_vm2, %vm637_vm0  ;;  %vm348_vm2 = vcmp.ge.f32.partialorder %v3154_v42, 2.0 }
  0x97   : > { %v358_v56 = vrot.slane %v3173_v54, %v3079_v4  ;;  %v354_v57 = vrot.slane %v3173_v54, %v3076_v3  ;;  %v625_v58 = vpop.permute.xlu1 %624  ;;  %vm3183_vm5 = vmand %vm636_vm3, %vm638_vm1  ;;  %v623_v60 = vpop.permute.xlu0 %622  ;;  %vm682_vm3 = vcmp.lt.s32.totalorder %v3115_v10, 32 }
  0x98   : > { %v627_v61 = vsel %vm626_vm14, %v623_v60, %v625_v58  ;;  %v628_v62 = vsel %vm626_vm14, %v625_v58, %v623_v60  ;;  %v699_v58 = vrot.slane %v2762_v51, %v3079_v4 }
  0x99   : > { %389 = vrot.lane.b32.xlu1 %v358_v56, %s3006_s10  ;;  %387 = vrot.lane.b32.xlu0 %v354_v57, %s3006_s10  ;;  %v641_v63 = vsel %vm3175_vm4, %v627_v61, 0.0  ;;  %v642_v0 = vsel %vm3183_vm5, %v628_v62, 0.0  ;;  %vm708_vm4 = vcmp.lt.s32.totalorder %v3115_v10, 96  ;;  %vm447_vm5 = vcmp.lt.s32.totalorder %v3115_v10, 4 }
  0x9b   : > { %v599_v1 = vpop.permute.xlu1 %598  ;;  %v597_v8 = vpop.permute.xlu0 %596 }
  0x9c   : > { %v601_v9 = vsel %vm600_vm11, %v597_v8, %v599_v1  ;;  %v602_v11 = vsel %vm600_vm11, %v599_v1, %v597_v8 }
  0x9d   : > { %363 = vrot.lane.b32.xlu1 %v358_v56, %s3005_s9  ;;  %361 = vrot.lane.b32.xlu0 %v354_v57, %s3005_s9  ;;  %v643_v12 = vsel %vm620_vm12, %v602_v11, %v641_v63  ;;  %v644_v13 = vsel %vm621_vm13, %v601_v9, %v642_v0  ;;  %v695_v56 = vrot.slane %v2762_v51, %v3076_v3 }
  0x9e   : > { %v647_v14 = vcombine.low %v643_v12, %v644_v13 }
  0x9f   : > { %v369_v23 = vpop.permute.xlu0 %368 }
  0xa0   : > { %v654_v16 = vrot.slane %v647_v14, %v3140_v31 }
  0xa1   : > { %687 = vrot.lane.b32.xlu1 %v3093_v6, %s3009_s15  ;;  %685 = vrot.lane.b32.xlu0 %v3084_v5, %s3009_s15 }
  0xa2   : > { %v661_v17 = vrot.slane %v654_v16, %v3140_v31 }
  0xa3   : > { %v395_v29 = vpop.permute.xlu0 %394 }
  0xa4   : > { %v663_v18 = vsel %vm594_vm7, %v661_v17, 0.0 }
  0xa5   : > { %713 = vrot.lane.b32.xlu1 %v3093_v6, %s3010_s16  ;;  %711 = vrot.lane.b32.xlu0 %v3084_v5, %s3010_s16  ;;  %v3218_v19 = vadd.f32 %v663_v18, %v3095_v7  ;;  %v371_v7 = vpop.permute.xlu1 %370 }
  0xa6   : > { %v373_v27 = vsel %vm365_vm8, %v371_v7, %v369_v23  ;;  %v372_v30 = vsel %vm365_vm8, %v369_v23, %v371_v7 }
  0xa7   : > { %v675_v20 = vrot.slane %v3218_v19, %v3079_v4  ;;  %v671_v21 = vrot.slane %v3218_v19, %v3076_v3  ;;  %vm385_vm10 = vcmp.eq.f32.partialorder %v373_v27, %v378_v25  ;;  %vm386_vm11 = vcmp.eq.f32.partialorder %v372_v30, %v382_v26  ;;  %v864_v27 = vld [vmem:[%s4899_s4] sm:$0xff]  ;;  %v867_v30 = vld [vmem:[%s4899_s4 + $0x18] sm:$0xff] }
  0xa8   : > { %vm402_vm12 = vmxor %vm385_vm10, %vm3008_vm6 }
  0xa9   : > { %452 = vrot.lane.b32.xlu1 %v3093_v6, %s3011_s17  ;;  %450 = vrot.lane.b32.xlu0 %v3084_v5, %s3011_s17  ;;  %v397_v28 = vpop.permute.xlu1 %396  ;;  %vm403_vm14 = vmxor %vm386_vm11, %vm3008_vm6 }
  0xaa   : > { %v398_v32 = vsel %vm391_vm9, %v395_v29, %v397_v28  ;;  %v399_v33 = vsel %vm391_vm9, %v397_v28, %v395_v29  ;;  %v866_v29 = vld [vmem:[%s4899_s4 + $0x10] sm:$0xff] }
  0xab   : > { %vm400_vm13 = vcmp.eq.f32.partialorder %v398_v32, %v378_v25  ;;  %vm401_vm15 = vcmp.eq.f32.partialorder %v399_v33, %v382_v26  ;;  %v865_v26 = vld [vmem:[%s4899_s4 + $0x8] sm:$0xff]  ;;  %v868_v33 = vld [vmem:[%s4899_s4 + $0x20] sm:$0xff] }
  0xac   : > { %vm404_vm0 = vmand %vm400_vm13, %vm402_vm12 }
  0xad   : > { %706 = vrot.lane.b32.xlu1 %v675_v20, %s3010_s16  ;;  %704 = vrot.lane.b32.xlu0 %v671_v21, %s3010_s16  ;;  %vm405_vm1 = vmand %vm401_vm15, %vm403_vm14  ;;  %vm665_vm15 = vcmp.ge.f32.partialorder %v3208_v15, 2.0 }
  0xb1   : > { %680 = vrot.lane.b32.xlu1 %v675_v20, %s3009_s15  ;;  %678 = vrot.lane.b32.xlu0 %v671_v21, %s3009_s15 }
  0xb5   : > { %478 = vrot.lane.b32.xlu1 %v3093_v6, %s3013_s18  ;;  %476 = vrot.lane.b32.xlu0 %v3084_v5, %s3013_s18 }
 0x10b   : > { %v390_v34 = vpop.permute.xlu1 %389  ;;  %v388_v35 = vpop.permute.xlu0 %387 }
 0x10c   : > { %v392_v36 = vsel %vm391_vm9, %v388_v35, %v390_v34  ;;  %v393_v37 = vsel %vm391_vm9, %v390_v34, %v388_v35  ;;  %v869_v34 = vld [vmem:[%s4899_s4 + $0x28] sm:$0xff] }
 0x10d   : > { %v406_v40 = vsel %vm404_vm0, %v392_v36, 0.0  ;;  %v407_v41 = vsel %vm405_vm1, %v393_v37, 0.0  ;;  %v870_v36 = vld [vmem:[%s4899_s4 + $0x30] sm:$0xff]  ;;  %v871_v37 = vld [vmem:[%s4899_s4 + $0x38] sm:$0xff]  ;;  %vm473_vm0 = vcmp.lt.s32.totalorder %v3115_v10, 124 }
 0x10f   : > { %v364_v38 = vpop.permute.xlu1 %363  ;;  %v362_v39 = vpop.permute.xlu0 %361 }
 0x110   : > { %v366_v43 = vsel %vm365_vm8, %v362_v39, %v364_v38  ;;  %v367_v44 = vsel %vm365_vm8, %v364_v38, %v362_v39 }
 0x111   : > { %v408_v45 = vsel %vm385_vm10, %v367_v44, %v406_v40  ;;  %v409_v46 = vsel %vm386_vm11, %v366_v43, %v407_v41  ;;  %v872_v41 = vld [vmem:[%s4900_s5] sm:$0xff]  ;;  %v874_v43 = vld [vmem:[%s4900_s5 + $0x10] sm:$0xff]  ;;  %v875_v44 = vld [vmem:[%s4900_s5 + $0x18] sm:$0xff] }
 0x112   : > { %v412_v47 = vcombine.low %v408_v45, %v409_v46  ;;  %v2759_v45 = vadd.f32 -4.0, %v3071_v2 }
 0x113   : > { %v688_v48 = vpop.permute.xlu1 %687  ;;  %v686_v49 = vpop.permute.xlu0 %685 }
 0x114   : > { %v419_v50 = vrot.slane %v412_v47, %v3140_v31  ;;  %v690_v59 = vsel %vm682_vm3, %v688_v48, %v686_v49  ;;  %v689_v61 = vsel %vm682_vm3, %v686_v49, %v688_v48  ;;  %v460_v46 = vrot.slane %v2759_v45, %v3076_v3 }
 0x115   : > { %vm702_vm7 = vcmp.eq.f32.partialorder %v690_v59, %v695_v56  ;;  %vm703_vm8 = vcmp.eq.f32.partialorder %v689_v61, %v699_v58  ;;  %v464_v47 = vrot.slane %v2759_v45, %v3079_v4 }
 0x116   : > { %v426_v52 = vrot.slane %v419_v50, %v3140_v31  ;;  %vm719_vm9 = vmxor %vm702_vm7, %vm3008_vm6 }
 0x117   : > { %v714_v53 = vpop.permute.xlu1 %713  ;;  %v712_v55 = vpop.permute.xlu0 %711  ;;  %vm720_vm11 = vmxor %vm703_vm8, %vm3008_vm6 }
 0x118   : > { %v428_v57 = vsel %vm348_vm2, %v426_v52, 0.0  ;;  %v715_v8 = vsel %vm708_vm4, %v712_v55, %v714_v53  ;;  %v716_v11 = vsel %vm708_vm4, %v714_v53, %v712_v55 }
 0x119   : > { %v3263_v60 = vadd.f32 %v428_v57, %v3173_v54  ;;  %vm717_vm10 = vcmp.eq.f32.partialorder %v715_v8, %v695_v56  ;;  %vm718_vm12 = vcmp.eq.f32.partialorder %v716_v11, %v699_v58 }
 0x11a   : > { %vm721_vm13 = vmand %vm717_vm10, %vm719_vm9 }
 0x11b   : > { %v453_v62 = vpop.permute.xlu1 %452  ;;  %v451_v63 = vpop.permute.xlu0 %450  ;;  %v440_v0 = vrot.slane %v3263_v60, %v3079_v4  ;;  %v436_v1 = vrot.slane %v3263_v60, %v3076_v3  ;;  %vm722_vm14 = vmand %vm718_vm12, %vm720_vm11  ;;  %vm430_vm11 = vcmp.ge.f32.partialorder %v3154_v42, 4.0  ;;  %vm529_vm12 = vcmp.lt.s32.totalorder %v3115_v10, 8 }
 0x11c   : > { %v3275_v9 = vsel %vm447_vm5, %v451_v63, %v453_v62  ;;  %v3279_v54 = vsel %vm447_vm5, %v453_v62, %v451_v63 }
 0x11d   : > { %471 = vrot.lane.b32.xlu1 %v440_v0, %s3013_s18  ;;  %469 = vrot.lane.b32.xlu0 %v436_v1, %s3013_s18  ;;  %vm467_vm1 = vcmp.eq.f32.partialorder %v3279_v54, %v460_v46  ;;  %vm468_vm2 = vcmp.eq.f32.partialorder %v3275_v9, %v464_v47 }
 0x11f   : > { %v707_v12 = vpop.permute.xlu1 %706  ;;  %v705_v13 = vpop.permute.xlu0 %704 }
 0x120   : > { %v709_v14 = vsel %vm708_vm4, %v705_v13, %v707_v12  ;;  %v710_v16 = vsel %vm708_vm4, %v707_v12, %v705_v13 }
 0x121   : > { %445 = vrot.lane.b32.xlu1 %v440_v0, %s3011_s17  ;;  %443 = vrot.lane.b32.xlu0 %v436_v1, %s3011_s17  ;;  %v723_v20 = vsel %vm721_vm13, %v709_v14, 0.0  ;;  %v724_v21 = vsel %vm722_vm14, %v710_v16, 0.0  ;;  %vm764_vm13 = vcmp.lt.s32.totalorder %v3115_v10, 64 }
 0x123   : > { %v681_v17 = vpop.permute.xlu1 %680  ;;  %v679_v18 = vpop.permute.xlu0 %678 }
 0x124   : > { %v683_v22 = vsel %vm682_vm3, %v679_v18, %v681_v17  ;;  %v684_v7 = vsel %vm682_vm3, %v681_v17, %v679_v18  ;;  %vm484_vm3 = vmxor %vm467_vm1, %vm3008_vm6 }
 0x125   : > { %769 = vrot.lane.b32.xlu1 %v3093_v6, %s3014_s19  ;;  %767 = vrot.lane.b32.xlu0 %v3084_v5, %s3014_s19  ;;  %v725_v23 = vsel %vm702_vm7, %v684_v7, %v723_v20  ;;  %v726_v24 = vsel %vm703_vm8, %v683_v22, %v724_v21  ;;  %vm485_vm7 = vmxor %vm468_vm2, %vm3008_vm6 }
 0x126   : > { %v729_v25 = vcombine.low %v725_v23, %v726_v24 }
 0x127   : > { %v479_v48 = vpop.permute.xlu1 %478  ;;  %v477_v49 = vpop.permute.xlu0 %476 }
 0x128   : > { %v736_v28 = vrot.slane %v729_v25, %v3140_v31  ;;  %v480_v50 = vsel %vm473_vm0, %v477_v49, %v479_v48  ;;  %v481_v51 = vsel %vm473_vm0, %v479_v48, %v477_v49  ;;  %v877_v25 = vld [vmem:[%s4900_s5 + $0x28] sm:$0xff] }
 0x129   : > { %534 = vrot.lane.b32.xlu1 %v3093_v6, %s3015_s20  ;;  %532 = vrot.lane.b32.xlu0 %v3084_v5, %s3015_s20  ;;  %vm482_vm4 = vcmp.eq.f32.partialorder %v480_v50, %v460_v46  ;;  %vm483_vm8 = vcmp.eq.f32.partialorder %v481_v51, %v464_v47  ;;  %v2764_v51 = vadd.f32 -128.0, %v3071_v2 }
 0x12a   : > { %v743_v32 = vrot.slane %v736_v28, %v3140_v31  ;;  %vm486_vm9 = vmand %vm482_vm4, %vm484_vm3  ;;  %v2763_v28 = vadd.f32 -64.0, %v3071_v2 }
 0x12b   : > { %vm487_vm10 = vmand %vm483_vm8, %vm485_vm7  ;;  %vm747_vm8 = vcmp.ge.f32.partialorder %v3208_v15, 4.0 }
 0x12c   : > { %v745_v35 = vsel %vm665_vm15, %v743_v32, 0.0  ;;  %v777_v32 = vrot.slane %v2763_v28, %v3076_v3 }
 0x12d   : > { %560 = vrot.lane.b32.xlu1 %v3093_v6, %s3016_s23  ;;  %558 = vrot.lane.b32.xlu0 %v3084_v5, %s3016_s23  ;;  %v3341_v38 = vadd.f32 %v745_v35, %v3218_v19  ;;  %v873_v19 = vld [vmem:[%s4900_s5 + $0x8] sm:$0xff]  ;;  %v781_v35 = vrot.slane %v2763_v28, %v3079_v4  ;;  %v2760_v28 = vadd.f32 -8.0, %v3071_v2 }
 0x12f   : > { %v757_v39 = vrot.slane %v3341_v38, %v3079_v4  ;;  %v753_v40 = vrot.slane %v3341_v38, %v3076_v3 }
 0x131   : > { %898 = vperm.xlu1 %2927, %v865_v26   ;;  %893 = vperm.xlu0 %2926, %v864_v27   ;;  %v878_v26 = vld [vmem:[%s4900_s5 + $0x30] sm:$0xff]  ;;  %v879_v27 = vld [vmem:[%s4900_s5 + $0x38] sm:$0xff] }
 0x135   : > { %903 = vperm.xlu1 %2927, %v866_v29   ;;  %908 = vperm.xlu0 %2926, %v867_v30  }
 0x139   : > { %1800 = vperm.xlu1 %2927, %v868_v33   ;;  %1805 = vperm.xlu0 %2926, %v869_v34  }
 0x13d   : > { %1810 = vperm.xlu1 %2927, %v870_v36   ;;  %1815 = vperm.xlu0 %2926, %v871_v37  }
 0x141   : > { %762 = vrot.lane.b32.xlu1 %v757_v39, %s3014_s19  ;;  %760 = vrot.lane.b32.xlu0 %v753_v40, %s3014_s19 }
 0x145   : > { %921 = vperm.xlu1 %2927, %v872_v41   ;;  %926 = vperm.xlu0 %2926, %v873_v19  }
 0x149   : > { %931 = vperm.xlu1 %2927, %v874_v43   ;;  %936 = vperm.xlu0 %2926, %v875_v44  }
 0x18f   : > { %v472_v52 = vpop.permute.xlu1 %471  ;;  %v470_v53 = vpop.permute.xlu0 %469 }
 0x190   : > { %v474_v55 = vsel %vm473_vm0, %v470_v53, %v472_v52  ;;  %v475_v56 = vsel %vm473_vm0, %v472_v52, %v470_v53 }
 0x191   : > { %v488_v59 = vsel %vm486_vm9, %v474_v55, 0.0  ;;  %v489_v61 = vsel %vm487_vm10, %v475_v56, 0.0  ;;  %v833_v55 = vrot.slane %v2764_v51, %v3076_v3  ;;  %v837_v56 = vrot.slane %v2764_v51, %v3079_v4 }
 0x193   : > { %v446_v57 = vpop.permute.xlu1 %445  ;;  %v444_v58 = vpop.permute.xlu0 %443  ;;  %vm840_vm9 = vcmp.eq.f32.partialorder %v3093_v6, %v833_v55  ;;  %vm841_vm10 = vcmp.eq.f32.partialorder %v3084_v5, %v837_v56 }
 0x194   : > { %v448_v62 = vsel %vm447_vm5, %v444_v58, %v446_v57  ;;  %v449_v63 = vsel %vm447_vm5, %v446_v57, %v444_v58  ;;  %vm555_vm5 = vcmp.lt.s32.totalorder %v3115_v10, 120 }
 0x195   : > { %v490_v0 = vsel %vm467_vm1, %v449_v63, %v488_v59  ;;  %v491_v1 = vsel %vm468_vm2, %v448_v62, %v489_v61 }
 0x196   : > { %v494_v8 = vcombine.low %v490_v0, %v491_v1 }
 0x197   : > { %v770_v11 = vpop.permute.xlu1 %769  ;;  %v768_v12 = vpop.permute.xlu0 %767 }
 0x198   : > { %v501_v13 = vrot.slane %v494_v8, %v3140_v31  ;;  %v772_v36 = vsel %vm764_vm13, %v770_v11, %v768_v12  ;;  %v771_v37 = vsel %vm764_vm13, %v768_v12, %v770_v11 }
 0x199   : > { %vm784_vm14 = vcmp.eq.f32.partialorder %v772_v36, %v777_v32  ;;  %vm785_vm15 = vcmp.eq.f32.partialorder %v771_v37, %v781_v35  ;;  %vm786_vm0 = vcmp.eq.f32.partialorder %v771_v37, %v777_v32  ;;  %vm787_vm2 = vcmp.eq.f32.partialorder %v772_v36, %v781_v35 }
 0x19a   : > { %v508_v14 = vrot.slane %v501_v13, %v3140_v31  ;;  %vm788_vm1 = vmxor %vm784_vm14, %vm3008_vm6 }
 0x19b   : > { %v535_v16 = vpop.permute.xlu1 %534  ;;  %v533_v17 = vpop.permute.xlu0 %532  ;;  %vm789_vm3 = vmxor %vm785_vm15, %vm3008_vm6 }
 0x19c   : > { %v510_v18 = vsel %vm430_vm11, %v508_v14, 0.0  ;;  %v3387_v54 = vsel %vm529_vm12, %v533_v17, %v535_v16  ;;  %v3391_v9 = vsel %vm529_vm12, %v535_v16, %v533_v17  ;;  %vm790_vm4 = vmand %vm786_vm0, %vm788_vm1  ;;  %vm816_vm11 = vcmp.ge.f32.partialorder %v3208_v15, 8.0 }
 0x19d   : > { %v3394_v20 = vadd.f32 %v510_v18, %v3263_v60  ;;  %v876_v60 = vld [vmem:[%s4900_s5 + $0x20] sm:$0xff]  ;;  %vm791_vm7 = vmand %vm787_vm2, %vm789_vm3 }
 0x19f   : > { %v522_v42 = vrot.slane %v3394_v20, %v3079_v4  ;;  %v518_v21 = vrot.slane %v3394_v20, %v3076_v3  ;;  %v561_v22 = vpop.permute.xlu1 %560  ;;  %v559_v7 = vpop.permute.xlu0 %558 }
 0x1a0   : > { %v3403_v23 = vsel %vm555_vm5, %v559_v7, %v561_v22  ;;  %v3407_v24 = vsel %vm555_vm5, %v561_v22, %v559_v7 }
 0x1a1   : > { %553 = vrot.lane.b32.xlu1 %v522_v42, %s3016_s23  ;;  %551 = vrot.lane.b32.xlu0 %v518_v21, %s3016_s23 }
 0x1a5   : > { %527 = vrot.lane.b32.xlu1 %v522_v42, %s3015_s20  ;;  %525 = vrot.lane.b32.xlu0 %v518_v21, %s3015_s20  ;;  %s2831_s20 = sshll.u32 %s4959_s22, 7 }
 0x1a6   : > { %s3822_s12 = scalar_lea.vmem %s4901_s6, %s2831_s20 }
 0x1a9   : > { %1828 = vperm.xlu1 %2927, %v876_v60   ;;  %1833 = vperm.xlu0 %2926, %v877_v25  }
 0x1ad   : > { %1838 = vperm.xlu1 %2927, %v878_v26   ;;  %1843 = vperm.xlu0 %2926, %v879_v27  }
 0x1b0   : > { %v3426_v29 = vpop.permute.xlu1 %898  ;;  %v894_v30 = vpop.permute.xlu0 %893 }
 0x1b4   : > { %v904_v33 = vpop.permute.xlu1 %903  ;;  %v909_v34 = vpop.permute.xlu0 %908 }
 0x1b8   : > { %v3435_v39 = vpop.permute.xlu1 %1800  ;;  %v3437_v40 = vpop.permute.xlu0 %1805 }
 0x1bc   : > { %v3443_v41 = vpop.permute.xlu1 %1810  ;;  %v3445_v19 = vpop.permute.xlu0 %1815 }
 0x1c0   : > { %v763_v43 = vpop.permute.xlu1 %762  ;;  %v761_v44 = vpop.permute.xlu0 %760 }
 0x1c1   : > { %v765_v45 = vsel %vm764_vm13, %v761_v44, %v763_v43  ;;  %v766_v46 = vsel %vm764_vm13, %v763_v43, %v761_v44 }
 0x1c2   : > { %v792_v47 = vsel %vm790_vm4, %v765_v45, 0.0  ;;  %v793_v48 = vsel %vm791_vm7, %v766_v46, 0.0 }
 0x1c3   : > { %v794_v49 = vsel %vm784_vm14, %v766_v46, %v792_v47  ;;  %v795_v50 = vsel %vm785_vm15, %v765_v45, %v793_v48  ;;  %v3496_v45 = vrot.slane %v2760_v28, %v3076_v3 }
 0x1c4   : > { %v798_v52 = vcombine.low %v794_v49, %v795_v50  ;;  %v922_v17 = vpop.permute.xlu1 %921  ;;  %v927_v60 = vpop.permute.xlu0 %926 }
 0x1c6   : > { %v805_v53 = vrot.slane %v798_v52, %v3140_v31 }
 0x1c8   : > { %v812_v57 = vrot.slane %v805_v53, %v3140_v31  ;;  %v3502_v53 = vrot.slane %v2760_v28, %v3079_v4 }
 0x1ca   : > { %v814_v58 = vsel %vm747_vm8, %v812_v57, 0.0 }
 0x1cb   : > { %v815_v59 = vadd.f32 %v814_v58, %v3341_v38 }
 0x1cd   : > { %v822_v61 = vrot.slane %v815_v59, %v3076_v3  ;;  %v826_v62 = vrot.slane %v815_v59, %v3079_v4 }
 0x1cf   : > { %v842_v63 = vsel %vm840_vm9, %v826_v62, 0.0  ;;  %v843_v0 = vsel %vm841_vm10, %v822_v61, 0.0 }
 0x1d0   : > { %v846_v1 = vcombine.low %v842_v63, %v843_v0 }
 0x1d2   : > { %v853_v8 = vrot.slane %v846_v1, %v3140_v31 }
 0x1d4   : > { %v860_v11 = vrot.slane %v853_v8, %v3140_v31  ;;  %v3017_v8 = vmov 683565275  }
 0x1d6   : > { %v862_v12 = vsel %vm816_vm11, %v860_v11, 0.0  ;;  %vm549_vm11 = vcmp.eq.f32.partialorder %v3391_v9, %v3496_v45  ;;  %v2992_v9 = vld [vmem:[%s4898_s3] sm:$0x3] }
 0x1d7   : > { %v863_v13 = vadd.f32 %v862_v12, %v815_v59 }
 0x1d9   : > { %v884_v38 = vrot.slane %v863_v13, %v3076_v3  ;;  %v888_v6 = vrot.slane %v863_v13, %v3079_v4 }
 0x1db   : > { %v911_v5 = vmul.f32 %v894_v30, %v884_v38  ;;  %v912_v14 = vmul.f32 %v894_v30, %v888_v6  ;;  %v913_v16 = vmul.f32 %v3426_v29, %v884_v38  ;;  %v3470_v18 = vmul.f32 %v904_v33, %v884_v38 }
 0x1dc   : > { %v3472_v42 = vmul.f32 %v904_v33, %v888_v6  ;;  %v3474_v21 = vmul.f32 %v909_v34, %v884_v38  ;;  %v3476_v15 = vmul.f32 %v909_v34, %v888_v6  ;;  %v914_v35 = vmul.f32 %v3426_v29, %v888_v6 }
 0x1dd   : > { %v3478_v22 = vadd.f32 %v922_v17, %v911_v5  ;;  %v3480_v7 = vadd.f32 %v922_v17, %v912_v14  ;;  %v3482_v25 = vadd.f32 %v927_v60, %v913_v16  ;;  %v3018_v38 = vmov 2475754826  }
 0x1de   : > { %v3498_v49 = vadd.f32 %v927_v60, %v914_v35  ;;  %v3019_v5 = vmov 2131351028   ;;  %v4908_v16 = vmov 2102212464   ;;  %v4906_v60 = vmov 920167782  }
 0x1df   : > { %v947_v26 = vand.u32 2147483647, %v3478_v22  ;;  %v950_v27 = vand.u32 2139095040, %v3478_v22  ;;  %v1051_v30 = vand.u32 2147483647, %v3480_v7  ;;  %v1054_v32 = vand.u32 2139095040, %v3480_v7 }
 0x1e0   : > { %v1158_v43 = vand.u32 2139095040, %v3482_v25  ;;  %v4902_v29 = vand.u32 2147483647, %v3482_v25  ;;  %v1262_v0 = vand.u32 2139095040, %v3498_v49 }
 0x1e1   : > { %v951_v33 = vshrl.u32 %v950_v27, 23  ;;  %v954_v34 = vand.u32 8388607, %v947_v26  ;;  %v1055_v36 = vshrl.u32 %v1054_v32, 23  ;;  %v1058_v37 = vand.u32 8388607, %v1051_v30 }
 0x1e2   : > { %v1159_v46 = vshrl.u32 %v1158_v43, 23  ;;  %v3510_v62 = vand.u32 8388607, %v4902_v29 }
 0x1e3   : > { %v2765_v44 = vadd.s32 4294967169, %v951_v33  ;;  %v2769_v2 = vadd.s32 4294967169, %v1055_v36  ;;  %v955_v47 = vor.u32 8388608, %v954_v34  ;;  %v1059_v50 = vor.u32 8388608, %v1058_v37 }
 0x1e4   : > { %v2773_v52 = vadd.s32 4294967169, %v1159_v46  ;;  %v4904_v36 = vmov 1326507024  }
 0x1e5   : > { %v957_v48 = vadd.s32 1, %v2765_v44  ;;  %v1061_v51 = vadd.s32 1, %v2769_v2  ;;  %v3504_v58 = vshll.u32 %v955_v47, 8  ;;  %v3506_v61 = vshll.u32 %v1059_v50, 8 }
 0x1e6   : > { %v3512_v63 = vadd.s32 1, %v2773_v52 }
 0x1e7   : > { %vm958_vm13 = vcmp.gt.s32.totalorder %v957_v48, 0  ;;  %vm1062_vm14 = vcmp.gt.s32.totalorder %v1061_v51, 0 }
 0x1e8   : > { %v959_v55 = vsel %vm958_vm13, %v957_v48, 0  ;;  %v1063_v59 = vsel %vm1062_vm14, %v1061_v51, 0  ;;  %vm1166_vm3 = vcmp.gt.s32.totalorder %v3512_v63, 0  ;;  %vm4910_vm13 = vcmp.eq.f32.partialorder %v3387_v54, %v3502_v53 }
 0x1e9   : > { %v960_v56 = vshrl.u32 %v959_v55, 5  ;;  %v961_v57 = vand.u32 31, %v959_v55  ;;  %v3516_v12 = vshrl.u32 %v1063_v59, 5  ;;  %v1065_v13 = vand.u32 31, %v1063_v59 }
 0x1ea   : > { %vm564_vm14 = vcmp.eq.f32.partialorder %v3403_v23, %v3496_v45 }
 0x1eb   : > { %v962_v1 = vsub.s32 32, %v961_v57  ;;  %v964_v11 = vshll.u32 %v3017_v8, %v961_v57  ;;  %v967_v6 = vshll.u32 %v3018_v38, %v961_v57  ;;  %v970_v14 = vshll.u32 %v3019_v5, %v961_v57 }
 0x1ec   : > { %v973_v17 = vshll.u32 %v4908_v16, %v961_v57  ;;  %v976_v27 = vshll.u32 %v4906_v60, %v961_v57  ;;  %vm979_vm15 = vcmp.lt.s32.totalorder %v960_v56, 1  ;;  %vm980_vm0 = vcmp.lt.s32.totalorder %v960_v56, 2 }
 0x1ed   : > { %v965_v28 = vshrl.u32 %v3018_v38, %v962_v1  ;;  %v968_v32 = vshrl.u32 %v3019_v5, %v962_v1  ;;  %v971_v33 = vshrl.u32 %v4908_v16, %v962_v1  ;;  %v963_v34 = vshrl.u32 %v3017_v8, %v962_v1 }
 0x1ee   : > { %v974_v35 = vshrl.u32 %v4906_v60, %v962_v1  ;;  %v977_v37 = vshrl.u32 %v4904_v36, %v962_v1  ;;  %v1066_v46 = vsub.s32 32, %v1065_v13  ;;  %vm981_vm1 = vcmp.lt.s32.totalorder %v960_v56, 3 }
 0x1ef   : > { %v966_v43 = vor.u32 %v965_v28, %v964_v11  ;;  %v969_v44 = vor.u32 %v968_v32, %v967_v6  ;;  %v972_v2 = vor.u32 %v971_v33, %v970_v14  ;;  %vm982_vm2 = vcmp.lt.s32.totalorder %v960_v56, 4 }
 0x1f0   : > { %v975_v47 = vor.u32 %v974_v35, %v973_v17  ;;  %v978_v48 = vor.u32 %v977_v37, %v976_v27  ;;  %v1068_v1 = vshll.u32 %v3017_v8, %v1065_v13  ;;  %v1069_v14 = vshrl.u32 %v3018_v38, %v1066_v46 }
 0x1f1   : > { %v983_v50 = vsel %vm979_vm15, %v963_v34, %v966_v43  ;;  %v984_v51 = vsel %vm982_vm2, %v972_v2, 2102212464  ;;  %v987_v52 = vsel %vm979_vm15, %v966_v43, %v969_v44  ;;  %v991_v55 = vsel %vm979_vm15, %v969_v44, %v972_v2 }
 0x1f2   : > { %v985_v57 = vsel %vm981_vm1, %v969_v44, %v984_v51  ;;  %v988_v59 = vsel %vm982_vm2, %v975_v47, 920167782  ;;  %v992_v29 = vsel %vm982_vm2, %v978_v48, 1326507024  ;;  %v1071_v17 = vshll.u32 %v3018_v38, %v1065_v13 }
 0x1f3   : > { %v989_v11 = vsel %vm981_vm1, %v972_v2, %v988_v59  ;;  %v993_v6 = vsel %vm981_vm1, %v975_v47, %v992_v29  ;;  %v986_v27 = vsel %vm980_vm0, %v983_v50, %v985_v57  ;;  %v1072_v33 = vshrl.u32 %v3019_v5, %v1066_v46 }
 0x1f4   : > { %v990_v28 = vsel %vm980_vm0, %v987_v52, %v989_v11  ;;  %v994_v32 = vsel %vm980_vm0, %v991_v55, %v993_v6  ;;  %v1070_v29 = vor.u32 %v1069_v14, %v1068_v1  ;;  %v1074_v2 = vshll.u32 %v3019_v5, %v1065_v13 }
 0x1f5   : > { %v3540_v34 = vmul.u32.u64.low %v3504_v58, %v994_v32  ;;  %v3541_v35 = vmul.u32.u64.high %v3504_v58, %v994_v32, %v3540_v34  ;;  %v3544_v37 = vmul.u32.u64.low %v3504_v58, %v990_v28  ;;  %v3545_v43 = vmul.u32.u64.high %v3504_v58, %v990_v28, %v3544_v37 }
 0x1f6   : > { %v1073_v44 = vor.u32 %v1072_v33, %v1071_v17  ;;  %v1075_v47 = vshrl.u32 %v4908_v16, %v1066_v46  ;;  %v1067_v48 = vshrl.u32 %v3017_v8, %v1066_v46  ;;  %v1077_v56 = vshll.u32 %v4908_v16, %v1065_v13 }
 0x1f7   : > { %v1078_v50 = vshrl.u32 %v4906_v60, %v1066_v46  ;;  %v1081_v51 = vshrl.u32 %v4904_v36, %v1066_v46  ;;  %v1002_v52 = vmul.u32 %v3504_v58, %v986_v27  ;;  %v1080_v57 = vshll.u32 %v4906_v60, %v1065_v13 }
 0x1f8   : > { %v1076_v55 = vor.u32 %v1075_v47, %v1074_v2  ;;  %vm1083_vm4 = vcmp.lt.s32.totalorder %v3516_v12, 1  ;;  %vm1004_vm7 = vc.u32 %v3541_v35, %v3544_v37  ;;  %v1005_v59 = vadd.s32 1, %v3545_v43 }
 0x1f9   : > { %v1079_v1 = vor.u32 %v1078_v50, %v1077_v56  ;;  %vm1084_vm8 = vcmp.lt.s32.totalorder %v3516_v12, 2  ;;  %v1082_v11 = vor.u32 %v1081_v51, %v1080_v57  ;;  %vm1085_vm9 = vcmp.lt.s32.totalorder %v3516_v12, 3 }
 0x1fa   : > { %vm1086_vm10 = vcmp.lt.s32.totalorder %v3516_v12, 4  ;;  %v1091_v46 = vsel %vm1083_vm4, %v1070_v29, %v1073_v44  ;;  %v1006_v58 = vsel %vm1004_vm7, %v1005_v59, %v3545_v43  ;;  %v1095_v13 = vsel %vm1083_vm4, %v1073_v44, %v1076_v55 }
 0x1fb   : > { %v1088_v6 = vsel %vm1086_vm10, %v1076_v55, 2102212464  ;;  %v1092_v14 = vsel %vm1086_vm10, %v1079_v1, 920167782  ;;  %v1007_v17 = vadd.s32 %v1006_v58, %v1002_v52  ;;  %v1087_v27 = vsel %vm1083_vm4, %v1067_v48, %v1070_v29  ;;  %vm3639_vm4 = vmxor %vm4910_vm13, %vm3008_vm6 }
 0x1fc   : > { %v1093_v28 = vsel %vm1085_vm9, %v1076_v55, %v1092_v14  ;;  %v1096_v32 = vsel %vm1086_vm10, %v1082_v11, 1326507024  ;;  %v1089_v33 = vsel %vm1085_vm9, %v1073_v44, %v1088_v6  ;;  %v1167_v47 = vsel %vm1166_vm3, %v3512_v63, 0  ;;  %vm3629_vm3 = vmxor %vm549_vm11, %vm3008_vm6 }
 0x1fd   : > { %v1094_v34 = vsel %vm1084_vm8, %v1091_v46, %v1093_v28  ;;  %v1097_v2 = vsel %vm1085_vm9, %v1079_v1, %v1096_v32  ;;  %v1008_v56 = vadd.s32 536870912, %v1007_v17  ;;  %v4903_v48 = vand.u32 2147483647, %v3498_v49  ;;  %vm3654_vm9 = vmand %vm564_vm14, %vm3629_vm3 }
 0x1fe   : > { %v1098_v43 = vsel %vm1084_vm8, %v1095_v13, %v1097_v2  ;;  %v3570_v50 = vmul.u32.u64.low %v3506_v61, %v1094_v34  ;;  %v3571_v51 = vmul.u32.u64.high %v3506_v61, %v1094_v34, %v3570_v50  ;;  %v1090_v55 = vsel %vm1084_vm8, %v1087_v27, %v1089_v33 }
 0x1ff   : > { %v3575_v29 = vmul.u32.u64.low %v3506_v61, %v1098_v43  ;;  %v3576_v44 = vmul.u32.u64.high %v3506_v61, %v1098_v43, %v3575_v29  ;;  %v1009_v52 = vshrl.u32 %v1008_v56, 30  ;;  %v1163_v63 = vor.u32 8388608, %v3510_v62 }
 0x200   : > { %v1169_v57 = vand.u32 31, %v1167_v47  ;;  %v1109_v1 = vadd.s32 1, %v3571_v51  ;;  %v1263_v12 = vshrl.u32 %v1262_v0, 23  ;;  %vm565_vm15 = vcmp.eq.f32.partialorder %v3407_v24, %v3502_v53 }
 0x201   : > { %v1010_v59 = vshll.u32 %v1009_v52, 30  ;;  %v1106_v62 = vmul.u32 %v3506_v61, %v1090_v55  ;;  %vm1108_vm0 = vc.u32 %v3576_v44, %v3570_v50  ;;  %v3598_v46 = vand.u32 8388607, %v4903_v48  ;;  %vm3670_vm14 = vmand %vm565_vm15, %vm3639_vm4 }
 0x202   : > { %v1170_v11 = vsub.s32 32, %v1169_v57  ;;  %vm949_vm1 = vcmp.lt.s32.totalorder %v3478_v22, 0  ;;  %v1110_v6 = vsel %vm1108_vm0, %v1109_v1, %v3571_v51  ;;  %v3604_v14 = vshll.u32 %v1163_v63, 8 }
 0x203   : > { %v3601_v58 = vsub.s32 %v1007_v17, %v1010_v59  ;;  %vm3608_vm2 = vcmp.le.f32.partialorder %v947_v26, 0.7853982  ;;  %v1003_v61 = vadd.s32 %v3544_v37, %v3541_v35  ;;  %v1111_v13 = vadd.s32 %v1110_v6, %v1106_v62 }
 0x204   : > { %v3613_v27 = vshrl.u32 %v1167_v47, 5  ;;  %v1173_v28 = vshrl.u32 %v3018_v38, %v1170_v11  ;;  %v1176_v32 = vshrl.u32 %v3019_v5, %v1170_v11  ;;  %v1179_v33 = vshrl.u32 %v4908_v16, %v1170_v11 }
 0x205   : > { %v1013_v17 = vsub.s32 0, %v3601_v58  ;;  %v2777_v34 = vadd.s32 4294967169, %v1263_v12  ;;  %v1033_v2 = vsub.s32 4, %v1009_v52  ;;  %v1112_v56 = vadd.s32 536870912, %v1111_v13 }
 0x206   : > { %v1172_v26 = vshll.u32 %v3017_v8, %v1169_v57  ;;  %v1175_v37 = vshll.u32 %v3018_v38, %v1169_v57  ;;  %v1178_v47 = vshll.u32 %v3019_v5, %v1169_v57  ;;  %v1182_v51 = vshrl.u32 %v4906_v60, %v1170_v11 }
 0x207   : > { %v2766_v35 = vmin.u32 %v1013_v17, %v3601_v58  ;;  %v1113_v55 = vshrl.u32 %v1112_v56, 30  ;;  %v1181_v59 = vshll.u32 %v4908_v16, %v1169_v57  ;;  %v1185_v1 = vshrl.u32 %v4904_v36, %v1170_v11 }
 0x208   : > { %v1174_v63 = vor.u32 %v1173_v28, %v1172_v26  ;;  %v1177_v6 = vor.u32 %v1176_v32, %v1175_v37  ;;  %v1180_v17 = vor.u32 %v1179_v33, %v1178_v47  ;;  %v1184_v48 = vshll.u32 %v4906_v60, %v1169_v57 }
 0x209   : > { %v1015_v62 = vclz %v2766_v35  ;;  %v1034_v28 = vsel %vm949_vm1, %v1033_v2, %v1009_v52  ;;  %v1114_v56 = vshll.u32 %v1113_v55, 30  ;;  %v1183_v26 = vor.u32 %v1182_v51, %v1181_v59 }
 0x20a   : > { %vm1187_vm7 = vcmp.lt.s32.totalorder %v3613_v27, 1  ;;  %v1186_v36 = vor.u32 %v1185_v1, %v1184_v48  ;;  %vm1188_vm8 = vcmp.lt.s32.totalorder %v3613_v27, 2  ;;  %vm1190_vm6 = vcmp.lt.s32.totalorder %v3613_v27, 4 }
 0x20b   : > { %v2767_v43 = vadd.s32 4294967294, %v1015_v62  ;;  %vm1053_vm10 = vcmp.lt.s32.totalorder %v3480_v7, 0  ;;  %v3659_v52 = vsub.s32 %v1111_v13, %v1114_v56  ;;  %v1171_v32 = vshrl.u32 %v3017_v8, %v1170_v11 }
 0x20c   : > { %vm1189_vm0 = vcmp.lt.s32.totalorder %v3613_v27, 3  ;;  %v1196_v48 = vsel %vm1190_vm6, %v1183_v26, 920167782  ;;  %v1036_v13 = vsel %vm3608_vm2, 0, %v1034_v28  ;;  %v1195_v11 = vsel %vm1187_vm7, %v1174_v63, %v1177_v6 }
 0x20d   : > { %vm2768_vm3 = vcmp.lt.s32.totalorder %v2767_v43, 0  ;;  %v1197_v33 = vsel %vm1189_vm0, %v1180_v17, %v1196_v48  ;;  %v1117_v35 = vsub.s32 0, %v3659_v52  ;;  %v1137_v37 = vsub.s32 4, %v1113_v55 }
 0x20e   : > { %v1018_v2 = vsel %vm2768_vm3, 0, %v2767_v43  ;;  %v1199_v24 = vsel %vm1187_vm7, %v1177_v6, %v1180_v17  ;;  %vm3685_vm15 = vcmp.le.f32.partialorder %v1051_v30, 0.7853982  ;;  %v1192_v59 = vsel %vm1190_vm6, %v1180_v17, 2102212464 }
 0x20f   : > { %v1019_v47 = vsub.s32 32, %v1018_v2  ;;  %v1023_v51 = vsub.s32 4294967266, %v1018_v2  ;;  %v1200_v43 = vsel %vm1190_vm6, %v1186_v36, 1326507024  ;;  %v1020_v1 = vshll.u32 %v3601_v58, %v1018_v2 }
 0x210   : > { %v2770_v12 = vmin.u32 %v1117_v35, %v3659_v52  ;;  %v1198_v62 = vsel %vm1188_vm8, %v1195_v11, %v1197_v33  ;;  %v1201_v28 = vsel %vm1189_vm0, %v1183_v26, %v1200_v43  ;;  %v1269_v60 = vadd.s32 1, %v2777_v34 }
 0x211   : > { %v1021_v30 = vshrl.u32 %v1003_v61, %v1019_v47  ;;  %v1024_v56 = vadd.s32 127, %v1023_v51  ;;  %v1202_v48 = vsel %vm1188_vm8, %v1199_v24, %v1201_v28  ;;  %v1040_v17 = vadd.s32 3, %v1036_v13 }
 0x212   : > { %v1119_v16 = vclz %v2770_v12  ;;  %v1191_v36 = vsel %vm1187_vm7, %v1171_v32, %v1174_v63  ;;  %v1193_v58 = vsel %vm1189_vm0, %v1177_v6, %v1192_v59  ;;  %vm1270_vm4 = vcmp.gt.s32.totalorder %v1269_v60, 0 }
 0x213   : > { %v1022_v2 = vor.u32 %v1021_v30, %v1020_v1  ;;  %v1025_v35 = vshll.u32 %v1024_v56, 23  ;;  %v3706_v11 = vmul.u32.u64.low %v3604_v14, %v1202_v48  ;;  %v3707_v33 = vmul.u32.u64.high %v3604_v14, %v1202_v48, %v3706_v11 }
 0x214   : > { %v2771_v61 = vadd.s32 4294967294, %v1119_v16  ;;  %v3710_v26 = vmul.u32.u64.low %v3604_v14, %v1198_v62  ;;  %v3711_v47 = vmul.u32.u64.high %v3604_v14, %v1198_v62, %v3710_v26  ;;  %v1107_v63 = vadd.s32 %v3570_v50, %v3576_v44 }
 0x215   : > { %v1026_v34 = vor.u32 4788187, %v1025_v35  ;;  %v1138_v6 = vsel %vm1053_vm10, %v1137_v37, %v1113_v55  ;;  %v1271_v32 = vsel %vm1270_vm4, %v1269_v60, 0  ;;  %v3718_v13 = vand.u32 3, %v1040_v17 }
 0x216   : > { %vm2772_vm7 = vcmp.lt.s32.totalorder %v2771_v61, 0  ;;  %v1194_v16 = vsel %vm1188_vm8, %v1191_v36, %v1193_v58  ;;  %v1273_v24 = vand.u32 31, %v1271_v32  ;;  %v1029_v59 = vcvt.s32.f32 %v1022_v2 }
 0x217   : > { %v1027_v51 = vand.u32 2147483647, %v1026_v34  ;;  %v1122_v43 = vsel %vm2772_vm7, 0, %v2771_v61  ;;  %vm1212_vm6 = vc.u32 %v3707_v33, %v3710_v26  ;;  %v1140_v50 = vsel %vm3685_vm15, 0, %v1138_v6 }
 0x218   : > { %v1123_v1 = vsub.s32 32, %v1122_v43  ;;  %v1127_v12 = vsub.s32 4294967266, %v1122_v43  ;;  %v1213_v60 = vadd.s32 1, %v3711_v47  ;;  %v1210_v55 = vmul.u32 %v3604_v14, %v1194_v16 }
 0x219   : > { %v1030_v44 = vmul.f32 %v1029_v59, %v1027_v51  ;;  %v3728_v37 = vshrl.u32 %v1271_v32, 5  ;;  %v1274_v27 = vsub.s32 32, %v1273_v24  ;;  %v1124_v62 = vshll.u32 %v3659_v52, %v1122_v43  ;;  %v932_v59 = vpop.permute.xlu1 %931 }
 0x21a   : > { %v1125_v28 = vshrl.u32 %v1107_v63, %v1123_v1  ;;  %v1128_v30 = vadd.s32 127, %v1127_v12  ;;  %v1214_v56 = vsel %vm1212_vm6, %v1213_v60, %v3711_v47  ;;  %v1276_v36 = vshll.u32 %v3017_v8, %v1273_v24 }
 0x21b   : > { %v1031_v48 = vxor.u32 2147483648, %v1030_v44  ;;  %v1215_v17 = vadd.s32 %v1214_v56, %v1210_v55  ;;  %v1277_v58 = vshrl.u32 %v3018_v38, %v1274_v27  ;;  %v1279_v11 = vshll.u32 %v3018_v38, %v1273_v24 }
 0x21c   : > { %v1126_v2 = vor.u32 %v1125_v28, %v1124_v62  ;;  %v1129_v35 = vshll.u32 %v1128_v30, 23  ;;  %v1280_v14 = vshrl.u32 %v3019_v5, %v1274_v27  ;;  %v1282_v34 = vshll.u32 %v3019_v5, %v1273_v24 }
 0x21d   : > { %v1032_v61 = vsel %vm949_vm1, %v1031_v48, %v1030_v44  ;;  %v1216_v52 = vadd.s32 536870912, %v1215_v17  ;;  %v4927_v63 = vmov 2102212464   ;;  %v1278_v16 = vor.u32 %v1277_v58, %v1276_v36 }
 0x21e   : > { %v1283_v47 = vshrl.u32 %v4927_v63, %v1274_v27  ;;  %v1035_v6 = vsel %vm3608_vm2, %v3478_v22, %v1032_v61  ;;  %v1130_v32 = vor.u32 4788187, %v1129_v35  ;;  %v1285_v51 = vshll.u32 %v4927_v63, %v1273_v24 }
 0x21f   : > { %2928 = vcosq.f32 %v1035_v6  ;;  %v1133_v43 = vcvt.s32.f32 %v1126_v2  ;;  %v1217_v1 = vshrl.u32 %v1216_v52, 30  ;;  %v4928_v12 = vmov 920167782  }
 0x220   : > { %v1286_v60 = vshrl.u32 %v4928_v12, %v1274_v27  ;;  %2930 = vsinq.f32 %v1035_v6  ;;  %v1131_v44 = vand.u32 2147483647, %v1130_v32  ;;  %v1281_v55 = vor.u32 %v1280_v14, %v1279_v11 }
 0x221   : > { %v4929_v62 = vmov 1326507024   ;;  %v1218_v30 = vshll.u32 %v1217_v1, 30  ;;  %v3747_v0 = vadd.f32 %v932_v59, %v3470_v18  ;;  %v3750_v48 = vadd.f32 %v932_v59, %v3472_v42 }
 0x222   : > { %v1289_v28 = vshrl.u32 %v4929_v62, %v1274_v27  ;;  %v1287_v56 = vor.u32 %v1286_v60, %v1285_v51  ;;  %v1134_v36 = vmul.f32 %v1133_v43, %v1131_v44  ;;  %v1144_v58 = vadd.s32 3, %v1140_v50 }
 0x223   : > { %vm1157_vm1 = vcmp.lt.s32.totalorder %v3482_v25, 0  ;;  %v1284_v2 = vor.u32 %v1283_v47, %v1282_v34  ;;  %v1288_v35 = vshll.u32 %v4928_v12, %v1273_v24  ;;  %v3754_v61 = vsub.s32 %v1215_v17, %v1218_v30 }
 0x224   : > { %v1275_v11 = vshrl.u32 %v3017_v8, %v1274_v27  ;;  %vm1291_vm2 = vcmp.lt.s32.totalorder %v3728_v37, 1  ;;  %v4930_v14 = vor.u32 8388608, %v3598_v46  ;;  %vm1043_vm8 = vcmp.eq.s32.totalorder %v3718_v13, 0 }
 0x225   : > { %v1135_v42 = vxor.u32 2147483648, %v1134_v36  ;;  %v1290_v52 = vor.u32 %v1289_v28, %v1288_v35  ;;  %vm1294_vm0 = vcmp.lt.s32.totalorder %v3728_v37, 4  ;;  %v1299_v50 = vsel %vm1291_vm2, %v1278_v16, %v1281_v55 }
 0x226   : > { %v3760_v18 = vshll.u32 %v4930_v14, 8  ;;  %vm1042_vm3 = vcmp.lt.s32.totalorder %v3718_v13, 2  ;;  %v1221_v24 = vsub.s32 0, %v3754_v61  ;;  %v1241_v27 = vsub.s32 4, %v1217_v1 }
 0x227   : > { %vm1293_vm4 = vcmp.lt.s32.totalorder %v3728_v37, 3  ;;  %v1300_v46 = vsel %vm1294_vm0, %v1287_v56, 920167782  ;;  %vm1039_vm7 = vweird.f32 %v3478_v22  ;;  %v1136_v17 = vsel %vm1053_vm10, %v1135_v42, %v1134_v36 }
 0x228   : > { %v4931_v34 = vand.u32 2147483647, %v3482_v25  ;;  %vm1292_vm13 = vcmp.lt.s32.totalorder %v3728_v37, 2  ;;  %v1296_v6 = vsel %vm1294_vm0, %v1284_v2, 2102212464  ;;  %v1301_v32 = vsel %vm1293_vm4, %v1284_v2, %v1300_v46 }
 0x229   : > { %v1139_v51 = vsel %vm3685_vm15, %v3480_v7, %v1136_v17  ;;  %v2774_v59 = vmin.u32 %v1221_v24, %v3754_v61  ;;  %v1302_v43 = vsel %vm1292_vm13, %v1299_v50, %v1301_v32  ;;  %v1303_v60 = vsel %vm1291_vm2, %v1281_v55, %v1284_v2  ;;  %v2929_v36 = vpop.eup %2928 }
 0x22a   : > { %vm3776_vm6 = vcmp.le.f32.partialorder %v4931_v34, 0.7853982  ;;  %2932 = vcosq.f32 %v1139_v51  ;;  %v1304_v44 = vsel %vm1294_vm0, %v1290_v52, 1326507024  ;;  %vm1046_vm10 = vcmp.eq.s32.totalorder %v3718_v13, 2  ;;  %v2931_v14 = vpop.eup %2930 }
 0x22b   : > { %v3796_v28 = vmul.u32.u64.low %v3760_v18, %v1302_v43  ;;  %v3797_v30 = vmul.u32.u64.high %v3760_v18, %v1302_v43, %v3796_v28  ;;  %2934 = vsinq.f32 %v1139_v51  ;;  %v3801_v29 = vand.u32 3, %v1144_v58 }
 0x22c   : > { %v1223_v35 = vclz %v2774_v59  ;;  %v1047_v42 = vxor.u32 2147483648, %v2929_v36  ;;  %v1295_v2 = vsel %vm1291_vm2, %v1275_v11, %v1278_v16  ;;  %v1297_v52 = vsel %vm1293_vm4, %v1281_v55, %v1296_v6 }
 0x22d   : > { %v1305_v50 = vsel %vm1293_vm4, %v1287_v56, %v1304_v44  ;;  %v1044_v24 = vxor.u32 2147483648, %v2931_v14  ;;  %v1242_v17 = vsel %vm1157_vm1, %v1241_v27, %v1217_v1  ;;  %v1363_v16 = vand.u32 2147483647, %v3747_v0 }
 0x22e   : > { %v2775_v46 = vadd.s32 4294967294, %v1223_v35  ;;  %v1306_v58 = vsel %vm1292_vm13, %v1303_v60, %v1305_v50  ;;  %v1048_v34 = vsel %vm1046_vm10, %v1047_v42, %v2931_v14  ;;  %v1298_v1 = vsel %vm1292_vm13, %v1295_v2, %v1297_v52 }
 0x22f   : > { %v3815_v32 = vmul.u32.u64.low %v3760_v18, %v1306_v58  ;;  %v3816_v51 = vmul.u32.u64.high %v3760_v18, %v1306_v58, %v3815_v32  ;;  %v1045_v55 = vsel %vm1043_vm8, %v2929_v36, %v1044_v24  ;;  %v1317_v56 = vadd.s32 1, %v3797_v30 }
 0x230   : > { %vm2776_vm15 = vcmp.lt.s32.totalorder %v2775_v46, 0  ;;  %v1049_v11 = vsel %vm1042_vm3, %v1045_v55, %v1048_v34  ;;  %vm1146_vm2 = vcmp.lt.s32.totalorder %v3801_v29, 2  ;;  %v1211_v27 = vadd.s32 %v3710_v26, %v3707_v33 }
 0x231   : > { %v1226_v6 = vsel %vm2776_vm15, 0, %v2775_v46  ;;  %v1366_v59 = vand.u32 2139095040, %v3747_v0  ;;  %v1050_v43 = vsel %vm1039_vm7, nan, %v1049_v11  ;;  %vm1143_vm8 = vweird.f32 %v3480_v7 }
 0x232   : > { %v1227_v37 = vsub.s32 32, %v1226_v6  ;;  %v1231_v60 = vsub.s32 4294967266, %v1226_v6  ;;  %v1244_v44 = vsel %vm3776_vm6, 0, %v1242_v17  ;;  %1779 = vst [vmem:[%s3822_s12] sm:$0xff] %v1050_v43  ;;  %v1314_v13 = vmul.u32 %v3760_v18, %v1298_v1 }
 0x233   : > { %vm1316_vm13 = vc.u32 %v3816_v51, %v3796_v28  ;;  %v1367_v33 = vshrl.u32 %v1366_v59, 23  ;;  %v1370_v26 = vand.u32 8388607, %v1363_v16  ;;  %v1228_v22 = vshll.u32 %v3754_v61, %v1226_v6  ;;  %v3854_v59 = vpop.permute.xlu0 %936 }
 0x234   : > { %v1229_v36 = vshrl.u32 %v1211_v27, %v1227_v37  ;;  %v1232_v35 = vadd.s32 127, %v1231_v60  ;;  %v1318_v14 = vsel %vm1316_vm13, %v1317_v56, %v3797_v30  ;;  %v2933_v42 = vpop.eup %2932  ;;  %vm1147_vm0 = vcmp.eq.s32.totalorder %v3801_v29, 0 }
 0x235   : > { %vm1150_vm3 = vcmp.eq.s32.totalorder %v3801_v29, 2  ;;  %v1319_v2 = vadd.s32 %v1318_v14, %v1314_v13  ;;  %v2781_v18 = vadd.s32 4294967169, %v1367_v33  ;;  %v2935_v52 = vpop.eup %2934  ;;  %v1151_v50 = vxor.u32 2147483648, %v2933_v42 }
 0x236   : > { %v1230_v24 = vor.u32 %v1229_v36, %v1228_v22  ;;  %v1233_v46 = vshll.u32 %v1232_v35, 23  ;;  %v1467_v17 = vand.u32 2147483647, %v3750_v48  ;;  %v1148_v58 = vxor.u32 2147483648, %v2935_v52 }
 0x237   : > { %v1248_v34 = vadd.s32 3, %v1244_v44  ;;  %v1320_v61 = vadd.s32 536870912, %v1319_v2  ;;  %v1373_v32 = vadd.s32 1, %v2781_v18  ;;  %v1152_v55 = vsel %vm1150_vm3, %v1151_v50, %v2935_v52 }
 0x238   : > { %v1234_v1 = vor.u32 4788187, %v1233_v46  ;;  %v1371_v30 = vor.u32 8388608, %v1370_v26  ;;  %v1470_v56 = vand.u32 2139095040, %v3750_v48  ;;  %v1149_v11 = vsel %vm1147_vm0, %v2933_v42, %v1148_v58 }
 0x239   : > { %v1237_v27 = vcvt.s32.f32 %v1230_v24  ;;  %v1321_v6 = vshrl.u32 %v1320_v61, 30  ;;  %vm1374_vm4 = vcmp.gt.s32.totalorder %v1373_v32, 0  ;;  %v1153_v43 = vsel %vm1146_vm2, %v1149_v11, %v1152_v55 }
 0x23a   : > { %v1235_v37 = vand.u32 2147483647, %v1234_v1  ;;  %v1375_v60 = vsel %vm1374_vm4, %v1373_v32, 0  ;;  %v3860_v44 = vand.u32 8388607, %v1467_v17  ;;  %v1154_v13 = vsel %vm1143_vm8, nan, %v1153_v43 }
 0x23b   : > { %v1322_v33 = vshll.u32 %v1321_v6, 30  ;;  %v1345_v26 = vsub.s32 4, %v1321_v6  ;;  %v1471_v22 = vshrl.u32 %v1470_v56, 23  ;;  %1780 = vst [vmem:[%s3822_s12 + $0x8] sm:$0xff] %v1154_v13  ;;  %v1377_v35 = vand.u32 31, %v1375_v60 }
 0x23c   : > { %v1238_v36 = vmul.f32 %v1237_v27, %v1235_v37  ;;  %v3867_v14 = vadd.f32 %v3854_v59, %v3474_v21  ;;  %v3869_v29 = vand.u32 3, %v1248_v34  ;;  %v4934_v42 = vand.u32 2147483647, %v3498_v49 }
 0x23d   : > { %vm1261_vm10 = vcmp.lt.s32.totalorder %v3498_v49, 0  ;;  %v1315_v7 = vadd.s32 %v3796_v28, %v3816_v51  ;;  %v3880_v52 = vsub.s32 %v1319_v2, %v1322_v33  ;;  %v3882_v24 = vshrl.u32 %v1375_v60, 5 }
 0x23e   : > { %vm3873_vm7 = vcmp.le.f32.partialorder %v4934_v42, 0.7853982  ;;  %v1239_v50 = vxor.u32 2147483648, %v1238_v36  ;;  %v1378_v21 = vsub.s32 32, %v1377_v35  ;;  %v3884_v46 = vshll.u32 %v1371_v30, 8 }
 0x23f   : > { %v1325_v58 = vsub.s32 0, %v3880_v52  ;;  %v3889_v34 = vsel %vm1261_vm10, %v1345_v26, %v1321_v6  ;;  %v2785_v61 = vadd.s32 4294967169, %v1471_v22  ;;  %v1475_v32 = vor.u32 8388608, %v3860_v44 }
 0x240   : > { %v1240_v28 = vsel %vm1157_vm1, %v1239_v50, %v1238_v36  ;;  %v1380_v51 = vshll.u32 %v3017_v8, %v1377_v35  ;;  %v1381_v2 = vshrl.u32 %v3018_v38, %v1378_v21  ;;  %v1384_v55 = vshrl.u32 %v3019_v5, %v1378_v21 }
 0x241   : > { %v1243_v1 = vsel %vm3776_vm6, %v3482_v25, %v1240_v28  ;;  %v2778_v30 = vmin.u32 %v1325_v58, %v3880_v52  ;;  %v1383_v56 = vshll.u32 %v3018_v38, %v1377_v35  ;;  %v1387_v11 = vshrl.u32 %v4927_v63, %v1378_v21 }
 0x242   : > { %2936 = vcosq.f32 %v1243_v1  ;;  %v1386_v27 = vshll.u32 %v3019_v5, %v1377_v35  ;;  %vm1395_vm1 = vcmp.lt.s32.totalorder %v3882_v24, 1  ;;  %vm1396_vm15 = vcmp.lt.s32.totalorder %v3882_v24, 2 }
 0x243   : > { %2938 = vsinq.f32 %v1243_v1  ;;  %v1327_v6 = vclz %v2778_v30  ;;  %v1382_v43 = vor.u32 %v1381_v2, %v1380_v51  ;;  %v1385_v37 = vor.u32 %v1384_v55, %v1383_v56 }
 0x244   : > { %v1379_v47 = vshrl.u32 %v3017_v8, %v1378_v21  ;;  %v1388_v60 = vor.u32 %v1387_v11, %v1386_v27  ;;  %v1389_v13 = vshll.u32 %v4927_v63, %v1377_v35  ;;  %v1390_v33 = vshrl.u32 %v4928_v12, %v1378_v21 }
 0x245   : > { %v2779_v26 = vadd.s32 4294967294, %v1327_v6  ;;  %v1392_v22 = vshll.u32 %v4928_v12, %v1377_v35  ;;  %v1393_v36 = vshrl.u32 %v4929_v62, %v1378_v21  ;;  %vm1398_vm6 = vcmp.lt.s32.totalorder %v3882_v24, 4 }
 0x246   : > { %vm1254_vm2 = vcmp.eq.s32.totalorder %v3869_v29, 2  ;;  %v1348_v42 = vsel %vm3873_vm7, 0, %v3889_v34  ;;  %v1391_v50 = vor.u32 %v1390_v33, %v1389_v13  ;;  %vm1397_vm8 = vcmp.lt.s32.totalorder %v3882_v24, 3 }
 0x247   : > { %v1400_v58 = vsel %vm1398_vm6, %v1388_v60, 2102212464  ;;  %vm1251_vm13 = vcmp.eq.s32.totalorder %v3869_v29, 0  ;;  %vm2780_vm0 = vcmp.lt.s32.totalorder %v2779_v26, 0  ;;  %v1394_v35 = vor.u32 %v1393_v36, %v1392_v22 }
 0x248   : > { %v1399_v21 = vsel %vm1395_vm1, %v1379_v47, %v1382_v43  ;;  %v1403_v28 = vsel %vm1395_vm1, %v1382_v43, %v1385_v37  ;;  %vm1250_vm3 = vcmp.lt.s32.totalorder %v3869_v29, 2  ;;  %v1330_v51 = vsel %vm2780_vm0, 0, %v2779_v26 }
 0x249   : > { %v1401_v34 = vsel %vm1397_vm8, %v1385_v37, %v1400_v58  ;;  %v1404_v2 = vsel %vm1398_vm6, %v1391_v50, 920167782  ;;  %v1477_v55 = vadd.s32 1, %v2785_v61  ;;  %vm1247_vm4 = vweird.f32 %v3482_v25 }
 0x24a   : > { %v1331_v1 = vsub.s32 32, %v1330_v51  ;;  %v1335_v30 = vsub.s32 4294967266, %v1330_v51  ;;  %v1405_v56 = vsel %vm1397_vm8, %v1388_v60, %v1404_v2  ;;  %v1407_v11 = vsel %vm1395_vm1, %v1385_v37, %v1388_v60 }
 0x24b   : > { %v1332_v27 = vshll.u32 %v3880_v52, %v1330_v51  ;;  %v1406_v6 = vsel %vm1396_vm15, %v1403_v28, %v1405_v56  ;;  %v1408_v43 = vsel %vm1398_vm6, %v1394_v35, 1326507024  ;;  %vm1478_vm0 = vcmp.gt.s32.totalorder %v1477_v55, 0 }
 0x24c   : > { %v1333_v61 = vshrl.u32 %v1315_v7, %v1331_v1  ;;  %v1336_v47 = vadd.s32 127, %v1335_v30  ;;  %v1409_v13 = vsel %vm1397_vm8, %v1391_v50, %v1408_v43  ;;  %v1479_v33 = vsel %vm1478_vm0, %v1477_v55, 0  ;;  %v2937_v26 = vpop.eup %2936 }
 0x24d   : > { %v1402_v22 = vsel %vm1396_vm15, %v1399_v21, %v1401_v34  ;;  %v1410_v52 = vsel %vm1396_vm15, %v1407_v11, %v1409_v13  ;;  %v3946_v37 = vmul.u32.u64.low %v3884_v46, %v1406_v6  ;;  %v3947_v60 = vmul.u32.u64.high %v3884_v46, %v1406_v6, %v3946_v37  ;;  %v2939_v36 = vpop.eup %2938 }
 0x24e   : > { %v1255_v58 = vxor.u32 2147483648, %v2937_v26  ;;  %v1334_v7 = vor.u32 %v1333_v61, %v1332_v27  ;;  %v1337_v35 = vshll.u32 %v1336_v47, 23  ;;  %v1481_v28 = vand.u32 31, %v1479_v33 }
 0x24f   : > { %v1252_v51 = vxor.u32 2147483648, %v2939_v36  ;;  %v3950_v50 = vadd.s32 3, %v1348_v42  ;;  %v3953_v2 = vmul.u32.u64.low %v3884_v46, %v1410_v52  ;;  %v3954_v55 = vmul.u32.u64.high %v3884_v46, %v1410_v52, %v3953_v2 }
 0x250   : > { %v1256_v24 = vsel %vm1254_vm2, %v1255_v58, %v2939_v36  ;;  %v1338_v21 = vor.u32 4788187, %v1337_v35  ;;  %v1418_v34 = vmul.u32 %v3884_v46, %v1402_v22  ;;  %v1482_v1 = vsub.s32 32, %v1481_v28 }
 0x251   : > { %v1253_v30 = vsel %vm1251_vm13, %v2937_v26, %v1252_v51  ;;  %v1341_v56 = vcvt.s32.f32 %v1334_v7  ;;  %v1421_v11 = vadd.s32 1, %v3947_v60  ;;  %v1480_v42 = vshrl.u32 %v1479_v33, 5 }
 0x252   : > { %v1257_v27 = vsel %vm1250_vm3, %v1253_v30, %v1256_v24  ;;  %v1339_v6 = vand.u32 2147483647, %v1338_v21  ;;  %v1484_v43 = vshll.u32 %v3017_v8, %v1481_v28  ;;  %v1485_v61 = vshrl.u32 %v3018_v38, %v1482_v1 }
 0x253   : > { %v1258_v47 = vsel %vm1247_vm4, nan, %v1257_v27  ;;  %vm1420_vm1 = vc.u32 %v3954_v55, %v3946_v37  ;;  %v1487_v46 = vshll.u32 %v3018_v38, %v1481_v28  ;;  %v1488_v13 = vshrl.u32 %v3019_v5, %v1482_v1 }
 0x254   : > { %v1342_v26 = vmul.f32 %v1341_v56, %v1339_v6  ;;  %1781 = vst [vmem:[%s3822_s12 + $0x10] sm:$0xff] %v1258_v47  ;;  %v1422_v29 = vsel %vm1420_vm1, %v1421_v11, %v3947_v60  ;;  %v1486_v33 = vor.u32 %v1485_v61, %v1484_v43  ;;  %v1490_v22 = vshll.u32 %v3019_v5, %v1481_v28 }
 0x255   : > { %v1423_v52 = vadd.s32 %v1422_v29, %v1418_v34  ;;  %v1489_v36 = vor.u32 %v1488_v13, %v1487_v46  ;;  %v1491_v58 = vshrl.u32 %v4927_v63, %v1482_v1  ;;  %v1493_v25 = vshll.u32 %v4927_v63, %v1481_v28 }
 0x256   : > { %v1343_v7 = vxor.u32 2147483648, %v1342_v26  ;;  %v1494_v35 = vshrl.u32 %v4928_v12, %v1482_v1  ;;  %v1496_v51 = vshll.u32 %v4928_v12, %v1481_v28  ;;  %v1497_v2 = vshrl.u32 %v4929_v62, %v1482_v1 }
 0x257   : > { %v1424_v24 = vadd.s32 536870912, %v1423_v52  ;;  %v1483_v21 = vshrl.u32 %v3017_v8, %v1482_v1  ;;  %v1492_v60 = vor.u32 %v1491_v58, %v1490_v22  ;;  %vm1499_vm15 = vcmp.lt.s32.totalorder %v1480_v42, 1 }
 0x258   : > { %v1344_v34 = vsel %vm1261_vm10, %v1343_v7, %v1342_v26  ;;  %v1495_v30 = vor.u32 %v1494_v35, %v1493_v25  ;;  %v1498_v56 = vor.u32 %v1497_v2, %v1496_v51  ;;  %vm1502_vm6 = vcmp.lt.s32.totalorder %v1480_v42, 4 }
 0x259   : > { %v1347_v11 = vsel %vm3873_vm7, %v3498_v49, %v1344_v34  ;;  %v1425_v27 = vshrl.u32 %v1424_v24, 30  ;;  %vm1500_vm2 = vcmp.lt.s32.totalorder %v1480_v42, 2  ;;  %v1504_v28 = vsel %vm1502_vm6, %v1492_v60, 2102212464 }
 0x25a   : > { %2940 = vcosq.f32 %v1347_v11  ;;  %vm1501_vm8 = vcmp.lt.s32.totalorder %v1480_v42, 3  ;;  %v1507_v6 = vsel %vm1499_vm15, %v1486_v33, %v1489_v36  ;;  %v1508_v1 = vsel %vm1502_vm6, %v1495_v30, 920167782 }
 0x25b   : > { %2942 = vsinq.f32 %v1347_v11  ;;  %v1426_v43 = vshll.u32 %v1425_v27, 30  ;;  %v1503_v61 = vsel %vm1499_vm15, %v1483_v21, %v1486_v33  ;;  %v1505_v47 = vsel %vm1501_vm8, %v1489_v36, %v1504_v28 }
 0x25c   : > { %v1509_v46 = vsel %vm1501_vm8, %v1492_v60, %v1508_v1  ;;  %v1511_v13 = vsel %vm1499_vm15, %v1489_v36, %v1492_v60  ;;  %v1512_v26 = vsel %vm1502_vm6, %v1498_v56, 1326507024  ;;  %v1515_v18 = vshll.u32 %v1475_v32, 8 }
 0x25d   : > { %v3991_v29 = vsub.s32 %v1423_v52, %v1426_v43  ;;  %v1449_v22 = vsub.s32 4, %v1425_v27  ;;  %v1510_v58 = vsel %vm1500_vm2, %v1507_v6, %v1509_v46  ;;  %v1513_v25 = vsel %vm1501_vm8, %v1495_v30, %v1512_v26 }
 0x25e   : > { %v1514_v7 = vsel %vm1500_vm2, %v1511_v13, %v1513_v25  ;;  %v3995_v35 = vmul.u32.u64.low %v1515_v18, %v1510_v58  ;;  %v3996_v51 = vmul.u32.u64.high %v1515_v18, %v1510_v58, %v3995_v35  ;;  %v1353_v33 = vand.u32 3, %v3950_v50 }
 0x25f   : > { %v1429_v36 = vsub.s32 0, %v3991_v29  ;;  %v4001_v2 = vmul.u32.u64.low %v1515_v18, %v1514_v7  ;;  %v4002_v24 = vmul.u32.u64.high %v1515_v18, %v1514_v7, %v4001_v2  ;;  %vm1365_vm7 = vcmp.lt.s32.totalorder %v3747_v0, 0 }
 0x260   : > { %v1506_v44 = vsel %vm1500_vm2, %v1503_v61, %v1505_v47  ;;  %v1450_v52 = vsel %vm1365_vm7, %v1449_v22, %v1425_v27  ;;  %v1571_v21 = vand.u32 2147483647, %v3867_v14  ;;  %v1574_v60 = vand.u32 2139095040, %v3867_v14 }
 0x261   : > { %v2782_v32 = vmin.u32 %v1429_v36, %v3991_v29  ;;  %vm1351_vm10 = vweird.f32 %v3498_v49  ;;  %vm4014_vm13 = vcmp.le.f32.partialorder %v1363_v16, 0.7853982  ;;  %v1525_v42 = vadd.s32 1, %v3996_v51 }
 0x262   : > { %v4021_v34 = vadd.f32 %v3854_v59, %v3476_v15  ;;  %vm1354_vm3 = vcmp.lt.s32.totalorder %v1353_v33, 2  ;;  %vm1355_vm4 = vcmp.eq.s32.totalorder %v1353_v33, 0  ;;  %vm1358_vm0 = vcmp.eq.s32.totalorder %v1353_v33, 2 }
 0x263   : > { %v1431_v30 = vclz %v2782_v32  ;;  %v1452_v11 = vsel %vm4014_vm13, 0, %v1450_v52  ;;  %v1522_v27 = vmul.u32 %v1515_v18, %v1506_v44  ;;  %vm1524_vm1 = vc.u32 %v4002_v24, %v3995_v35 }
 0x264   : > { %v2941_v56 = vpop.eup %2940  ;;  %v1575_v16 = vshrl.u32 %v1574_v60, 23  ;;  %v1526_v43 = vsel %vm1524_vm1, %v1525_v42, %v3996_v51  ;;  %v1578_v15 = vand.u32 8388607, %v1571_v21  ;;  %v1419_v61 = vadd.s32 %v3946_v37, %v3954_v55 }
 0x265   : > { %v2943_v28 = vpop.eup %2942  ;;  %v1359_v6 = vxor.u32 2147483648, %v2941_v56  ;;  %v2783_v1 = vadd.s32 4294967294, %v1431_v30  ;;  %v1527_v47 = vadd.s32 %v1526_v43, %v1522_v27  ;;  %v1456_v26 = vadd.s32 3, %v1452_v11 }
 0x266   : > { %v1356_v59 = vxor.u32 2147483648, %v2943_v28  ;;  %v2789_v46 = vadd.s32 4294967169, %v1575_v16  ;;  %v1678_v18 = vand.u32 2139095040, %v4021_v34  ;;  %v1579_v44 = vor.u32 8388608, %v1578_v15 }
 0x267   : > { %v1360_v13 = vsel %vm1358_vm0, %v1359_v6, %v2943_v28  ;;  %vm2784_vm15 = vcmp.lt.s32.totalorder %v2783_v1, 0  ;;  %v1528_v25 = vadd.s32 536870912, %v1527_v47  ;;  %v1675_v32 = vand.u32 2147483647, %v4021_v34 }
 0x268   : > { %v1357_v22 = vsel %vm1355_vm4, %v2941_v56, %v1356_v59  ;;  %v1434_v58 = vsel %vm2784_vm15, 0, %v2783_v1  ;;  %v1581_v7 = vadd.s32 1, %v2789_v46  ;;  %v1679_v27 = vshrl.u32 %v1678_v18, 23 }
 0x269   : > { %v1361_v51 = vsel %vm1354_vm3, %v1357_v22, %v1360_v13  ;;  %v1435_v36 = vsub.s32 32, %v1434_v58  ;;  %v1439_v2 = vsub.s32 4294967266, %v1434_v58  ;;  %v1529_v55 = vshrl.u32 %v1528_v25, 30 }
 0x26a   : > { %v1362_v37 = vsel %vm1351_vm10, nan, %v1361_v51  ;;  %vm1582_vm6 = vcmp.gt.s32.totalorder %v1581_v7, 0  ;;  %v1436_v52 = vshll.u32 %v3991_v29, %v1434_v58  ;;  %vm4043_vm2 = vcmp.le.f32.partialorder %v1467_v17, 0.7853982 }
 0x26b   : > { %1782 = vst [vmem:[%s3822_s12 + $0x18] sm:$0xff] %v1362_v37  ;;  %v1437_v60 = vshrl.u32 %v1419_v61, %v1435_v36  ;;  %v1440_v42 = vadd.s32 127, %v1439_v2  ;;  %v1583_v30 = vsel %vm1582_vm6, %v1581_v7, 0  ;;  %v1530_v56 = vshll.u32 %v1529_v55, 30 }
 0x26c   : > { %v1553_v11 = vsub.s32 4, %v1529_v55  ;;  %v1585_v33 = vand.u32 31, %v1583_v30  ;;  %vm1469_vm8 = vcmp.lt.s32.totalorder %v3750_v48, 0  ;;  %v4048_v6 = vand.u32 3, %v1456_v26 }
 0x26d   : > { %v1438_v16 = vor.u32 %v1437_v60, %v1436_v52  ;;  %v1441_v28 = vshll.u32 %v1440_v42, 23  ;;  %v1523_v29 = vadd.s32 %v3995_v35, %v4002_v24  ;;  %v1531_v1 = vsub.s32 %v1527_v47, %v1530_v56 }
 0x26e   : > { %v1586_v43 = vsub.s32 32, %v1585_v33  ;;  %v1584_v59 = vshrl.u32 %v1583_v30, 5  ;;  %v4052_v61 = vshll.u32 %v1579_v44, 8  ;;  %v4056_v46 = vand.u32 8388607, %v1675_v32 }
 0x26f   : > { %v1442_v15 = vor.u32 4788187, %v1441_v28  ;;  %v1533_v17 = vsub.s32 0, %v1531_v1  ;;  %v1554_v13 = vsel %vm1469_vm8, %v1553_v11, %v1529_v55  ;;  %v2793_v18 = vadd.s32 4294967169, %v1679_v27 }
 0x270   : > { %v1589_v26 = vshrl.u32 %v3018_v38, %v1586_v43  ;;  %v1445_v58 = vcvt.s32.f32 %v1438_v16  ;;  %v1592_v35 = vshrl.u32 %v3019_v5, %v1586_v43  ;;  %v1595_v24 = vshrl.u32 %v4927_v63, %v1586_v43 }
 0x271   : > { %v1443_v22 = vand.u32 2147483647, %v1442_v15  ;;  %v2786_v47 = vmin.u32 %v1533_v17, %v1531_v1  ;;  %v1588_v25 = vshll.u32 %v3017_v8, %v1585_v33  ;;  %v1591_v7 = vshll.u32 %v3018_v38, %v1585_v33 }
 0x272   : > { %v1594_v51 = vshll.u32 %v3019_v5, %v1585_v33  ;;  %v1556_v2 = vsel %vm4043_vm2, 0, %v1554_v13  ;;  %v1597_v44 = vshll.u32 %v4927_v63, %v1585_v33  ;;  %v1598_v37 = vshrl.u32 %v4928_v12, %v1586_v43 }
 0x273   : > { %v1446_v36 = vmul.f32 %v1445_v58, %v1443_v22  ;;  %v1535_v55 = vclz %v2786_v47  ;;  %v1590_v52 = vor.u32 %v1589_v26, %v1588_v25  ;;  %v1593_v60 = vor.u32 %v1592_v35, %v1591_v7 }
 0x274   : > { %v1596_v42 = vor.u32 %v1595_v24, %v1594_v51  ;;  %v1599_v56 = vor.u32 %v1598_v37, %v1597_v44  ;;  %v1600_v11 = vshll.u32 %v4928_v12, %v1585_v33  ;;  %v1601_v27 = vshrl.u32 %v4929_v62, %v1586_v43 }
 0x275   : > { %v1447_v30 = vxor.u32 2147483648, %v1446_v36  ;;  %v2787_v16 = vadd.s32 4294967294, %v1535_v55  ;;  %v1587_v28 = vshrl.u32 %v3017_v8, %v1586_v43  ;;  %vm1603_vm10 = vcmp.lt.s32.totalorder %v1584_v59, 1 }
 0x276   : > { %vm1604_vm3 = vcmp.lt.s32.totalorder %v1584_v59, 2  ;;  %v1602_v17 = vor.u32 %v1601_v27, %v1600_v11  ;;  %vm1605_vm4 = vcmp.lt.s32.totalorder %v1584_v59, 3  ;;  %vm1606_vm0 = vcmp.lt.s32.totalorder %v1584_v59, 4 }
 0x277   : > { %v1448_v15 = vsel %vm1365_vm7, %v1447_v30, %v1446_v36  ;;  %vm2788_vm1 = vcmp.lt.s32.totalorder %v2787_v16, 0  ;;  %v1607_v33 = vsel %vm1603_vm10, %v1587_v28, %v1590_v52  ;;  %v1608_v26 = vsel %vm1606_vm0, %v1596_v42, 2102212464 }
 0x278   : > { %v1451_v13 = vsel %vm4014_vm13, %v3747_v0, %v1448_v15  ;;  %v1538_v22 = vsel %vm2788_vm1, 0, %v2787_v16  ;;  %v1611_v43 = vsel %vm1603_vm10, %v1590_v52, %v1593_v60  ;;  %v1612_v58 = vsel %vm1606_vm0, %v1599_v56, 920167782 }
 0x279   : > { %2944 = vcosq.f32 %v1451_v13  ;;  %v1539_v35 = vsub.s32 32, %v1538_v22  ;;  %v1543_v24 = vsub.s32 4294967266, %v1538_v22  ;;  %v1609_v47 = vsel %vm1605_vm4, %v1593_v60, %v1608_v26 }
 0x27a   : > { %2946 = vsinq.f32 %v1451_v13  ;;  %v1540_v25 = vshll.u32 %v1531_v1, %v1538_v22  ;;  %v1613_v50 = vsel %vm1605_vm4, %v1596_v42, %v1612_v58  ;;  %v1615_v7 = vsel %vm1603_vm10, %v1593_v60, %v1596_v42  ;;  %v552_v22 = vpop.permute.xlu0 %551 }
 0x27b   : > { %v1616_v51 = vsel %vm1606_vm0, %v1602_v17, 1326507024  ;;  %v1541_v36 = vshrl.u32 %v1523_v29, %v1539_v35  ;;  %v1544_v44 = vadd.s32 127, %v1543_v24  ;;  %v1614_v37 = vsel %vm1604_vm3, %v1611_v43, %v1613_v50 }
 0x27c   : > { %v1617_v55 = vsel %vm1605_vm4, %v1599_v56, %v1616_v51  ;;  %v1610_v52 = vsel %vm1604_vm3, %v1607_v33, %v1609_v47  ;;  %v4091_v11 = vmul.u32.u64.low %v4052_v61, %v1614_v37  ;;  %v4092_v27 = vmul.u32.u64.high %v4052_v61, %v1614_v37, %v4091_v11 }
 0x27d   : > { %v1618_v30 = vsel %vm1604_vm3, %v1615_v7, %v1617_v55  ;;  %v1542_v1 = vor.u32 %v1541_v36, %v1540_v25  ;;  %v1545_v16 = vshll.u32 %v1544_v44, 23  ;;  %v1685_v29 = vadd.s32 1, %v2793_v18  ;;  %v554_v18 = vpop.permute.xlu1 %553 }
 0x27e   : > { %v4096_v60 = vmul.u32.u64.low %v4052_v61, %v1618_v30  ;;  %v4097_v42 = vmul.u32.u64.high %v4052_v61, %v1618_v30, %v4096_v60  ;;  %vm1455_vm7 = vweird.f32 %v3747_v0  ;;  %vm1458_vm13 = vcmp.lt.s32.totalorder %v4048_v6, 2 }
 0x27f   : > { %v1546_v56 = vor.u32 4788187, %v1545_v16  ;;  %v1560_v28 = vadd.s32 3, %v1556_v2  ;;  %v1626_v59 = vmul.u32 %v4052_v61, %v1610_v52  ;;  %v1629_v15 = vadd.s32 1, %v4092_v27 }
 0x280   : > { %v1683_v17 = vor.u32 8388608, %v4056_v46  ;;  %vm1686_vm15 = vcmp.gt.s32.totalorder %v1685_v29, 0  ;;  %v1549_v33 = vcvt.s32.f32 %v1542_v1  ;;  %vm1628_vm6 = vc.u32 %v4097_v42, %v4091_v11 }
 0x281   : > { %v1547_v13 = vand.u32 2147483647, %v1546_v56  ;;  %v1687_v26 = vsel %vm1686_vm15, %v1685_v29, 0  ;;  %vm1459_vm10 = vcmp.eq.s32.totalorder %v4048_v6, 0  ;;  %vm1462_vm3 = vcmp.eq.s32.totalorder %v4048_v6, 2 }
 0x282   : > { %v1630_v61 = vsel %vm1628_vm6, %v1629_v15, %v4092_v27  ;;  %v1689_v2 = vand.u32 31, %v1687_v26  ;;  %v4109_v24 = vand.u32 3, %v1560_v28  ;;  %v4111_v7 = vshll.u32 %v1683_v17, 8 }
 0x283   : > { %v2945_v43 = vpop.eup %2944  ;;  %v1550_v46 = vmul.f32 %v1549_v33, %v1547_v13  ;;  %v1631_v47 = vadd.s32 %v1630_v61, %v1626_v59  ;;  %v4115_v51 = vsel %vm555_vm5, %v552_v22, %v554_v18  ;;  %v1688_v15 = vshrl.u32 %v1687_v26, 5  ;;  %v526_v61 = vpop.permute.xlu0 %525 }
 0x284   : > { %v2947_v58 = vpop.eup %2946  ;;  %v1463_v35 = vxor.u32 2147483648, %v2945_v43  ;;  %v1690_v50 = vsub.s32 32, %v1689_v2  ;;  %v1692_v55 = vshll.u32 %v3017_v8, %v1689_v2  ;;  %v1695_v27 = vshll.u32 %v3018_v38, %v1689_v2 }
 0x285   : > { %v1460_v25 = vxor.u32 2147483648, %v2947_v58  ;;  %v1551_v44 = vxor.u32 2147483648, %v1550_v46  ;;  %v1632_v37 = vadd.s32 536870912, %v1631_v47  ;;  %v1698_v17 = vshll.u32 %v3019_v5, %v1689_v2 }
 0x286   : > { %v1464_v36 = vsel %vm1462_vm3, %v1463_v35, %v2947_v58  ;;  %v1693_v30 = vshrl.u32 %v3018_v38, %v1690_v50  ;;  %v1696_v1 = vshrl.u32 %v3019_v5, %v1690_v50  ;;  %v1699_v56 = vshrl.u32 %v4927_v63, %v1690_v50 }
 0x287   : > { %v1461_v52 = vsel %vm1459_vm10, %v2945_v43, %v1460_v25  ;;  %v1552_v60 = vsel %vm1469_vm8, %v1551_v44, %v1550_v46  ;;  %v4127_v29 = vshrl.u32 %v1632_v37, 30  ;;  %v528_v43 = vpop.permute.xlu1 %527  ;;  %v1701_v0 = vshll.u32 %v4927_v63, %v1689_v2 }
 0x288   : > { %v1465_v16 = vsel %vm1458_vm13, %v1461_v52, %v1464_v36  ;;  %v1555_v59 = vsel %vm4043_vm2, %v3750_v48, %v1552_v60  ;;  %v1694_v13 = vor.u32 %v1693_v30, %v1692_v55  ;;  %v1697_v33 = vor.u32 %v1696_v1, %v1695_v27 }
 0x289   : > { %v1466_v28 = vsel %vm1455_vm7, nan, %v1465_v16  ;;  %2948 = vcosq.f32 %v1555_v59  ;;  %v1634_v6 = vshll.u32 %v4127_v29, 30  ;;  %v1700_v58 = vor.u32 %v1699_v56, %v1698_v17 }
 0x28a   : > { %1783 = vst [vmem:[%s3822_s12 + $0x20] sm:$0xff] %v1466_v28  ;;  %2950 = vsinq.f32 %v1555_v59  ;;  %v1702_v35 = vshrl.u32 %v4928_v12, %v1690_v50  ;;  %v1704_v49 = vshll.u32 %v4928_v12, %v1689_v2  ;;  %v1705_v26 = vshrl.u32 %v4929_v62, %v1690_v50 }
 0x28b   : > { %v4140_v46 = vsub.s32 %v1631_v47, %v1634_v6  ;;  %v557_v25 = vsel %vm555_vm5, %v554_v18, %v552_v22  ;;  %v1691_v36 = vshrl.u32 %v3017_v8, %v1690_v50  ;;  %vm1707_vm2 = vcmp.lt.s32.totalorder %v1688_v15, 1 }
 0x28c   : > { %v1703_v44 = vor.u32 %v1702_v35, %v1701_v0  ;;  %v530_v37 = vsel %vm529_vm12, %v526_v61, %v528_v43  ;;  %v1706_v52 = vor.u32 %v1705_v26, %v1704_v49  ;;  %vm1708_vm8 = vcmp.lt.s32.totalorder %v1688_v15, 2 }
 0x28d   : > { %v1637_v55 = vsub.s32 0, %v4140_v46  ;;  %vm1710_vm4 = vcmp.lt.s32.totalorder %v1688_v15, 4  ;;  %vm1563_vm0 = vcmp.eq.s32.totalorder %v4109_v24, 0  ;;  %vm1709_vm1 = vcmp.lt.s32.totalorder %v1688_v15, 3 }
 0x28e   : > { %v1712_v2 = vsel %vm1710_vm4, %v1700_v58, 2102212464  ;;  %v1715_v47 = vsel %vm1707_vm2, %v1694_v13, %v1697_v33  ;;  %v1716_v30 = vsel %vm1710_vm4, %v1703_v44, 920167782  ;;  %vm1562_vm5 = vcmp.lt.s32.totalorder %v4109_v24, 2 }
 0x28f   : > { %v2790_v18 = vmin.u32 %v1637_v55, %v4140_v46  ;;  %v1711_v22 = vsel %vm1707_vm2, %v1691_v36, %v1694_v13  ;;  %v1713_v50 = vsel %vm1709_vm1, %v1697_v33, %v1712_v2  ;;  %v1717_v27 = vsel %vm1709_vm1, %v1700_v58, %v1716_v30 }
 0x290   : > { %vm1559_vm7 = vweird.f32 %v3750_v48  ;;  %v1718_v1 = vsel %vm1708_vm8, %v1715_v47, %v1717_v27  ;;  %v1719_v16 = vsel %vm1707_vm2, %v1697_v33, %v1700_v58  ;;  %v1720_v60 = vsel %vm1710_vm4, %v1706_v52, 1326507024 }
 0x291   : > { %v531_v56 = vsel %vm529_vm12, %v528_v43, %v526_v61  ;;  %vm1566_vm13 = vcmp.eq.s32.totalorder %v4109_v24, 2  ;;  %v1639_v28 = vclz %v2790_v18  ;;  %v570_v59 = vsel %vm3654_vm9, %v4115_v51, 0.0 }
 0x292   : > { %v571_v17 = vsel %vm3670_vm14, %v557_v25, 0.0  ;;  %v1714_v6 = vsel %vm1708_vm8, %v1711_v22, %v1713_v50  ;;  %v1721_v13 = vsel %vm1709_vm1, %v1703_v44, %v1720_v60  ;;  %v572_v57 = vsel %vm549_vm11, %v531_v56, %v570_v59 }
 0x293   : > { %v4171_v33 = vmul.u32.u64.low %v4111_v7, %v1718_v1  ;;  %v4172_v58 = vmul.u32.u64.high %v4111_v7, %v1718_v1, %v4171_v33  ;;  %v2949_v10 = vpop.eup %2948  ;;  %v2791_v43 = vadd.s32 4294967294, %v1639_v28  ;;  %v1722_v61 = vsel %vm1708_vm8, %v1719_v16, %v1721_v13  ;;  %v1829_v28 = vpop.permute.xlu1 %1828 }
 0x294   : > { %vm4941_vm12 = vcmp.eq.f32.partialorder %v3387_v54, %v3502_v53  ;;  %v2951_v51 = vpop.eup %2950  ;;  %v1567_v0 = vxor.u32 2147483648, %v2949_v10  ;;  %v4183_v35 = vmul.u32.u64.low %v4111_v7, %v1722_v61  ;;  %v4184_v49 = vmul.u32.u64.high %v4111_v7, %v1722_v61, %v4183_v35 }
 0x295   : > { %v573_v23 = vsel %vm4941_vm12, %v530_v37, %v571_v17  ;;  %v1564_v25 = vxor.u32 2147483648, %v2951_v51  ;;  %v1627_v15 = vadd.s32 %v4091_v11, %v4097_v42  ;;  %vm2792_vm9 = vcmp.lt.s32.totalorder %v2791_v43, 0 }
 0x296   : > { %v576_v26 = vcombine.low %v572_v57, %v573_v23  ;;  %vm512_vm11 = vcmp.ge.f32.partialorder %v2992_v9, 8.0  ;;  %v1568_v54 = vsel %vm1566_vm13, %v1567_v0, %v2951_v51  ;;  %v1642_v45 = vsel %vm2792_vm9, 0, %v2791_v43 }
 0x297   : > { %v1733_v53 = vadd.s32 1, %v4172_v58  ;;  %v1565_v44 = vsel %vm1563_vm0, %v2949_v10, %v1564_v25  ;;  %v1643_v37 = vsub.s32 32, %v1642_v45  ;;  %v1647_v11 = vsub.s32 4294967266, %v1642_v45  ;;  %v4249_v25 = vpop.permute.xlu0 %1833 }
 0x298   : > { %v583_v36 = vrot.slane %v576_v26, %v3140_v31  ;;  %v1730_v42 = vmul.u32 %v4111_v7, %v1714_v6  ;;  %v1569_v55 = vsel %vm1562_vm5, %v1565_v44, %v1568_v54  ;;  %v1644_v52 = vshll.u32 %v4140_v46, %v1642_v45 }
 0x299   : > { %vm1732_vm14 = vc.u32 %v4184_v49, %v4171_v33  ;;  %v1570_v47 = vsel %vm1559_vm7, nan, %v1569_v55  ;;  %v1645_v30 = vshrl.u32 %v1627_v15, %v1643_v37  ;;  %v1648_v18 = vadd.s32 127, %v1647_v11 }
 0x29a   : > { %v590_v2 = vrot.slane %v583_v36, %v3140_v31  ;;  %v1734_v22 = vsel %vm1732_vm14, %v1733_v53, %v4172_v58  ;;  %1784 = vst [vmem:[%s3822_s12 + $0x28] sm:$0xff] %v1570_v47  ;;  %v1657_v7 = vsub.s32 4, %v4127_v29  ;;  %vm1573_vm15 = vcmp.lt.s32.totalorder %v3867_v14, 0 }
 0x29b   : > { %v1735_v50 = vadd.s32 %v1734_v22, %v1730_v42  ;;  %v1646_v27 = vor.u32 %v1645_v30, %v1644_v52  ;;  %v1649_v46 = vshll.u32 %v1648_v18, 23  ;;  %vm4225_vm6 = vcmp.le.f32.partialorder %v1571_v21, 0.7853982 }
 0x29c   : > { %v592_v24 = vsel %vm512_vm11, %v590_v2, 0.0  ;;  %v1658_v60 = vsel %vm1573_vm15, %v1657_v7, %v4127_v29  ;;  %vm1677_vm10 = vcmp.lt.s32.totalorder %v4021_v34, 0  ;;  %vm4243_vm3 = vcmp.le.f32.partialorder %v1675_v32, 0.7853982 }
 0x29d   : > { %v593_v1 = vadd.f32 %v592_v24, %v3394_v20  ;;  %v1736_v16 = vadd.s32 536870912, %v1735_v50  ;;  %v1650_v31 = vor.u32 4788187, %v1649_v46  ;;  %v1653_v17 = vcvt.s32.f32 %v1646_v27 }
 0x29e   : > { %v1660_v29 = vsel %vm4225_vm6, 0, %v1658_v60  ;;  %vm1663_vm5 = vweird.f32 %v3867_v14 }
 0x29f   : > { %v4213_v48 = vrot.slane %v593_v1, %v3076_v3  ;;  %v1737_v56 = vshrl.u32 %v1736_v16, 30  ;;  %v1651_v59 = vand.u32 2147483647, %v1650_v31  ;;  %v4219_v6 = vrot.slane %v593_v1, %v3079_v4 }
 0x2a0   : > { %v1664_v51 = vadd.s32 3, %v1660_v29 }
 0x2a1   : > { %v1818_v20 = vmul.f32 %v3435_v39, %v4213_v48  ;;  %v1738_v3 = vshll.u32 %v1737_v56, 30  ;;  %v1761_v58 = vsub.s32 4, %v1737_v56  ;;  %v1654_v10 = vmul.f32 %v1653_v17, %v1651_v59 }
 0x2a2   : > { %v1819_v21 = vmul.f32 %v3435_v39, %v4219_v6  ;;  %v1820_v32 = vmul.f32 %v3437_v40, %v4213_v48  ;;  %v1665_v37 = vand.u32 3, %v1664_v51  ;;  %v4275_v24 = vmul.f32 %v3437_v40, %v4219_v6 }
 0x2a3   : > { %v4232_v43 = vadd.f32 %v1829_v28, %v1818_v20  ;;  %v4234_v4 = vsub.s32 %v1735_v50, %v1738_v3  ;;  %v1762_v61 = vsel %vm1677_vm10, %v1761_v58, %v1737_v56  ;;  %v1655_v57 = vxor.u32 2147483648, %v1654_v10 }
 0x2a4   : > { %v1764_v39 = vsel %vm4243_vm3, 0, %v1762_v61  ;;  %v4255_v9 = vadd.f32 %v1829_v28, %v1819_v21  ;;  %v4266_v44 = vadd.f32 %v4249_v25, %v1820_v32  ;;  %vm1667_vm2 = vcmp.eq.s32.totalorder %v1665_v37, 0 }
 0x2a5   : > { %v1854_v23 = vand.u32 2147483647, %v4232_v43  ;;  %v1741_v35 = vsub.s32 0, %v4234_v4  ;;  %v1857_v26 = vand.u32 2139095040, %v4232_v43  ;;  %v1656_v15 = vsel %vm1573_vm15, %v1655_v57, %v1654_v10 }
 0x2a6   : > { %v1659_v54 = vsel %vm4225_vm6, %v3867_v14, %v1656_v15  ;;  %v1768_v42 = vadd.s32 3, %v1764_v39  ;;  %v1961_v52 = vand.u32 2139095040, %v4255_v9  ;;  %v1958_v18 = vand.u32 2147483647, %v4255_v9 }
 0x2a7   : > { %v2794_v45 = vmin.u32 %v1741_v35, %v4234_v4  ;;  %v1858_v53 = vshrl.u32 %v1857_v26, 23  ;;  %v1861_v36 = vand.u32 8388607, %v1854_v23  ;;  %2952 = vcosq.f32 %v1659_v54 }
 0x2a8   : > { %2954 = vsinq.f32 %v1659_v54  ;;  %v1962_v22 = vshrl.u32 %v1961_v52, 23  ;;  %v2065_v7 = vand.u32 2139095040, %v4266_v44  ;;  %vm1670_vm8 = vcmp.eq.s32.totalorder %v1665_v37, 2 }
 0x2a9   : > { %v1743_v11 = vclz %v2794_v45  ;;  %v2797_v55 = vadd.s32 4294967169, %v1858_v53  ;;  %v1862_v47 = vor.u32 8388608, %v1861_v36  ;;  %v1731_v50 = vadd.s32 %v4171_v33, %v4184_v49 }
 0x2aa   : > { %vm1666_vm0 = vcmp.lt.s32.totalorder %v1665_v37, 2  ;;  %v4277_v46 = vand.u32 3, %v1768_v42  ;;  %v2801_v1 = vadd.s32 4294967169, %v1962_v22  ;;  %v4284_v33 = vand.u32 8388607, %v1958_v18 }
 0x2ab   : > { %v2795_v2 = vadd.s32 4294967294, %v1743_v11  ;;  %v1864_v30 = vadd.s32 1, %v2797_v55  ;;  %v4280_v56 = vshll.u32 %v1862_v47, 8  ;;  %v2062_v40 = vand.u32 2147483647, %v4266_v44 }
 0x2ac   : > { %v4287_v49 = vshrl.u32 %v2065_v7, 23  ;;  %v1968_v61 = vadd.s32 1, %v2801_v1  ;;  %v4327_v0 = vadd.f32 %v4249_v25, %v4275_v24  ;;  %vm1774_vm14 = vcmp.eq.s32.totalorder %v4277_v46, 2 }
 0x2ad   : > { %vm2796_vm4 = vcmp.lt.s32.totalorder %v2795_v2, 0  ;;  %vm1865_vm1 = vcmp.gt.s32.totalorder %v1864_v30, 0  ;;  %vm1771_vm6 = vcmp.eq.s32.totalorder %v4277_v46, 0 }
 0x2ae   : > { %v1746_v27 = vsel %vm2796_vm4, 0, %v2795_v2  ;;  %v1866_v60 = vsel %vm1865_vm1, %v1864_v30, 0  ;;  %vm1969_vm11 = vcmp.gt.s32.totalorder %v1968_v61, 0 }
 0x2af   : > { %v1747_v16 = vsub.s32 32, %v1746_v27  ;;  %v1751_v31 = vsub.s32 4294967266, %v1746_v27  ;;  %v1868_v28 = vand.u32 31, %v1866_v60  ;;  %v1748_v59 = vshll.u32 %v4234_v4, %v1746_v27 }
 0x2b0   : > { %v1867_v13 = vshrl.u32 %v1866_v60, 5 }
 0x2b1   : > { %v1749_v17 = vshrl.u32 %v1731_v50, %v1747_v16  ;;  %v1752_v20 = vadd.s32 127, %v1751_v31  ;;  %v2953_v3 = vpop.eup %2952  ;;  %v1869_v58 = vsub.s32 32, %v1868_v28  ;;  %v1871_v10 = vshll.u32 %v3017_v8, %v1868_v28 }
 0x2b2   : > { %v1874_v29 = vshll.u32 %v3018_v38, %v1868_v28  ;;  %v2955_v57 = vpop.eup %2954  ;;  %v1671_v21 = vxor.u32 2147483648, %v2953_v3  ;;  %v1877_v26 = vshll.u32 %v3019_v5, %v1868_v28  ;;  %v1880_v32 = vshll.u32 %v4927_v63, %v1868_v28 }
 0x2b3   : > { %v1750_v51 = vor.u32 %v1749_v17, %v1748_v59  ;;  %v1753_v35 = vshll.u32 %v1752_v20, 23  ;;  %v1668_v15 = vxor.u32 2147483648, %v2955_v57  ;;  %v1872_v39 = vshrl.u32 %v3018_v38, %v1869_v58 }
 0x2b4   : > { %v1875_v4 = vshrl.u32 %v3019_v5, %v1869_v58  ;;  %v1672_v54 = vsel %vm1670_vm8, %v1671_v21, %v2955_v57  ;;  %v1870_v53 = vshrl.u32 %v3017_v8, %v1869_v58  ;;  %v1878_v36 = vshrl.u32 %v4927_v63, %v1869_v58 }
 0x2b5   : > { %v1754_v45 = vor.u32 4788187, %v1753_v35  ;;  %v1669_v11 = vsel %vm1667_vm2, %v2953_v3, %v1668_v15  ;;  %v1873_v42 = vor.u32 %v1872_v39, %v1871_v10  ;;  %v1881_v52 = vshrl.u32 %v4928_v12, %v1869_v58 }
 0x2b6   : > { %v1876_v55 = vor.u32 %v1875_v4, %v1874_v29  ;;  %v1673_v2 = vsel %vm1666_vm0, %v1669_v11, %v1672_v54  ;;  %v1757_v30 = vcvt.s32.f32 %v1750_v51  ;;  %v1879_v22 = vor.u32 %v1878_v36, %v1877_v26 }
 0x2b7   : > { %v1755_v47 = vand.u32 2147483647, %v1754_v45  ;;  %v1674_v7 = vsel %vm1663_vm5, nan, %v1673_v2  ;;  %v1882_v50 = vor.u32 %v1881_v52, %v1880_v32  ;;  %v1883_v27 = vshll.u32 %v4928_v12, %v1868_v28 }
 0x2b8   : > { %v1884_v1 = vshrl.u32 %v4929_v62, %v1869_v58  ;;  %1785 = vst [vmem:[%s3822_s12 + $0x30] sm:$0xff] %v1674_v7  ;;  %vm1886_vm7 = vcmp.lt.s32.totalorder %v1867_v13, 1  ;;  %vm1888_vm13 = vcmp.lt.s32.totalorder %v1867_v13, 3  ;;  %vm1889_vm12 = vcmp.lt.s32.totalorder %v1867_v13, 4 }
 0x2b9   : > { %v1758_v16 = vmul.f32 %v1757_v30, %v1755_v47  ;;  %v1890_v60 = vsel %vm1886_vm7, %v1870_v53, %v1873_v42  ;;  %v1891_v37 = vsel %vm1889_vm12, %v1879_v22, 2102212464  ;;  %v1894_v59 = vsel %vm1886_vm7, %v1873_v42, %v1876_v55 }
 0x2ba   : > { %v1885_v31 = vor.u32 %v1884_v1, %v1883_v27  ;;  %v1892_v20 = vsel %vm1888_vm13, %v1876_v55, %v1891_v37  ;;  %v1895_v3 = vsel %vm1889_vm12, %v1882_v50, 920167782  ;;  %v1898_v14 = vsel %vm1886_vm7, %v1876_v55, %v1879_v22 }
 0x2bb   : > { %v1759_v17 = vxor.u32 2147483648, %v1758_v16  ;;  %vm1887_vm9 = vcmp.lt.s32.totalorder %v1867_v13, 2  ;;  %v1896_v10 = vsel %vm1888_vm13, %v1879_v22, %v1895_v3  ;;  %v1970_v32 = vsel %vm1969_vm11, %v1968_v61, 0 }
 0x2bc   : > { %v1899_v28 = vsel %vm1889_vm12, %v1885_v31, 1326507024  ;;  %v1893_v29 = vsel %vm1887_vm9, %v1890_v60, %v1892_v20  ;;  %v1897_v57 = vsel %vm1887_vm9, %v1894_v59, %v1896_v10  ;;  %v1972_v54 = vand.u32 31, %v1970_v32 }
 0x2bd   : > { %v1760_v58 = vsel %vm1677_vm10, %v1759_v17, %v1758_v16  ;;  %v1900_v21 = vsel %vm1888_vm13, %v1882_v50, %v1899_v28  ;;  %v4316_v26 = vmul.u32.u64.low %v4280_v56, %v1897_v57  ;;  %v4317_v15 = vmul.u32.u64.high %v4280_v56, %v1897_v57, %v4316_v26 }
 0x2be   : > { %v1763_v51 = vsel %vm4243_vm3, %v4021_v34, %v1760_v58  ;;  %v1901_v35 = vsel %vm1887_vm9, %v1898_v14, %v1900_v21  ;;  %v1966_v13 = vor.u32 8388608, %v4284_v33  ;;  %v4331_v45 = vand.u32 8388607, %v2062_v40 }
 0x2bf   : > { %2956 = vcosq.f32 %v1763_v51  ;;  %v4321_v39 = vmul.u32.u64.low %v4280_v56, %v1901_v35  ;;  %v4322_v4 = vmul.u32.u64.high %v4280_v56, %v1901_v35, %v4321_v39  ;;  %v1909_v53 = vmul.u32 %v4280_v56, %v1893_v29 }
 0x2c0   : > { %2958 = vsinq.f32 %v1763_v51  ;;  %v1912_v36 = vadd.s32 1, %v4317_v15  ;;  %v1973_v11 = vsub.s32 32, %v1972_v54  ;;  %v2805_v42 = vadd.s32 4294967169, %v4287_v49 }
 0x2c1   : > { %vm1911_vm15 = vc.u32 %v4322_v4, %v4316_v26  ;;  %v4339_v33 = vshrl.u32 %v1970_v32, 5  ;;  %v1975_v25 = vshll.u32 %v3017_v8, %v1972_v54  ;;  %v1978_v24 = vshll.u32 %v3018_v38, %v1972_v54 }
 0x2c2   : > { %v1913_v56 = vsel %vm1911_vm15, %v1912_v36, %v4317_v15  ;;  %v1976_v61 = vshrl.u32 %v3018_v38, %v1973_v11  ;;  %v1979_v55 = vshrl.u32 %v3019_v5, %v1973_v11  ;;  %v1981_v49 = vshll.u32 %v3019_v5, %v1972_v54 }
 0x2c3   : > { %vm1770_vm10 = vcmp.lt.s32.totalorder %v4277_v46, 2  ;;  %v1914_v52 = vadd.s32 %v1913_v56, %v1909_v53  ;;  %v1982_v2 = vshrl.u32 %v4927_v63, %v1973_v11  ;;  %v1984_v47 = vshll.u32 %v4927_v63, %v1972_v54 }
 0x2c4   : > { %v1985_v30 = vshrl.u32 %v4928_v12, %v1973_v11  ;;  %vm1767_vm3 = vweird.f32 %v4021_v34  ;;  %v1977_v22 = vor.u32 %v1976_v61, %v1975_v25  ;;  %v1980_v7 = vor.u32 %v1979_v55, %v1978_v24 }
 0x2c5   : > { %v1987_v50 = vshll.u32 %v4928_v12, %v1972_v54  ;;  %v1988_v27 = vshrl.u32 %v4929_v62, %v1973_v11  ;;  %v1915_v1 = vadd.s32 536870912, %v1914_v52  ;;  %v1983_v16 = vor.u32 %v1982_v2, %v1981_v49 }
 0x2c6   : > { %v1986_v31 = vor.u32 %v1985_v30, %v1984_v47  ;;  %v2006_v60 = vshll.u32 %v1966_v13, 8  ;;  %vm1993_vm2 = vcmp.lt.s32.totalorder %v4339_v33, 4  ;;  %v2070_v59 = vor.u32 8388608, %v4331_v45 }
 0x2c7   : > { %v1989_v37 = vor.u32 %v1988_v27, %v1987_v50  ;;  %v2072_v17 = vadd.s32 1, %v2805_v42  ;;  %v1916_v3 = vshrl.u32 %v1915_v1, 30  ;;  %vm1990_vm8 = vcmp.lt.s32.totalorder %v4339_v33, 1 }
 0x2c8   : > { %vm1992_vm4 = vcmp.lt.s32.totalorder %v4339_v33, 3  ;;  %v1999_v14 = vsel %vm1993_vm2, %v1986_v31, 920167782  ;;  %v1974_v58 = vshrl.u32 %v3017_v8, %v1973_v11  ;;  %v1998_v29 = vsel %vm1990_vm8, %v1977_v22, %v1980_v7 }
 0x2c9   : > { %v2957_v20 = vpop.eup %2956  ;;  %v2000_v57 = vsel %vm1992_vm4, %v1983_v16, %v1999_v14  ;;  %v1917_v51 = vshll.u32 %v1916_v3, 30  ;;  %vm1991_vm0 = vcmp.lt.s32.totalorder %v4339_v33, 2  ;;  %v2002_v35 = vsel %vm1990_vm8, %v1980_v7, %v1983_v16 }
 0x2ca   : > { %v2959_v10 = vpop.eup %2958  ;;  %v1775_v28 = vxor.u32 2147483648, %v2957_v20  ;;  %v1994_v39 = vsel %vm1990_vm8, %v1974_v58, %v1977_v22  ;;  %v1995_v32 = vsel %vm1993_vm2, %v1983_v16, 2102212464  ;;  %v2003_v54 = vsel %vm1993_vm2, %v1989_v37, 1326507024 }
 0x2cb   : > { %v1772_v21 = vxor.u32 2147483648, %v2959_v10  ;;  %v1918_v45 = vsub.s32 %v1914_v52, %v1917_v51  ;;  %v2001_v53 = vsel %vm1991_vm0, %v1998_v29, %v2000_v57  ;;  %v2004_v36 = vsel %vm1992_vm4, %v1986_v31, %v2003_v54 }
 0x2cc   : > { %v1776_v15 = vsel %vm1774_vm14, %v1775_v28, %v2959_v10  ;;  %v1940_v42 = vsub.s32 4, %v1916_v3  ;;  %v2005_v25 = vsel %vm1991_vm0, %v2002_v35, %v2004_v36  ;;  %vm2073_vm1 = vcmp.gt.s32.totalorder %v2072_v17, 0 }
 0x2cd   : > { %v1773_v13 = vsel %vm1771_vm6, %v2957_v20, %v1772_v21  ;;  %v1920_v56 = vsub.s32 0, %v1918_v45  ;;  %v1996_v61 = vsel %vm1992_vm4, %v1980_v7, %v1995_v32  ;;  %v2074_v55 = vsel %vm2073_vm1, %v2072_v17, 0 }
 0x2ce   : > { %v1777_v11 = vsel %vm1770_vm10, %v1773_v13, %v1776_v15  ;;  %v4386_v49 = vmul.u32.u64.low %v2006_v60, %v2005_v25  ;;  %v4387_v52 = vmul.u32.u64.high %v2006_v60, %v2005_v25, %v4386_v49  ;;  %vm1856_vm5 = vcmp.lt.s32.totalorder %v4232_v43, 0 }
 0x2cf   : > { %v1778_v24 = vsel %vm1767_vm3, nan, %v1777_v11  ;;  %v4389_v2 = vmul.u32.u64.low %v2006_v60, %v2001_v53  ;;  %v4390_v46 = vmul.u32.u64.high %v2006_v60, %v2001_v53, %v4389_v2  ;;  %v2798_v47 = vmin.u32 %v1920_v56, %v1918_v45 }
 0x2d0   : > { %1786 = vst [vmem:[%s3822_s12 + $0x38] sm:$0xff] %v1778_v24  ;;  %v2076_v30 = vand.u32 31, %v2074_v55  ;;  %v1941_v34 = vsel %vm1856_vm5, %v1940_v42, %v1916_v3  ;;  %v1997_v22 = vsel %vm1991_vm0, %v1994_v39, %v1996_v61  ;;  %vm4400_vm7 = vcmp.le.f32.partialorder %v1854_v23, 0.7853982 }
 0x2d1   : > { %v1922_v50 = vclz %v2798_v47  ;;  %v4404_v27 = vshll.u32 %v2070_v59, 8  ;;  %vm2015_vm13 = vc.u32 %v4387_v52, %v4389_v2  ;;  %v2016_v1 = vadd.s32 1, %v4390_v46 }
 0x2d2   : > { %v2077_v16 = vsub.s32 32, %v2076_v30  ;;  %v2166_v31 = vand.u32 2147483647, %v4327_v0  ;;  %v1910_v33 = vadd.s32 %v4316_v26, %v4322_v4  ;;  %v1943_v23 = vsel %vm4400_vm7, 0, %v1941_v34 }
 0x2d3   : > { %v2799_v37 = vadd.s32 4294967294, %v1922_v50  ;;  %v2013_v17 = vmul.u32 %v2006_v60, %v1997_v22  ;;  %v2017_v20 = vsel %vm2015_vm13, %v2016_v1, %v4390_v46  ;;  %v4415_v59 = vshrl.u32 %v2074_v55, 5 }
 0x2d4   : > { %v2080_v3 = vshrl.u32 %v3018_v38, %v2077_v16  ;;  %v2083_v14 = vshrl.u32 %v3019_v5, %v2077_v16  ;;  %v2079_v28 = vshll.u32 %v3017_v8, %v2076_v30  ;;  %v2082_v58 = vshll.u32 %v3018_v38, %v2076_v30 }
 0x2d5   : > { %vm2800_vm12 = vcmp.lt.s32.totalorder %v2799_v37, 0  ;;  %v2018_v10 = vadd.s32 %v2017_v20, %v2013_v17  ;;  %v2086_v4 = vshrl.u32 %v4927_v63, %v2077_v16  ;;  %v2088_v29 = vshll.u32 %v4927_v63, %v2076_v30 }
 0x2d6   : > { %v1925_v26 = vsel %vm2800_vm12, 0, %v2799_v37  ;;  %v2089_v60 = vshrl.u32 %v4928_v12, %v2077_v16  ;;  %v2085_v35 = vshll.u32 %v3019_v5, %v2076_v30  ;;  %v2081_v15 = vor.u32 %v2080_v3, %v2079_v28 }
 0x2d7   : > { %v1926_v57 = vsub.s32 32, %v1925_v26  ;;  %v1930_v21 = vsub.s32 4294967266, %v1925_v26  ;;  %v2019_v51 = vadd.s32 536870912, %v2018_v10  ;;  %v2084_v39 = vor.u32 %v2083_v14, %v2082_v58 }
 0x2d8   : > { %v2090_v32 = vor.u32 %v2089_v60, %v2088_v29  ;;  %v2092_v54 = vshrl.u32 %v4929_v62, %v2077_v16  ;;  %v1927_v13 = vshll.u32 %v1918_v45, %v1925_v26  ;;  %v1947_v42 = vadd.s32 3, %v1943_v23 }
 0x2d9   : > { %v1928_v53 = vshrl.u32 %v1910_v33, %v1926_v57  ;;  %v1931_v36 = vadd.s32 127, %v1930_v21  ;;  %v2020_v11 = vshrl.u32 %v2019_v51, 30  ;;  %vm1960_vm9 = vcmp.lt.s32.totalorder %v4255_v9, 0 }
 0x2da   : > { %v2087_v25 = vor.u32 %v2086_v4, %v2085_v35  ;;  %v2091_v24 = vshll.u32 %v4928_v12, %v2076_v30  ;;  %v2169_v56 = vand.u32 2139095040, %v4327_v0  ;;  %vm2097_vm11 = vcmp.lt.s32.totalorder %v4415_v59, 4 }
 0x2db   : > { %v1929_v61 = vor.u32 %v1928_v53, %v1927_v13  ;;  %v1932_v55 = vshll.u32 %v1931_v36, 23  ;;  %v2021_v49 = vshll.u32 %v2020_v11, 30  ;;  %v2078_v46 = vshrl.u32 %v3017_v8, %v2077_v16 }
 0x2dc   : > { %v2093_v47 = vor.u32 %v2092_v54, %v2091_v24  ;;  %vm2094_vm14 = vcmp.lt.s32.totalorder %v4415_v59, 1  ;;  %v2103_v45 = vsel %vm2097_vm11, %v2090_v32, 920167782  ;;  %vm2096_vm15 = vcmp.lt.s32.totalorder %v4415_v59, 3 }
 0x2dd   : > { %v1933_v34 = vor.u32 4788187, %v1932_v55  ;;  %v4434_v22 = vsub.s32 %v2018_v10, %v2021_v49  ;;  %v2102_v30 = vsel %vm2094_vm14, %v2081_v15, %v2084_v39  ;;  %v2044_v50 = vsub.s32 4, %v2020_v11 }
 0x2de   : > { %vm2095_vm6 = vcmp.lt.s32.totalorder %v4415_v59, 2  ;;  %v2099_v1 = vsel %vm2097_vm11, %v2087_v25, 2102212464  ;;  %v2104_v16 = vsel %vm2096_vm15, %v2087_v25, %v2103_v45  ;;  %v1936_v37 = vcvt.s32.f32 %v1929_v61  ;;  %v4488_v59 = vpop.permute.xlu1 %1838 }
 0x2df   : > { %v1934_v33 = vand.u32 2147483647, %v1933_v34  ;;  %v2024_v23 = vsub.s32 0, %v4434_v22  ;;  %v2106_v17 = vsel %vm2094_vm14, %v2084_v39, %v2087_v25  ;;  %v2098_v20 = vsel %vm2094_vm14, %v2078_v46, %v2081_v15 }
 0x2e0   : > { %v2105_v3 = vsel %vm2095_vm6, %v2102_v30, %v2104_v16  ;;  %v2107_v14 = vsel %vm2097_vm11, %v2093_v47, 1326507024  ;;  %v2170_v10 = vshrl.u32 %v2169_v56, 23  ;;  %v2100_v26 = vsel %vm2096_vm15, %v2084_v39, %v2099_v1 }
 0x2e1   : > { %v1937_v28 = vmul.f32 %v1936_v37, %v1934_v33  ;;  %v2802_v58 = vmin.u32 %v2024_v23, %v4434_v22  ;;  %v2108_v4 = vsel %vm2096_vm15, %v2090_v32, %v2107_v14  ;;  %v2045_v15 = vsel %vm1960_vm9, %v2044_v50, %v2020_v11 }
 0x2e2   : > { %v2109_v29 = vsel %vm2095_vm6, %v2106_v17, %v2108_v4  ;;  %v4455_v60 = vmul.u32.u64.low %v4404_v27, %v2105_v3  ;;  %v4456_v57 = vmul.u32.u64.high %v4404_v27, %v2105_v3, %v4455_v60  ;;  %v2809_v21 = vadd.s32 4294967169, %v2170_v10 }
 0x2e3   : > { %v1938_v51 = vxor.u32 2147483648, %v1937_v28  ;;  %v2026_v35 = vclz %v2802_v58  ;;  %v1822_v54 = vmul.f32 %v3443_v41, %v4213_v48  ;;  %v4462_v39 = vand.u32 3, %v1947_v42 }
 0x2e4   : > { %vm4466_vm10 = vcmp.le.f32.partialorder %v1958_v18, 0.7853982  ;;  %v4471_v13 = vmul.u32.u64.low %v4404_v27, %v2109_v29  ;;  %v4472_v53 = vmul.u32.u64.high %v4404_v27, %v2109_v29, %v4471_v13  ;;  %v2101_v11 = vsel %vm2095_vm6, %v2098_v20, %v2100_v26 }
 0x2e5   : > { %v1939_v36 = vsel %vm1856_vm5, %v1938_v51, %v1937_v28  ;;  %v2803_v25 = vadd.s32 4294967294, %v2026_v35  ;;  %v2176_v24 = vadd.s32 1, %v2809_v21  ;;  %v2047_v18 = vsel %vm4466_vm10, 0, %v2045_v15 }
 0x2e6   : > { %v1942_v42 = vsel %vm4400_vm7, %v4232_v43, %v1939_v36  ;;  %v2120_v56 = vadd.s32 1, %v4456_v57  ;;  %v2173_v61 = vand.u32 8388607, %v2166_v31  ;;  %v2014_v55 = vadd.s32 %v4389_v2, %v4387_v52 }
 0x2e7   : > { %2960 = vcosq.f32 %v1942_v42  ;;  %vm2804_vm3 = vcmp.lt.s32.totalorder %v2803_v25, 0  ;;  %vm2177_vm2 = vcmp.gt.s32.totalorder %v2176_v24, 0  ;;  %v2117_v7 = vmul.u32 %v4404_v27, %v2101_v11 }
 0x2e8   : > { %2962 = vsinq.f32 %v1942_v42  ;;  %v2029_v49 = vsel %vm2804_vm3, 0, %v2803_v25  ;;  %vm2119_vm8 = vc.u32 %v4472_v53, %v4455_v60  ;;  %v2051_v45 = vadd.s32 3, %v2047_v18 }
 0x2e9   : > { %v2030_v46 = vsub.s32 32, %v2029_v49  ;;  %v2034_v47 = vsub.s32 4294967266, %v2029_v49  ;;  %v2121_v34 = vsel %vm2119_vm8, %v2120_v56, %v4456_v57  ;;  %v2174_v50 = vor.u32 8388608, %v2173_v61 }
 0x2ea   : > { %v2122_v30 = vadd.s32 %v2121_v34, %v2117_v7  ;;  %v2178_v1 = vsel %vm2177_vm2, %v2176_v24, 0  ;;  %v4494_v52 = vadd.f32 %v4488_v59, %v1822_v54  ;;  %v2031_v2 = vshll.u32 %v4434_v22, %v2029_v49 }
 0x2eb   : > { %v2032_v16 = vshrl.u32 %v2014_v55, %v2030_v46  ;;  %v2035_v33 = vadd.s32 127, %v2034_v47  ;;  %v2180_v37 = vand.u32 31, %v2178_v1  ;;  %v4499_v27 = vmul.f32 %v3443_v41, %v4219_v6 }
 0x2ec   : > { %v2123_v23 = vadd.s32 536870912, %v2122_v30  ;;  %vm1949_vm4 = vcmp.lt.s32.totalorder %v4462_v39, 2  ;;  %vm1946_vm0 = vweird.f32 %v4232_v43  ;;  %vm1950_vm1 = vcmp.eq.s32.totalorder %v4462_v39, 0 }
 0x2ed   : > { %v2033_v17 = vor.u32 %v2032_v16, %v2031_v2  ;;  %v2036_v20 = vshll.u32 %v2035_v33, 23  ;;  %v2181_v3 = vsub.s32 32, %v2180_v37  ;;  %vm1953_vm5 = vcmp.eq.s32.totalorder %v4462_v39, 2 }
 0x2ee   : > { %v4505_v22 = vand.u32 3, %v2051_v45  ;;  %v2124_v14 = vshrl.u32 %v2123_v23, 30  ;;  %v4508_v28 = vadd.s32 %v4455_v60, %v4472_v53  ;;  %v4510_v41 = vshll.u32 %v2174_v50, 8 }
 0x2ef   : > { %v2037_v10 = vor.u32 4788187, %v2036_v20  ;;  %v2270_v58 = vand.u32 2147483647, %v4494_v52  ;;  %vm2064_vm7 = vcmp.lt.s32.totalorder %v4266_v44, 0  ;;  %v4514_v4 = vshrl.u32 %v2178_v1, 5 }
 0x2f0   : > { %v2125_v26 = vshll.u32 %v2124_v14, 30  ;;  %v2183_v29 = vshll.u32 %v3017_v8, %v2180_v37  ;;  %v2184_v57 = vshrl.u32 %v3018_v38, %v2181_v3  ;;  %v2040_v35 = vcvt.s32.f32 %v2033_v17 }
 0x2f1   : > { %v2961_v21 = vpop.eup %2960  ;;  %v2038_v51 = vand.u32 2147483647, %v2037_v10  ;;  %v2186_v15 = vshll.u32 %v3018_v38, %v2180_v37  ;;  %v2189_v60 = vshll.u32 %v3019_v5, %v2180_v37  ;;  %v2187_v36 = vshrl.u32 %v3019_v5, %v2181_v3 }
 0x2f2   : > { %v2963_v54 = vpop.eup %2962  ;;  %v1954_v13 = vxor.u32 2147483648, %v2961_v21  ;;  %v4520_v53 = vsub.s32 %v2122_v30, %v2125_v26  ;;  %v2190_v25 = vshrl.u32 %v4927_v63, %v2181_v3  ;;  %v2192_v42 = vshll.u32 %v4927_v63, %v2180_v37 }
 0x2f3   : > { %v1951_v11 = vxor.u32 2147483648, %v2963_v54  ;;  %v2041_v24 = vmul.f32 %v2040_v35, %v2038_v51  ;;  %v2193_v18 = vshrl.u32 %v4928_v12, %v2181_v3  ;;  %v2148_v55 = vsub.s32 4, %v2124_v14 }
 0x2f4   : > { %v1955_v56 = vsel %vm1953_vm5, %v1954_v13, %v2963_v54  ;;  %v2128_v61 = vsub.s32 0, %v4520_v53  ;;  %v2185_v49 = vor.u32 %v2184_v57, %v2183_v29  ;;  %v2195_v47 = vshll.u32 %v4928_v12, %v2180_v37 }
 0x2f5   : > { %v1952_v7 = vsel %vm1950_vm1, %v2961_v21, %v1951_v11  ;;  %v2042_v46 = vxor.u32 2147483648, %v2041_v24  ;;  %v2196_v45 = vshrl.u32 %v4929_v62, %v2181_v3  ;;  %v2188_v50 = vor.u32 %v2187_v36, %v2186_v15 }
 0x2f6   : > { %v1956_v34 = vsel %vm1949_vm4, %v1952_v7, %v1955_v56  ;;  %v2806_v30 = vmin.u32 %v2128_v61, %v4520_v53  ;;  %v2191_v1 = vor.u32 %v2190_v25, %v2189_v60  ;;  %v2194_v33 = vor.u32 %v2193_v18, %v2192_v42 }
 0x2f7   : > { %v1957_v2 = vsel %vm1946_vm0, nan, %v1956_v34  ;;  %v2043_v16 = vsel %vm1960_vm9, %v2042_v46, %v2041_v24  ;;  %v2197_v23 = vor.u32 %v2196_v45, %v2195_v47  ;;  %v2182_v39 = vshrl.u32 %v3017_v8, %v2181_v3 }
 0x2f8   : > { %v2046_v37 = vsel %vm4466_vm10, %v4255_v9, %v2043_v16  ;;  %2686 = vst [vmem:[%s3822_s12 + $0x40] sm:$0xff] %v1957_v2  ;;  %v2130_v17 = vclz %v2806_v30  ;;  %v2273_v20 = vand.u32 2139095040, %v4494_v52  ;;  %v2149_v43 = vsel %vm2064_vm7, %v2148_v55, %v2124_v14 }
 0x2f9   : > { %2964 = vcosq.f32 %v2046_v37  ;;  %vm2198_vm13 = vcmp.lt.s32.totalorder %v4514_v4, 1  ;;  %vm2200_vm12 = vcmp.lt.s32.totalorder %v4514_v4, 3  ;;  %vm2201_vm9 = vcmp.lt.s32.totalorder %v4514_v4, 4 }
 0x2fa   : > { %2966 = vsinq.f32 %v2046_v37  ;;  %v2807_v10 = vadd.s32 4294967294, %v2130_v17  ;;  %v2206_v32 = vsel %vm2198_vm13, %v2185_v49, %v2188_v50  ;;  %v2203_v26 = vsel %vm2201_vm9, %v2191_v1, 2102212464 }
 0x2fb   : > { %v2207_v29 = vsel %vm2201_vm9, %v2194_v33, 920167782  ;;  %v2210_v57 = vsel %vm2198_vm13, %v2188_v50, %v2191_v1  ;;  %v2211_v21 = vsel %vm2201_vm9, %v2197_v23, 1326507024  ;;  %vm2199_vm14 = vcmp.lt.s32.totalorder %v4514_v4, 2 }
 0x2fc   : > { %vm2808_vm11 = vcmp.lt.s32.totalorder %v2807_v10, 0  ;;  %v2208_v3 = vsel %vm2200_vm12, %v2191_v1, %v2207_v29  ;;  %v2212_v14 = vsel %vm2200_vm12, %v2194_v33, %v2211_v21  ;;  %v2202_v35 = vsel %vm2198_vm13, %v2182_v39, %v2185_v49 }
 0x2fd   : > { %v2133_v51 = vsel %vm2808_vm11, 0, %v2807_v10  ;;  %v2209_v15 = vsel %vm2199_vm14, %v2206_v32, %v2208_v3  ;;  %v2213_v60 = vsel %vm2199_vm14, %v2210_v57, %v2212_v14  ;;  %v2204_v36 = vsel %vm2200_vm12, %v2188_v50, %v2203_v26 }
 0x2fe   : > { %v2134_v54 = vsub.s32 32, %v2133_v51  ;;  %v2138_v13 = vsub.s32 4294967266, %v2133_v51  ;;  %v2274_v25 = vshrl.u32 %v2273_v20, 23  ;;  %v2135_v56 = vshll.u32 %v4520_v53, %v2133_v51 }
 0x2ff   : > { %v4563_v11 = vmul.u32.u64.low %v4510_v41, %v2213_v60  ;;  %v4564_v24 = vmul.u32.u64.high %v4510_v41, %v2213_v60, %v4563_v11  ;;  %v4567_v42 = vmul.u32.u64.low %v4510_v41, %v2209_v15  ;;  %v4568_v18 = vmul.u32.u64.high %v4510_v41, %v2209_v15, %v4567_v42 }
 0x300   : > { %v2136_v61 = vshrl.u32 %v4508_v28, %v2134_v54  ;;  %v2139_v55 = vadd.s32 127, %v2138_v13  ;;  %v2813_v49 = vadd.s32 4294967169, %v2274_v25  ;;  %vm2050_vm15 = vweird.f32 %v4255_v9 }
 0x301   : > { %vm2054_vm6 = vcmp.eq.s32.totalorder %v4505_v22, 0  ;;  %vm4577_vm10 = vcmp.le.f32.partialorder %v2062_v40, 0.7853982  ;;  %v2205_v46 = vsel %vm2199_vm14, %v2202_v35, %v2204_v36  ;;  %vm2057_vm3 = vcmp.eq.s32.totalorder %v4505_v22, 2 }
 0x302   : > { %v2137_v53 = vor.u32 %v2136_v61, %v2135_v56  ;;  %v2140_v47 = vshll.u32 %v2139_v55, 23  ;;  %v2280_v28 = vadd.s32 1, %v2813_v49  ;;  %v2151_v34 = vsel %vm4577_vm10, 0, %v2149_v43 }
 0x303   : > { %v2965_v45 = vpop.eup %2964  ;;  %vm2223_vm2 = vc.u32 %v4564_v24, %v4567_v42  ;;  %v2224_v40 = vadd.s32 1, %v4568_v18  ;;  %v2277_v30 = vand.u32 8388607, %v2270_v58  ;;  %v2221_v2 = vmul.u32 %v4510_v41, %v2205_v46 }
 0x304   : > { %v2967_v50 = vpop.eup %2966  ;;  %v2058_v4 = vxor.u32 2147483648, %v2965_v45  ;;  %v2141_v1 = vor.u32 4788187, %v2140_v47  ;;  %vm2281_vm8 = vcmp.gt.s32.totalorder %v2280_v28, 0  ;;  %v4595_v23 = vadd.f32 %v4488_v59, %v4499_v27 }
 0x305   : > { %v2055_v16 = vxor.u32 2147483648, %v2967_v50  ;;  %v2225_v33 = vsel %vm2223_vm2, %v2224_v40, %v4568_v18  ;;  %v2282_v37 = vsel %vm2281_vm8, %v2280_v28, 0  ;;  %v2144_v20 = vcvt.s32.f32 %v2137_v53 }
 0x306   : > { %v2059_v17 = vsel %vm2057_vm3, %v2058_v4, %v2967_v50  ;;  %v2142_v39 = vand.u32 2147483647, %v2141_v1  ;;  %v2226_v43 = vadd.s32 %v2225_v33, %v2221_v2  ;;  %vm2053_vm4 = vcmp.lt.s32.totalorder %v4505_v22, 2 }
 0x307   : > { %v2056_v41 = vsel %vm2054_vm6, %v2965_v45, %v2055_v16  ;;  %v2155_v10 = vadd.s32 3, %v2151_v34  ;;  %v2284_v32 = vand.u32 31, %v2282_v37  ;;  %v2278_v59 = vor.u32 8388608, %v2277_v30 }
 0x308   : > { %v2060_v26 = vsel %vm2053_vm4, %v2056_v41, %v2059_v17  ;;  %v2145_v29 = vmul.f32 %v2144_v20, %v2142_v39  ;;  %v2227_v57 = vadd.s32 536870912, %v2226_v43  ;;  %v2283_v21 = vshrl.u32 %v2282_v37, 5 }
 0x309   : > { %v2061_v27 = vsel %vm2050_vm15, nan, %v2060_v26  ;;  %v2285_v3 = vsub.s32 32, %v2284_v32  ;;  %v2377_v14 = vand.u32 2139095040, %v4595_v23  ;;  %v2287_v22 = vshll.u32 %v3017_v8, %v2284_v32 }
 0x30a   : > { %2687 = vst [vmem:[%s3822_s12 + $0x48] sm:$0xff] %v2061_v27  ;;  %v2146_v51 = vxor.u32 2147483648, %v2145_v29  ;;  %v4606_v35 = vshrl.u32 %v2227_v57, 30  ;;  %v2290_v15 = vshll.u32 %v3018_v38, %v2284_v32  ;;  %v2293_v13 = vshll.u32 %v3019_v5, %v2284_v32 }
 0x30b   : > { %v2288_v60 = vshrl.u32 %v3018_v38, %v2285_v3  ;;  %v2291_v54 = vshrl.u32 %v3019_v5, %v2285_v3  ;;  %v2294_v9 = vshrl.u32 %v4927_v63, %v2285_v3  ;;  %v2296_v11 = vshll.u32 %v4927_v63, %v2284_v32 }
 0x30c   : > { %v2147_v36 = vsel %vm2064_vm7, %v2146_v51, %v2145_v29  ;;  %v2229_v25 = vshll.u32 %v4606_v35, 30  ;;  %v2297_v18 = vshrl.u32 %v4928_v12, %v2285_v3  ;;  %v4622_v61 = vand.u32 3, %v2155_v10 }
 0x30d   : > { %v2150_v56 = vsel %vm4577_vm10, %v4266_v44, %v2147_v36  ;;  %v2289_v55 = vor.u32 %v2288_v60, %v2287_v22  ;;  %v2292_v49 = vor.u32 %v2291_v54, %v2290_v15  ;;  %v2295_v53 = vor.u32 %v2294_v9, %v2293_v13 }
 0x30e   : > { %2968 = vcosq.f32 %v2150_v56  ;;  %v4624_v46 = vsub.s32 %v2226_v43, %v2229_v25  ;;  %v2298_v47 = vor.u32 %v2297_v18, %v2296_v11  ;;  %v2299_v28 = vshll.u32 %v4928_v12, %v2284_v32 }
 0x30f   : > { %2970 = vsinq.f32 %v2150_v56  ;;  %v2300_v45 = vshrl.u32 %v4929_v62, %v2285_v3  ;;  %v2378_v34 = vshrl.u32 %v2377_v14, 23  ;;  %vm2168_vm0 = vcmp.lt.s32.totalorder %v4327_v0, 0 }
 0x310   : > { %v2232_v7 = vsub.s32 0, %v4624_v46  ;;  %vm2302_vm1 = vcmp.lt.s32.totalorder %v2283_v21, 1  ;;  %v2318_v40 = vshll.u32 %v2278_v59, 8  ;;  %v2374_v30 = vand.u32 2147483647, %v4595_v23 }
 0x311   : > { %v2286_v50 = vshrl.u32 %v3017_v8, %v2285_v3  ;;  %v2301_v4 = vor.u32 %v2300_v45, %v2299_v28  ;;  %vm2304_vm5 = vcmp.lt.s32.totalorder %v2283_v21, 3  ;;  %vm2305_vm7 = vcmp.lt.s32.totalorder %v2283_v21, 4 }
 0x312   : > { %v2810_v1 = vmin.u32 %v2232_v7, %v4624_v46  ;;  %v2307_v2 = vsel %vm2305_vm7, %v2295_v53, 2102212464  ;;  %v2310_v16 = vsel %vm2302_vm1, %v2289_v55, %v2292_v49  ;;  %v2311_v33 = vsel %vm2305_vm7, %v2298_v47, 920167782 }
 0x313   : > { %v2312_v37 = vsel %vm2304_vm5, %v2295_v53, %v2311_v33  ;;  %v2314_v17 = vsel %vm2302_vm1, %v2292_v49, %v2295_v53  ;;  %v2315_v39 = vsel %vm2305_vm7, %v2301_v4, 1326507024  ;;  %v2817_v20 = vadd.s32 4294967169, %v2378_v34 }
 0x314   : > { %vm2157_vm13 = vcmp.lt.s32.totalorder %v4622_v61, 2  ;;  %v2234_v43 = vclz %v2810_v1  ;;  %vm2303_vm12 = vcmp.lt.s32.totalorder %v2283_v21, 2  ;;  %v2306_v41 = vsel %vm2302_vm1, %v2286_v50, %v2289_v55 }
 0x315   : > { %v2308_v10 = vsel %vm2304_vm5, %v2292_v49, %v2307_v2  ;;  %vm2154_vm9 = vweird.f32 %v4266_v44  ;;  %vm2158_vm11 = vcmp.eq.s32.totalorder %v4622_v61, 0  ;;  %v2252_v32 = vsub.s32 4, %v4606_v35 }
 0x316   : > { %v2313_v26 = vsel %vm2303_vm12, %v2310_v16, %v2312_v37  ;;  %v2316_v29 = vsel %vm2304_vm5, %v2298_v47, %v2315_v39  ;;  %v2811_v57 = vadd.s32 4294967294, %v2234_v43  ;;  %v2309_v14 = vsel %vm2303_vm12, %v2306_v41, %v2308_v10 }
 0x317   : > { %v2317_v59 = vsel %vm2303_vm12, %v2314_v17, %v2316_v29  ;;  %v4643_v27 = vmul.u32.u64.low %v2318_v40, %v2313_v26  ;;  %v4644_v3 = vmul.u32.u64.high %v2318_v40, %v2313_v26, %v4643_v27  ;;  %v2384_v15 = vadd.s32 1, %v2817_v20 }
 0x318   : > { %v4647_v51 = vmul.u32.u64.low %v2318_v40, %v2317_v59  ;;  %v4648_v22 = vmul.u32.u64.high %v2318_v40, %v2317_v59, %v4647_v51  ;;  %v2969_v60 = vpop.eup %2968  ;;  %vm2161_vm14 = vcmp.eq.s32.totalorder %v4622_v61, 2  ;;  %v2222_v54 = vadd.s32 %v4567_v42, %v4564_v24 }
 0x319   : > { %vm2812_vm15 = vcmp.lt.s32.totalorder %v2811_v57, 0  ;;  %v2381_v21 = vand.u32 8388607, %v2374_v30  ;;  %v2971_v13 = vpop.eup %2970  ;;  %v2162_v9 = vxor.u32 2147483648, %v2969_v60  ;;  %v2253_v25 = vsel %vm2168_vm0, %v2252_v32, %v4606_v35 }
 0x31a   : > { %v2237_v36 = vsel %vm2812_vm15, 0, %v2811_v57  ;;  %vm2385_vm6 = vcmp.gt.s32.totalorder %v2384_v15, 0  ;;  %v2159_v11 = vxor.u32 2147483648, %v2971_v13  ;;  %v2325_v55 = vmul.u32 %v2318_v40, %v2309_v14 }
 0x31b   : > { %v2238_v18 = vsub.s32 32, %v2237_v36  ;;  %v2242_v56 = vsub.s32 4294967266, %v2237_v36  ;;  %v2163_v49 = vsel %vm2161_vm14, %v2162_v9, %v2971_v13  ;;  %v2239_v53 = vshll.u32 %v4624_v46, %v2237_v36 }
 0x31c   : > { %vm2327_vm10 = vc.u32 %v4648_v22, %v4643_v27  ;;  %v2328_v24 = vadd.s32 1, %v4644_v3  ;;  %v2160_v42 = vsel %vm2158_vm11, %v2969_v60, %v2159_v11  ;;  %v2386_v35 = vsel %vm2385_vm6, %v2384_v15, 0 }
 0x31d   : > { %v2240_v47 = vshrl.u32 %v2222_v54, %v2238_v18  ;;  %v2243_v28 = vadd.s32 127, %v2242_v56  ;;  %v2164_v45 = vsel %vm2157_vm13, %v2160_v42, %v2163_v49  ;;  %vm4668_vm3 = vcmp.le.f32.partialorder %v2166_v31, 0.7853982 }
 0x31e   : > { %v2329_v46 = vsel %vm2327_vm10, %v2328_v24, %v4644_v3  ;;  %v2388_v7 = vand.u32 31, %v2386_v35  ;;  %v2165_v40 = vsel %vm2154_vm9, nan, %v2164_v45  ;;  %v2255_v2 = vsel %vm4668_vm3, 0, %v2253_v25 }
 0x31f   : > { %v2241_v50 = vor.u32 %v2240_v47, %v2239_v53  ;;  %v2244_v4 = vshll.u32 %v2243_v28, 23  ;;  %v2330_v1 = vadd.s32 %v2329_v46, %v2325_v55  ;;  %2688 = vst [vmem:[%s3822_s12 + $0x50] sm:$0xff] %v2165_v40  ;;  %v2382_v31 = vor.u32 8388608, %v2381_v21 }
 0x320   : > { %v2389_v61 = vsub.s32 32, %v2388_v7  ;;  %v2391_v37 = vshll.u32 %v3017_v8, %v2388_v7  ;;  %v2394_v39 = vshll.u32 %v3018_v38, %v2388_v7  ;;  %v2387_v26 = vshrl.u32 %v2386_v35, 5  ;;  %v1844_v35 = vpop.permute.xlu0 %1843 }
 0x321   : > { %v2245_v16 = vor.u32 4788187, %v2244_v4  ;;  %v2331_v33 = vadd.s32 536870912, %v2330_v1  ;;  %v2248_v41 = vcvt.s32.f32 %v2241_v50  ;;  %v2397_v29 = vshll.u32 %v3019_v5, %v2388_v7 }
 0x322   : > { %v2392_v17 = vshrl.u32 %v3018_v38, %v2389_v61  ;;  %v2395_v44 = vshrl.u32 %v3019_v5, %v2389_v61  ;;  %v2398_v20 = vshrl.u32 %v4927_v63, %v2389_v61  ;;  %v2401_v32 = vshrl.u32 %v4928_v12, %v2389_v61 }
 0x323   : > { %v2246_v43 = vand.u32 2147483647, %v2245_v16  ;;  %v4683_v10 = vshrl.u32 %v2331_v33, 30  ;;  %v2400_v57 = vshll.u32 %v4927_v63, %v2388_v7  ;;  %v2404_v59 = vshrl.u32 %v4929_v62, %v2389_v61 }
 0x324   : > { %v2393_v51 = vor.u32 %v2392_v17, %v2391_v37  ;;  %v2396_v15 = vor.u32 %v2395_v44, %v2394_v39  ;;  %v2399_v60 = vor.u32 %v2398_v20, %v2397_v29  ;;  %v2403_v21 = vshll.u32 %v4928_v12, %v2388_v7 }
 0x325   : > { %v2249_v3 = vmul.f32 %v2248_v41, %v2246_v43  ;;  %v2333_v14 = vshll.u32 %v4683_v10, 30  ;;  %v2402_v54 = vor.u32 %v2401_v32, %v2400_v57  ;;  %v2259_v9 = vadd.s32 3, %v2255_v2 }
 0x326   : > { %v4693_v25 = vshll.u32 %v2382_v31, 8  ;;  %v2390_v11 = vshrl.u32 %v3017_v8, %v2389_v61  ;;  %v2405_v18 = vor.u32 %v2404_v59, %v2403_v21  ;;  %vm2406_vm2 = vcmp.lt.s32.totalorder %v2387_v26, 1 }
 0x327   : > { %v2250_v13 = vxor.u32 2147483648, %v2249_v3  ;;  %v4691_v36 = vsub.s32 %v2330_v1, %v2333_v14  ;;  %v1824_v56 = vmul.f32 %v3445_v19, %v4213_v48  ;;  %vm2409_vm8 = vcmp.lt.s32.totalorder %v2387_v26, 4 }
 0x328   : > { %v2414_v53 = vsel %vm2406_vm2, %v2393_v51, %v2396_v15  ;;  %vm2408_vm4 = vcmp.lt.s32.totalorder %v2387_v26, 3  ;;  %v2411_v42 = vsel %vm2409_vm8, %v2399_v60, 2102212464  ;;  %v2415_v47 = vsel %vm2409_vm8, %v2402_v54, 920167782 }
 0x329   : > { %v2251_v55 = vsel %vm2168_vm0, %v2250_v13, %v2249_v3  ;;  %v2336_v49 = vsub.s32 0, %v4691_v36  ;;  %vm2407_vm1 = vcmp.lt.s32.totalorder %v2387_v26, 2  ;;  %v2416_v48 = vsel %vm2408_vm4, %v2399_v60, %v2415_v47 }
 0x32a   : > { %v2254_v24 = vsel %vm4668_vm3, %v4327_v0, %v2251_v55  ;;  %v2417_v45 = vsel %vm2407_vm1, %v2414_v53, %v2416_v48  ;;  %v2418_v46 = vsel %vm2406_vm2, %v2396_v15, %v2399_v60  ;;  %v2419_v7 = vsel %vm2409_vm8, %v2405_v18, 1326507024 }
 0x32b   : > { %2972 = vcosq.f32 %v2254_v24  ;;  %v2814_v28 = vmin.u32 %v2336_v49, %v4691_v36  ;;  %v2260_v40 = vand.u32 3, %v2259_v9  ;;  %v2410_v34 = vsel %vm2406_vm2, %v2390_v11, %v2393_v51 }
 0x32c   : > { %2974 = vsinq.f32 %v2254_v24  ;;  %v2412_v4 = vsel %vm2408_vm4, %v2396_v15, %v2411_v42  ;;  %v2420_v1 = vsel %vm2408_vm4, %v2402_v54, %v2419_v7  ;;  %v4717_v16 = vadd.f32 %v1844_v35, %v1824_v56 }
 0x32d   : > { %v2338_v50 = vclz %v2814_v28  ;;  %v4713_v2 = vmul.u32.u64.low %v4693_v25, %v2417_v45  ;;  %v4714_v61 = vmul.u32.u64.high %v4693_v25, %v2417_v45, %v4713_v2  ;;  %v2356_v31 = vsub.s32 4, %v4683_v10 }
 0x32e   : > { %v2421_v37 = vsel %vm2407_vm1, %v2418_v46, %v2420_v1  ;;  %vm4723_vm0 = vcmp.le.f32.partialorder %v2270_v58, 0.7853982  ;;  %vm2272_vm5 = vcmp.lt.s32.totalorder %v4494_v52, 0  ;;  %vm2261_vm7 = vcmp.lt.s32.totalorder %v2260_v40, 2 }
 0x32f   : > { %v2815_v33 = vadd.s32 4294967294, %v2338_v50  ;;  %v4729_v39 = vmul.u32.u64.low %v4693_v25, %v2421_v37  ;;  %v4730_v44 = vmul.u32.u64.high %v4693_v25, %v2421_v37, %v4729_v39  ;;  %v2413_v20 = vsel %vm2407_vm1, %v2410_v34, %v2412_v4 }
 0x330   : > { %v2481_v43 = vand.u32 2139095040, %v4717_v16  ;;  %vm2258_vm12 = vweird.f32 %v4327_v0  ;;  %v2326_v58 = vadd.s32 %v4643_v27, %v4648_v22  ;;  %v2432_v32 = vadd.s32 1, %v4714_v61 }
 0x331   : > { %vm2816_vm13 = vcmp.lt.s32.totalorder %v2815_v33, 0  ;;  %v1825_v29 = vmul.f32 %v3445_v19, %v4219_v6  ;;  %v2357_v26 = vsel %vm2272_vm5, %v2356_v31, %v4683_v10  ;;  %v2429_v51 = vmul.u32 %v4693_v25, %v2413_v20 }
 0x332   : > { %v2341_v41 = vsel %vm2816_vm13, 0, %v2815_v33  ;;  %v2482_v3 = vshrl.u32 %v2481_v43, 23  ;;  %vm2431_vm9 = vc.u32 %v4730_v44, %v4713_v2  ;;  %v2478_v27 = vand.u32 2147483647, %v4717_v16 }
 0x333   : > { %v2342_v57 = vsub.s32 32, %v2341_v41  ;;  %v2346_v59 = vsub.s32 4294967266, %v2341_v41  ;;  %v2343_v14 = vshll.u32 %v4691_v36, %v2341_v41  ;;  %v2433_v19 = vsel %vm2431_vm9, %v2432_v32, %v4714_v61 }
 0x334   : > { %v2821_v6 = vadd.s32 4294967169, %v2482_v3  ;;  %vm2265_vm11 = vcmp.eq.s32.totalorder %v2260_v40, 2  ;;  %v2434_v10 = vadd.s32 %v2433_v19, %v2429_v51  ;;  %v4749_v13 = vadd.f32 %v1844_v35, %v1825_v29 }
 0x335   : > { %v2973_v22 = vpop.eup %2972  ;;  %v2344_v15 = vshrl.u32 %v2326_v58, %v2342_v57  ;;  %v2347_v60 = vadd.s32 127, %v2346_v59  ;;  %vm2262_vm14 = vcmp.eq.s32.totalorder %v2260_v40, 0  ;;  %v2359_v56 = vsel %vm4723_vm0, 0, %v2357_v26 }
 0x336   : > { %v2975_v54 = vpop.eup %2974  ;;  %v2266_v21 = vxor.u32 2147483648, %v2973_v22  ;;  %v2488_v11 = vadd.s32 1, %v2821_v6  ;;  %v2435_v55 = vadd.s32 536870912, %v2434_v10  ;;  %v2485_v24 = vand.u32 8388607, %v2478_v27 }
 0x337   : > { %v2263_v9 = vxor.u32 2147483648, %v2975_v54  ;;  %v2345_v36 = vor.u32 %v2344_v15, %v2343_v14  ;;  %v2348_v25 = vshll.u32 %v2347_v60, 23  ;;  %v2585_v48 = vand.u32 2139095040, %v4749_v13 }
 0x338   : > { %v2267_v18 = vsel %vm2265_vm11, %v2266_v21, %v2975_v54  ;;  %vm2489_vm15 = vcmp.gt.s32.totalorder %v2488_v11, 0  ;;  %v4756_v47 = vshrl.u32 %v2435_v55, 30  ;;  %v2363_v4 = vadd.s32 3, %v2359_v56 }
 0x339   : > { %v2264_v49 = vsel %vm2262_vm14, %v2973_v22, %v2263_v9  ;;  %v2349_v53 = vor.u32 4788187, %v2348_v25  ;;  %v2490_v28 = vsel %vm2489_vm15, %v2488_v11, 0  ;;  %v2352_v46 = vcvt.s32.f32 %v2345_v36 }
 0x33a   : > { %v2268_v42 = vsel %vm2261_vm7, %v2264_v49, %v2267_v18  ;;  %v2492_v7 = vand.u32 31, %v2490_v28  ;;  %v2437_v50 = vshll.u32 %v4756_v47, 30  ;;  %v2486_v40 = vor.u32 8388608, %v2485_v24 }
 0x33b   : > { %v2269_v35 = vsel %vm2258_vm12, nan, %v2268_v42  ;;  %v2350_v45 = vand.u32 2147483647, %v2349_v53  ;;  %v4765_v33 = vshrl.u32 %v2490_v28, 5  ;;  %v2586_v31 = vshrl.u32 %v2585_v48, 23 }
 0x33c   : > { %2689 = vst [vmem:[%s3822_s12 + $0x58] sm:$0xff] %v2269_v35  ;;  %v2493_v1 = vsub.s32 32, %v2492_v7  ;;  %v4763_v61 = vsub.s32 %v2434_v10, %v2437_v50  ;;  %v2495_v39 = vshll.u32 %v3017_v8, %v2492_v7  ;;  %v2498_v20 = vshll.u32 %v3018_v38, %v2492_v7 }
 0x33d   : > { %v2353_v34 = vmul.f32 %v2352_v46, %v2350_v45  ;;  %v2501_v41 = vshll.u32 %v3019_v5, %v2492_v7  ;;  %v2504_v59 = vshll.u32 %v4927_v63, %v2492_v7  ;;  %v2507_v22 = vshll.u32 %v4928_v12, %v2492_v7 }
 0x33e   : > { %v2496_v0 = vshrl.u32 %v3018_v38, %v2493_v1  ;;  %v2440_v43 = vsub.s32 0, %v4763_v61  ;;  %v2499_v58 = vshrl.u32 %v3019_v5, %v2493_v1  ;;  %v2502_v32 = vshrl.u32 %v4927_v63, %v2493_v1 }
 0x33f   : > { %v2354_v37 = vxor.u32 2147483648, %v2353_v34  ;;  %v2505_v26 = vshrl.u32 %v4928_v12, %v2493_v1  ;;  %v2508_v19 = vshrl.u32 %v4929_v62, %v2493_v1  ;;  %v2364_v6 = vand.u32 3, %v2363_v4 }
 0x340   : > { %v2497_v57 = vor.u32 %v2496_v0, %v2495_v39  ;;  %v2818_v14 = vmin.u32 %v2440_v43, %v4763_v61  ;;  %v2500_v51 = vor.u32 %v2499_v58, %v2498_v20  ;;  %v2503_v15 = vor.u32 %v2502_v32, %v2501_v41 }
 0x341   : > { %v2355_v29 = vsel %vm2272_vm5, %v2354_v37, %v2353_v34  ;;  %v2506_v60 = vor.u32 %v2505_v26, %v2504_v59  ;;  %v2430_v54 = vadd.s32 %v4713_v2, %v4730_v44  ;;  %v2494_v10 = vshrl.u32 %v3017_v8, %v2493_v1 }
 0x342   : > { %v2358_v3 = vsel %vm4723_vm0, %v4494_v52, %v2355_v29  ;;  %v2442_v21 = vclz %v2818_v14  ;;  %v2509_v17 = vor.u32 %v2508_v19, %v2507_v22  ;;  %v2526_v9 = vshll.u32 %v2486_v40, 8 }
 0x343   : > { %2976 = vcosq.f32 %v2358_v3  ;;  %v2825_v36 = vadd.s32 4294967169, %v2586_v31  ;;  %vm2510_vm6 = vcmp.lt.s32.totalorder %v4765_v33, 1  ;;  %vm2512_vm10 = vcmp.lt.s32.totalorder %v4765_v33, 3 }
 0x344   : > { %2978 = vsinq.f32 %v2358_v3  ;;  %v2819_v25 = vadd.s32 4294967294, %v2442_v21  ;;  %vm2513_vm3 = vcmp.lt.s32.totalorder %v4765_v33, 4  ;;  %v2518_v18 = vsel %vm2510_vm6, %v2497_v57, %v2500_v51 }
 0x345   : > { %v2515_v11 = vsel %vm2513_vm3, %v2503_v15, 2102212464  ;;  %v2519_v56 = vsel %vm2513_vm3, %v2506_v60, 920167782  ;;  %v2522_v55 = vsel %vm2510_vm6, %v2500_v51, %v2503_v15  ;;  %vm2376_vm2 = vcmp.lt.s32.totalorder %v4595_v23, 0 }
 0x346   : > { %vm2820_vm8 = vcmp.lt.s32.totalorder %v2819_v25, 0  ;;  %vm2511_vm4 = vcmp.lt.s32.totalorder %v4765_v33, 2  ;;  %v2520_v2 = vsel %vm2512_vm10, %v2503_v15, %v2519_v56  ;;  %v2523_v44 = vsel %vm2513_vm3, %v2509_v17, 1326507024 }
 0x347   : > { %vm2365_vm1 = vcmp.lt.s32.totalorder %v2364_v6, 2  ;;  %v2445_v49 = vsel %vm2820_vm8, 0, %v2819_v25  ;;  %v2514_v53 = vsel %vm2510_vm6, %v2494_v10, %v2497_v57  ;;  %v2521_v24 = vsel %vm2511_vm4, %v2518_v18, %v2520_v2 }
 0x348   : > { %v2524_v42 = vsel %vm2512_vm10, %v2506_v60, %v2523_v44  ;;  %vm2362_vm0 = vweird.f32 %v4494_v52  ;;  %v2446_v28 = vsub.s32 32, %v2445_v49  ;;  %v2450_v48 = vsub.s32 4294967266, %v2445_v49 }
 0x349   : > { %v2516_v35 = vsel %vm2512_vm10, %v2500_v51, %v2515_v11  ;;  %v2525_v45 = vsel %vm2511_vm4, %v2522_v55, %v2524_v42  ;;  %v4806_v50 = vmul.u32.u64.low %v2526_v9, %v2521_v24  ;;  %v4807_v34 = vmul.u32.u64.high %v2526_v9, %v2521_v24, %v4806_v50 }
 0x34a   : > { %v4803_v46 = vmul.u32.u64.low %v2526_v9, %v2525_v45  ;;  %v4804_v7 = vmul.u32.u64.high %v2526_v9, %v2525_v45, %v4803_v46  ;;  %v2447_v4 = vshll.u32 %v4763_v61, %v2445_v49  ;;  %v2448_v1 = vshrl.u32 %v2430_v54, %v2446_v28 }
 0x34b   : > { %v2451_v40 = vadd.s32 127, %v2450_v48  ;;  %v2592_v31 = vadd.s32 1, %v2825_v36  ;;  %vm2366_vm5 = vcmp.eq.s32.totalorder %v2364_v6, 0  ;;  %vm2369_vm7 = vcmp.eq.s32.totalorder %v2364_v6, 2 }
 0x34c   : > { %v2460_v39 = vsub.s32 4, %v4756_v47  ;;  %v2517_v0 = vsel %vm2511_vm4, %v2514_v53, %v2516_v35  ;;  %v2449_v58 = vor.u32 %v2448_v1, %v2447_v4  ;;  %vm2535_vm12 = vc.u32 %v4804_v7, %v4806_v50 }
 0x34d   : > { %v2977_v37 = vpop.eup %2976  ;;  %v2452_v41 = vshll.u32 %v2451_v40, 23  ;;  %vm2593_vm13 = vcmp.gt.s32.totalorder %v2592_v31, 0  ;;  %v2536_v61 = vadd.s32 1, %v4807_v34  ;;  %v2582_v29 = vand.u32 2147483647, %v4749_v13 }
 0x34e   : > { %v2979_v20 = vpop.eup %2978  ;;  %v2370_v43 = vxor.u32 2147483648, %v2977_v37  ;;  %v2533_v26 = vmul.u32 %v2526_v9, %v2517_v0  ;;  %v2594_v3 = vsel %vm2593_vm13, %v2592_v31, 0  ;;  %v2461_v14 = vsel %vm2376_vm2, %v2460_v39, %v4756_v47 }
 0x34f   : > { %v2367_v32 = vxor.u32 2147483648, %v2979_v20  ;;  %v2453_v59 = vor.u32 4788187, %v2452_v41  ;;  %v2537_v51 = vsel %vm2535_vm12, %v2536_v61, %v4807_v34  ;;  %v2596_v22 = vand.u32 31, %v2594_v3 }
 0x350   : > { %v2371_v57 = vsel %vm2369_vm7, %v2370_v43, %v2979_v20  ;;  %v2456_v19 = vcvt.s32.f32 %v2449_v58  ;;  %v2538_v54 = vadd.s32 %v2537_v51, %v2533_v26  ;;  %vm4828_vm9 = vcmp.le.f32.partialorder %v2374_v30, 0.7853982 }
 0x351   : > { %v2368_v33 = vsel %vm2366_vm5, %v2977_v37, %v2367_v32  ;;  %v2454_v60 = vand.u32 2147483647, %v2453_v59  ;;  %v2589_v47 = vand.u32 8388607, %v2582_v29  ;;  %v2597_v17 = vsub.s32 32, %v2596_v22 }
 0x352   : > { %v2372_v15 = vsel %vm2365_vm1, %v2368_v33, %v2371_v57  ;;  %v2463_v6 = vsel %vm4828_vm9, 0, %v2461_v14  ;;  %v2539_v36 = vadd.s32 536870912, %v2538_v54  ;;  %v2595_v25 = vshrl.u32 %v2594_v3, 5 }
 0x353   : > { %v2373_v21 = vsel %vm2362_vm0, nan, %v2372_v15  ;;  %v2457_v9 = vmul.f32 %v2456_v19, %v2454_v60  ;;  %v2599_v52 = vshll.u32 %v3017_v8, %v2596_v22  ;;  %v2600_v11 = vshrl.u32 %v3018_v38, %v2597_v17 }
 0x354   : > { %2690 = vst [vmem:[%s3822_s12 + $0x60] sm:$0xff] %v2373_v21  ;;  %v2602_v30 = vshll.u32 %v3018_v38, %v2596_v22  ;;  %v2603_v18 = vshrl.u32 %v3019_v5, %v2597_v17  ;;  %v4841_v55 = vshrl.u32 %v2539_v36, 30  ;;  %v2606_v2 = vshrl.u32 %v4927_v63, %v2597_v17 }
 0x355   : > { %v2458_v56 = vxor.u32 2147483648, %v2457_v9  ;;  %v2609_v44 = vshrl.u32 %v4928_v12, %v2597_v17  ;;  %v2605_v49 = vshll.u32 %v3019_v5, %v2596_v22  ;;  %v2608_v53 = vshll.u32 %v4927_v63, %v2596_v22 }
 0x356   : > { %v2611_v24 = vshll.u32 %v4928_v12, %v2596_v22  ;;  %v2612_v42 = vshrl.u32 %v4929_v62, %v2597_v17  ;;  %v2541_v28 = vshll.u32 %v4841_v55, 30  ;;  %v2601_v48 = vor.u32 %v2600_v11, %v2599_v52 }
 0x357   : > { %v2459_v38 = vsel %vm2376_vm2, %v2458_v56, %v2457_v9  ;;  %v2604_v35 = vor.u32 %v2603_v18, %v2602_v30  ;;  %v2610_v46 = vor.u32 %v2609_v44, %v2608_v53  ;;  %v2607_v63 = vor.u32 %v2606_v2, %v2605_v49 }
 0x358   : > { %v2462_v45 = vsel %vm4828_vm9, %v4595_v23, %v2459_v38  ;;  %v2613_v34 = vor.u32 %v2612_v42, %v2611_v24  ;;  %v2542_v5 = vsub.s32 %v2538_v54, %v2541_v28  ;;  %v2467_v12 = vadd.s32 3, %v2463_v6 }
 0x359   : > { %2980 = vcosq.f32 %v2462_v45  ;;  %v2590_v4 = vor.u32 8388608, %v2589_v47  ;;  %vm2614_vm11 = vcmp.lt.s32.totalorder %v2595_v25, 1  ;;  %v2598_v1 = vshrl.u32 %v3017_v8, %v2597_v17 }
 0x35a   : > { %2982 = vsinq.f32 %v2462_v45  ;;  %v2544_v62 = vsub.s32 0, %v2542_v5  ;;  %vm2617_vm14 = vcmp.lt.s32.totalorder %v2595_v25, 4  ;;  %v2622_v40 = vsel %vm2614_vm11, %v2601_v48, %v2604_v35 }
 0x35b   : > { %vm2615_vm15 = vcmp.lt.s32.totalorder %v2595_v25, 2  ;;  %vm2616_vm6 = vcmp.lt.s32.totalorder %v2595_v25, 3  ;;  %v2623_v31 = vsel %vm2617_vm14, %v2610_v46, 920167782  ;;  %v2627_v37 = vsel %vm2617_vm14, %v2613_v34, 1326507024 }
 0x35c   : > { %v2822_v39 = vmin.u32 %v2544_v62, %v2542_v5  ;;  %v2619_v0 = vsel %vm2617_vm14, %v2607_v63, 2102212464  ;;  %v2624_v20 = vsel %vm2616_vm6, %v2607_v63, %v2623_v31  ;;  %v2626_v43 = vsel %vm2614_vm11, %v2604_v35, %v2607_v63 }
 0x35d   : > { %v2625_v58 = vsel %vm2615_vm15, %v2622_v40, %v2624_v20  ;;  %v2628_v41 = vsel %vm2616_vm6, %v2610_v46, %v2627_v37  ;;  %v2630_v32 = vshll.u32 %v2590_v4, 8  ;;  %v2468_v61 = vand.u32 3, %v2467_v12 }
 0x35e   : > { %v2546_v57 = vclz %v2822_v39  ;;  %v2618_v8 = vsel %vm2614_vm11, %v2598_v1, %v2601_v48  ;;  %v2620_v59 = vsel %vm2616_vm6, %v2604_v35, %v2619_v0  ;;  %v2629_v26 = vsel %vm2615_vm15, %v2626_v43, %v2628_v41 }
 0x35f   : > { %v4861_v3 = vmul.u32.u64.low %v2630_v32, %v2625_v58  ;;  %v4862_v33 = vmul.u32.u64.high %v2630_v32, %v2625_v58, %v4861_v3  ;;  %v4864_v51 = vmul.u32.u64.low %v2630_v32, %v2629_v26  ;;  %v4865_v22 = vmul.u32.u64.high %v2630_v32, %v2629_v26, %v4864_v51 }
 0x360   : > { %v2823_v14 = vadd.s32 4294967294, %v2546_v57  ;;  %vm2469_vm10 = vcmp.lt.s32.totalorder %v2468_v61, 2  ;;  %vm2470_vm3 = vcmp.eq.s32.totalorder %v2468_v61, 0  ;;  %v2621_v60 = vsel %vm2615_vm15, %v2618_v8, %v2620_v59 }
 0x361   : > { %vm2473_vm8 = vcmp.eq.s32.totalorder %v2468_v61, 2  ;;  %v2640_v10 = vadd.s32 1, %v4862_v33  ;;  %v2534_v17 = vadd.s32 %v4806_v50, %v4804_v7  ;;  %v2637_v11 = vmul.u32 %v2630_v32, %v2621_v60 }
 0x362   : > { %vm2824_vm2 = vcmp.lt.s32.totalorder %v2823_v14, 0  ;;  %vm2639_vm4 = vc.u32 %v4865_v22, %v4861_v3  ;;  %vm2466_vm1 = vweird.f32 %v4595_v23  ;;  %v2564_v45 = vsub.s32 4, %v4841_v55 }
 0x363   : > { %v2981_v15 = vpop.eup %2980  ;;  %v2549_v21 = vsel %vm2824_vm2, 0, %v2823_v14  ;;  %v2641_v56 = vsel %vm2639_vm4, %v2640_v10, %v4862_v33  ;;  %vm2480_vm0 = vcmp.lt.s32.totalorder %v4717_v16, 0  ;;  %vm2479_vm5 = vcmp.le.f32.partialorder %v2478_v27, 0.7853982 }
 0x364   : > { %v2983_v19 = vpop.eup %2982  ;;  %v2474_v54 = vxor.u32 2147483648, %v2981_v15  ;;  %v2550_v9 = vsub.s32 32, %v2549_v21  ;;  %v2554_v6 = vsub.s32 4294967266, %v2549_v21  ;;  %v2551_v52 = vshll.u32 %v2542_v5, %v2549_v21 }
 0x365   : > { %v2471_v47 = vxor.u32 2147483648, %v2983_v19  ;;  %v2642_v44 = vadd.s32 %v2641_v56, %v2637_v11  ;;  %v2565_v63 = vsel %vm2480_vm0, %v2564_v45, %v4841_v55  ;;  %v2638_v39 = vadd.s32 %v4861_v3, %v4865_v22 }
 0x366   : > { %v2475_v36 = vsel %vm2473_vm8, %v2474_v54, %v2983_v19  ;;  %v2552_v30 = vshrl.u32 %v2534_v17, %v2550_v9  ;;  %v2555_v18 = vadd.s32 127, %v2554_v6  ;;  %v2567_v62 = vsel %vm2479_vm5, 0, %v2565_v63 }
 0x367   : > { %v2472_v25 = vsel %vm2470_vm3, %v2981_v15, %v2471_v47  ;;  %v2643_v53 = vadd.s32 536870912, %v2642_v44  ;;  %v2571_v31 = vadd.s32 3, %v2567_v62  ;;  %vm2570_vm11 = vweird.f32 %v4717_v16 }
 0x368   : > { %v2476_v2 = vsel %vm2469_vm10, %v2472_v25, %v2475_v36  ;;  %v2553_v50 = vor.u32 %v2552_v30, %v2551_v52  ;;  %v2556_v49 = vshll.u32 %v2555_v18, 23  ;;  %vm2584_vm14 = vcmp.lt.s32.totalorder %v4749_v13, 0 }
 0x369   : > { %v2477_v7 = vsel %vm2466_vm1, nan, %v2476_v2  ;;  %v2644_v42 = vshrl.u32 %v2643_v53, 30  ;;  %v2572_v43 = vand.u32 3, %v2571_v31  ;;  %vm2583_vm15 = vcmp.le.f32.partialorder %v2582_v29, 0.7853982 }
 0x36a   : > { %2691 = vst [vmem:[%s3822_s12 + $0x68] sm:$0xff] %v2477_v7  ;;  %v2557_v24 = vor.u32 4788187, %v2556_v49  ;;  %v2560_v28 = vcvt.s32.f32 %v2553_v50  ;;  %vm2674_vm2 = vweird.f32 %v4749_v13 }
 0x36b   : > { %v2645_v48 = vshll.u32 %v2644_v42, 30  ;;  %vm2577_vm13 = vcmp.eq.s32.totalorder %v2572_v43, 2  ;;  %vm2574_vm12 = vcmp.eq.s32.totalorder %v2572_v43, 0  ;;  %vm2573_vm9 = vcmp.lt.s32.totalorder %v2572_v43, 2 }
 0x36c   : > { %v2558_v38 = vand.u32 2147483647, %v2557_v24  ;;  %v2668_v19 = vsub.s32 4, %v2644_v42 }
 0x36d   : > { %v2646_v46 = vsub.s32 %v2642_v44, %v2645_v48 }
 0x36e   : > { %v2561_v35 = vmul.f32 %v2560_v28, %v2558_v38  ;;  %v2669_v10 = vsel %vm2584_vm14, %v2668_v19, %v2644_v42 }
 0x36f   : > { %v2648_v23 = vsub.s32 0, %v2646_v46  ;;  %v2671_v17 = vsel %vm2583_vm15, 0, %v2669_v10 }
 0x370   : > { %v2562_v34 = vxor.u32 2147483648, %v2561_v35 }
 0x371   : > { %v2826_v4 = vmin.u32 %v2648_v23, %v2646_v46 }
 0x372   : > { %v2563_v5 = vsel %vm2480_vm0, %v2562_v34, %v2561_v35 }
 0x373   : > { %v2566_v12 = vsel %vm2479_vm5, %v4717_v16, %v2563_v5  ;;  %v2650_v1 = vclz %v2826_v4  ;;  %v2675_v16 = vadd.s32 3, %v2671_v17 }
 0x374   : > { %2984 = vcosq.f32 %v2566_v12 }
 0x375   : > { %2986 = vsinq.f32 %v2566_v12  ;;  %v2827_v40 = vadd.s32 4294967294, %v2650_v1  ;;  %v2676_v9 = vand.u32 3, %v2675_v16 }
 0x377   : > { %vm2828_vm7 = vcmp.lt.s32.totalorder %v2827_v40, 0  ;;  %vm2681_vm6 = vcmp.eq.s32.totalorder %v2676_v9, 2  ;;  %vm2678_vm10 = vcmp.eq.s32.totalorder %v2676_v9, 0  ;;  %vm2677_vm3 = vcmp.lt.s32.totalorder %v2676_v9, 2 }
 0x378   : > { %v2653_v37 = vsel %vm2828_vm7, 0, %v2827_v40 }
 0x379   : > { %v2654_v0 = vsub.s32 32, %v2653_v37  ;;  %v2658_v20 = vsub.s32 4294967266, %v2653_v37  ;;  %v2655_v27 = vshll.u32 %v2646_v46, %v2653_v37 }
 0x37b   : > { %v2656_v58 = vshrl.u32 %v2638_v39, %v2654_v0  ;;  %v2659_v41 = vadd.s32 127, %v2658_v20 }
 0x37d   : > { %v2657_v57 = vor.u32 %v2656_v58, %v2655_v27  ;;  %v2660_v8 = vshll.u32 %v2659_v41, 23 }
 0x37e   : > { %v2985_v55 = vpop.eup %2984 }
 0x37f   : > { %v2987_v32 = vpop.eup %2986  ;;  %v2578_v61 = vxor.u32 2147483648, %v2985_v55  ;;  %v2661_v33 = vor.u32 4788187, %v2660_v8  ;;  %v2664_v22 = vcvt.s32.f32 %v2657_v57 }
 0x380   : > { %v2575_v59 = vxor.u32 2147483648, %v2987_v32 }
 0x381   : > { %v2579_v26 = vsel %vm2577_vm13, %v2578_v61, %v2987_v32  ;;  %v2662_v51 = vand.u32 2147483647, %v2661_v33 }
 0x382   : > { %v2576_v14 = vsel %vm2574_vm12, %v2985_v55, %v2575_v59 }
 0x383   : > { %v2580_v3 = vsel %vm2573_vm9, %v2576_v14, %v2579_v26  ;;  %v2665_v60 = vmul.f32 %v2664_v22, %v2662_v51 }
 0x384   : > { %v2581_v15 = vsel %vm2570_vm11, nan, %v2580_v3 }
 0x385   : > { %2692 = vst [vmem:[%s3822_s12 + $0x70] sm:$0xff] %v2581_v15  ;;  %v2666_v54 = vxor.u32 2147483648, %v2665_v60 }
 0x387   : > { %v2667_v21 = vsel %vm2584_vm14, %v2666_v54, %v2665_v60 }
 0x388   : > { %v2670_v47 = vsel %vm2583_vm15, %v4749_v13, %v2667_v21 }
 0x389   : > { %2988 = vcosq.f32 %v2670_v47 }
 0x38a   : > { %2990 = vsinq.f32 %v2670_v47 }
 0x393   : > { %v2989_v6 = vpop.eup %2988 }
 0x394   : > { %v2991_v36 = vpop.eup %2990  ;;  %v2682_v52 = vxor.u32 2147483648, %v2989_v6 }
 0x395   : > { %v2679_v11 = vxor.u32 2147483648, %v2991_v36 }
 0x396   : > { %v2683_v25 = vsel %vm2681_vm6, %v2682_v52, %v2991_v36 }
 0x397   : > { %v2680_v30 = vsel %vm2678_vm10, %v2989_v6, %v2679_v11 }
 0x398   : > { %v2684_v29 = vsel %vm2677_vm3, %v2680_v30, %v2683_v25 }
 0x399   : > { %v2685_v18 = vsel %vm2674_vm2, nan, %v2684_v29 }
 0x39a   : > { %2693 = vst [vmem:[%s3822_s12 + $0x78] sm:$0xff] %v2685_v18 }
 0x39b PF: > { %s16_s21 = sadd.s32 1, %s2999_s21  }
 0x39c   : > { %p13_p4 = scmp.ge.s32.totalorder %s16_s21, 4  }
 0x39e   :  { %15 = sbr.rel (!%p13_p4) target bundleno = 1 (0x1), region = 74 }

</bundles_post_ra>
